<compile_context>
chip_gen: v6e
topology: v6e:2x2x1
jax: 0.10.0
libtpu: 0.0.40
codegen_flags: <defaults>
</compile_context>

<pallas_src>
import functools

import jax
import jax.numpy as jnp
from jax import lax
from jax.experimental import pallas as pl
from jax.experimental.pallas import tpu as pltpu


def _round_up(x, m):
    return ((x + m - 1) // m) * m


# ----------------------------------------------------------------------------
# Fused matmul + bias + activation (MXU hot path)
# ----------------------------------------------------------------------------

def _mm_bias_act_kernel(x_ref, w_ref, b_ref, o_ref, *, act):
    acc = jnp.dot(x_ref[...], w_ref[...], preferred_element_type=jnp.float32)
    acc = acc + b_ref[...]                       # (1,O) broadcast, f32 epilogue
    if act == "relu":
        acc = jnp.maximum(acc, 0.0)
    elif act == "sigmoid":
        acc = jax.nn.sigmoid(acc)
    o_ref[...] = acc.astype(o_ref.dtype)


def fused_matmul(x, w, b, act="none"):
    """x:(G,M,K) @ w:(G,K,O) + b:(O,), fused activation.

    Operands are cast to bf16 (f32 accumulation), O is padded to a multiple of
    128 for lane-dense stores, M is padded so every row tile is full.
    """
    G, M, K = x.shape
    O = w.shape[-1]

    Op = _round_up(O, 128)
    if Op != O:
        w = jnp.pad(w, ((0, 0), (0, 0), (0, Op - O)))
        b = jnp.pad(b, (0, Op - O))

    if M >= 256:
        TM = 256
    elif M >= 128:
        TM = 128
    else:
        TM = _round_up(M, 8)
    Mp = _round_up(M, TM)
    if Mp != M:
        x = jnp.pad(x, ((0, 0), (0, Mp - M), (0, 0)))

    xb = x.astype(jnp.bfloat16)
    wb = w.astype(jnp.bfloat16)
    b2 = b.reshape(1, Op).astype(jnp.float32)

    kernel = functools.partial(_mm_bias_act_kernel, act=act)
    out = pl.pallas_call(
        kernel,
        out_shape=jax.ShapeDtypeStruct((G, Mp, Op), jnp.float32),
        grid=(G, Mp // TM),
        in_specs=[
            pl.BlockSpec((None, TM, K), lambda g, i: (g, i, 0)),
            pl.BlockSpec((None, K, Op), lambda g, i: (g, 0, 0)),
            pl.BlockSpec((1, Op), lambda g, i: (0, 0)),
        ],
        out_specs=pl.BlockSpec((None, TM, Op), lambda g, i: (g, i, 0)),
        compiler_params=pltpu.CompilerParams(
            dimension_semantics=("parallel", "parallel"),
            vmem_limit_bytes=32 * 1024 * 1024),
    )(xb, wb, b2)
    return out[:, :M, :O]


# ----------------------------------------------------------------------------
# Conv2d(kernel=4, stride=2, padding=1) via im2col (patch-major columns)
# ----------------------------------------------------------------------------

def conv2d_s2(x_nhwc, w_oikk, b, act):
    O, Ci, k, _ = w_oikk.shape
    N, H, W, C = x_nhwc.shape
    Ho, Wo = H // 2, W // 2
    xb = x_nhwc.astype(jnp.bfloat16)             # bf16 patches: half the bytes
    xp = jnp.pad(xb, ((0, 0), (1, 1), (1, 1), (0, 0)))
    # TODO(synk): patch extraction still runs in XLA; an in-kernel k*k
    # "arbitrary" grid axis with shifted index_maps would remove this HBM pass.
    cols = [xp[:, p:p + 2 * Ho - 1:2, q:q + 2 * Wo - 1:2, :]
            for p in range(k) for q in range(k)]
    pat = jnp.concatenate(cols, axis=-1)                   # (N,Ho,Wo,k*k*C)
    pat = pat.reshape(1, N * Ho * Wo, k * k * C)
    # weight rows ordered (p, q, ci) to match the patch column order
    wmat = jnp.transpose(w_oikk, (2, 3, 1, 0)).reshape(1, k * k * Ci, O)
    out = fused_matmul(pat, wmat, b, act)
    return out.reshape(N, Ho, Wo, O)


# ----------------------------------------------------------------------------
# ConvTranspose2d(kernel=4, stride=2, padding=1) via sub-pixel decomposition
# ----------------------------------------------------------------------------

def conv_transpose2d_s2(x_nhwc, w_iokk, b, act):
    """Exact PyTorch ConvTranspose2d(4, stride=2, padding=1) forward.

    Output pixel (2m+ry, 2j+rx) only touches a 2x2 input window and 4 of the
    16 kernel taps, so each parity class (ry,rx) is a matmul with K = 4*Ci.
    The 4 classes are batched into one pallas_call and interleaved afterwards.
    """
    Ci, O, k, _ = w_iokk.shape                   # k == 4
    N, H, W, C = x_nhwc.shape
    xb = x_nhwc.astype(jnp.bfloat16)
    xp = jnp.pad(xb, ((0, 0), (1, 1), (1, 1), (0, 0)))
    pats, wmats = [], []
    for ry in range(2):
        for rx in range(2):
            cols = [xp[:, ry + dy:ry + dy + H, rx + dx:rx + dx + W, :]
                    for dy in range(2) for dx in range(2)]
            pats.append(
                jnp.concatenate(cols, axis=-1).reshape(N * H * W, 4 * C))
            # W'[(dy,dx,ci), o] = W[ci, o, 3-ry-2*dy, 3-rx-2*dx]
            wmats.append(jnp.concatenate(
                [w_iokk[:, :, 3 - ry - 2 * dy, 3 - rx - 2 * dx]
                 for dy in range(2) for dx in range(2)], axis=0))
    pat = jnp.stack(pats, axis=0)                # (4, M, 4*Ci), parity 2*ry+rx
    wmat = jnp.stack(wmats, axis=0)              # (4, 4*Ci, O)
    out = fused_matmul(pat, wmat, b, act)        # (4, M, O)
    out = out.reshape(2, 2, N, H, W, O)
    out = jnp.transpose(out, (2, 3, 0, 4, 1, 5)).reshape(N, 2 * H, 2 * W, O)
    return out


# ----------------------------------------------------------------------------
# Vector quantizer (tiled, codebook resident, fused VQ-loss accumulation)
# ----------------------------------------------------------------------------

def _vq_kernel(x_ref, e_ref, e2_ref, q_ref, loss_ref, *, m_valid, tm):
    i = pl.program_id(0)

    @pl.when(i == 0)
    def _():
        loss_ref[...] = jnp.zeros_like(loss_ref)

    x = x_ref[...]                               # (TM, D) f32
    e = e_ref[...]                               # (Kc, D) f32
    kc = e.shape[0]
    # ||x||^2 dropped (constant per row for the argmin); ||e||^2 precomputed.
    s = lax.dot_general(x, e, (((1,), (1,)), ((), ())),
                        preferred_element_type=jnp.float32)      # (TM, Kc)
    d = e2_ref[...] - 2.0 * s
    min_d = jnp.min(d, axis=1, keepdims=True)
    col = lax.broadcasted_iota(jnp.int32, d.shape, 1)
    idx = jnp.min(jnp.where(d <= min_d, col, kc), axis=1, keepdims=True)
    onehot = (col == idx).astype(jnp.float32)
    q = jnp.dot(onehot, e, preferred_element_type=jnp.float32)   # (TM, D)
    q_ref[...] = q

    # fused sum((z - q)^2); mask rows added by padding
    row = lax.broadcasted_iota(jnp.int32, (x.shape[0], 1), 0) + i * tm
    valid = (row < m_valid).astype(jnp.float32)
    diff = x - q
    loss_ref[...] = loss_ref[...] + jnp.sum(
        jnp.sum(diff * diff, axis=1, keepdims=True) * valid)


def vector_quantize(z_nhwc, emb):
    N, H, W, D = z_nhwc.shape
    M = N * H * W
    Kc = emb.shape[0]
    flat = z_nhwc.reshape(M, D).astype(jnp.float32)
    TM = 256 if M >= 256 else _round_up(M, 8)
    Mp = _round_up(M, TM)
    if Mp != M:
        flat = jnp.pad(flat, ((0, Mp - M), (0, 0)))
    e = emb.astype(jnp.float32)
    e2 = jnp.sum(e * e, axis=1).reshape(1, Kc)   # hoisted out of the kernel

    kernel = functools.partial(_vq_kernel, m_valid=M, tm=TM)
    quant, sqsum = pl.pallas_call(
        kernel,
        out_shape=(jax.ShapeDtypeStruct((Mp, D), jnp.float32),
                   jax.ShapeDtypeStruct((1, 1), jnp.float32)),
        grid=(Mp // TM,),
        in_specs=[pl.BlockSpec((TM, D), lambda i: (i, 0)),
                  pl.BlockSpec((Kc, D), lambda i: (0, 0)),
                  pl.BlockSpec((1, Kc), lambda i: (0, 0))],
        out_specs=(pl.BlockSpec((TM, D), lambda i: (i, 0)),
                   pl.BlockSpec((1, 1), lambda i: (0, 0))),
        compiler_params=pltpu.CompilerParams(
            dimension_semantics=("arbitrary",)),
    )(flat, e, e2)
    return quant[:M].reshape(N, H, W, D), sqsum[0, 0]


# ----------------------------------------------------------------------------
# Tiled MSE reduction (lane-dense (TR,128) blocks, resident accumulator)
# ----------------------------------------------------------------------------

def _sqdiff_kernel(a_ref, b_ref, o_ref):
    @pl.when(pl.program_id(0) == 0)
    def _():
        o_ref[...] = jnp.zeros_like(o_ref)
    d = a_ref[...] - b_ref[...]
    o_ref[...] = o_ref[...] + jnp.sum(d * d)


def mse_pallas(a, b):
    n = a.size
    lanes = 128
    af = a.reshape(-1).astype(jnp.float32)
    bf = b.reshape(-1).astype(jnp.float32)
    npad = _round_up(n, lanes)
    if npad != n:
        af = jnp.pad(af, (0, npad - n))          # zero pad contributes 0
        bf = jnp.pad(bf, (0, npad - n))
    rows = npad // lanes
    TR = 256 if rows >= 256 else _round_up(rows, 8)
    rowsp = _round_up(rows, TR)
    if rowsp != rows:
        af = jnp.pad(af, (0, (rowsp - rows) * lanes))
        bf = jnp.pad(bf, (0, (rowsp - rows) * lanes))
    a2 = af.reshape(rowsp, lanes)
    b2 = bf.reshape(rowsp, lanes)
    s = pl.pallas_call(
        _sqdiff_kernel,
        out_shape=jax.ShapeDtypeStruct((1, 1), jnp.float32),
        grid=(rowsp // TR,),
        in_specs=[pl.BlockSpec((TR, lanes), lambda i: (i, 0)),
                  pl.BlockSpec((TR, lanes), lambda i: (i, 0))],
        out_specs=pl.BlockSpec((1, 1), lambda i: (0, 0)),
        compiler_params=pltpu.CompilerParams(
            dimension_semantics=("arbitrary",)),
    )(a2, b2)
    return s[0, 0] / n


# ----------------------------------------------------------------------------
# VQVAE forward
# ----------------------------------------------------------------------------

def vqvae_forward(params, image_nchw, commitment_cost=0.25):
    x = jnp.transpose(image_nchw, (0, 2, 3, 1))       # NCHW -> NHWC
    image_nhwc = x

    # ----- encoder -----
    (w1, b1), (w2, b2), (w3, b3), (w4, b4) = params["enc"]
    x = conv2d_s2(x, w1, b1, "relu")
    x = conv2d_s2(x, w2, b2, "relu")
    x = conv2d_s2(x, w3, b3, "relu")
    z = conv2d_s2(x, w4, b4, "none")                  # (N,h,w,latent_dim)

    # ----- vector quantizer (loss-sum fused into the kernel) -----
    quant, sqsum = vector_quantize(z, params["emb"])
    # codebook_loss + commitment_cost * commitment_loss; both equal mse(z, q)
    # in the forward pass.
    qloss = (1.0 + commitment_cost) * sqsum / z.size
    # TODO(synk): straight-through estimator (x + (q - x).detach()) only
    # affects gradients; forward value is just `quant`.
    y = quant

    # ----- decoder -----
    (dw1, db1), (dw2, db2), (dw3, db3), (dw4, db4) = params["dec"]
    y = conv_transpose2d_s2(y, dw1, db1, "relu")
    y = conv_transpose2d_s2(y, dw2, db2, "relu")
    y = conv_transpose2d_s2(y, dw3, db3, "relu")
    y = conv_transpose2d_s2(y, dw4, db4, "sigmoid")

    # recon MSE on NHWC (same value as NCHW MSE, avoids an extra transpose)
    rloss = mse_pallas(y, image_nhwc)
    recon = jnp.transpose(y, (0, 3, 1, 2))            # NHWC -> NCHW
    return recon, rloss + qloss


def init_params(key, latent_dim=256, num_embeddings=128):
    keys = jax.random.split(key, 9)

    def conv_p(k, o, i):
        kw, kb = jax.random.split(k)
        w = jax.random.normal(kw, (o, i, 4, 4), jnp.float32) * 0.05
        b = jax.random.normal(kb, (o,), jnp.float32) * 0.01
        return (w, b)

    def deconv_p(k, i, o):
        kw, kb = jax.random.split(k)
        w = jax.random.normal(kw, (i, o, 4, 4), jnp.float32) * 0.05
        b = jax.random.normal(kb, (o,), jnp.float32) * 0.01
        return (w, b)

    enc = [conv_p(keys[0], 32, 3),
           conv_p(keys[1], 64, 32),
           conv_p(keys[2], 128, 64),
           conv_p(keys[3], latent_dim, 128)]
    dec = [deconv_p(keys[4], latent_dim, 128),
           deconv_p(keys[5], 128, 64),
           deconv_p(keys[6], 64, 32),
           deconv_p(keys[7], 32, 3)]
    emb = jax.random.uniform(keys[8], (num_embeddings, latent_dim),
                             jnp.float32,
                             minval=-1.0 / num_embeddings,
                             maxval=1.0 / num_embeddings)
    return {"enc": enc, "dec": dec, "emb": emb}


if __name__ == "__main__":
    key = jax.random.PRNGKey(0)
    k_img, k_par = jax.random.split(key)
    # small image: batch=2, 3 channels, 32x32 (encoder: 32->16->8->4->2)
    image = jax.random.uniform(k_img, (2, 3, 32, 32), jnp.float32)
    params = init_params(k_par, latent_dim=256, num_embeddings=128)

    fwd = jax.jit(functools.partial(vqvae_forward, commitment_cost=0.25))
    recon, loss = fwd(params, image)
    jax.block_until_ready((recon, loss))

    assert recon.shape == image.shape and recon.dtype == jnp.float32
    assert loss.shape == () and bool(jnp.isfinite(loss))
    print("KERNEL_OK")
</pallas_src>

<mosaic_0001>
module attributes {stable_mosaic.version = 11 : i64} {
  func.func @_mm_bias_act_kernel(%arg0: i32, %arg1: i32, %arg2: memref<1x256x48xbf16, #tpu.memory_space<vmem>>, %arg3: memref<1x48x128xbf16, #tpu.memory_space<vmem>>, %arg4: memref<1x128xf32, #tpu.memory_space<vmem>>, %arg5: memref<1x256x128xf32, #tpu.memory_space<vmem>>) attributes {dimension_semantics = [#tpu.dimension_semantics<parallel>, #tpu.dimension_semantics<parallel>], iteration_bounds = array<i64: 1, 2>, scalar_prefetch = 0 : i64, scratch_operands = 0 : i64, tpu.core_type = #tpu.core_type<tc>, window_params = [{transform_indices = @transform_0, window_bounds = array<i64: 1, 256, 48>}, {transform_indices = @transform_1, window_bounds = array<i64: 1, 48, 128>}, {pipeline_mode = #tpu.pipeline_mode<synchronous>, transform_indices = @transform_2, window_bounds = array<i64: 1, 128>}, {transform_indices = @transform_3, window_bounds = array<i64: 1, 256, 128>}]} {
    %c0 = arith.constant 0 : index
    %c0_0 = arith.constant 0 : index
    %c0_1 = arith.constant 0 : index
    %0 = vector.load %arg2[%c0, %c0_0, %c0_1] : memref<1x256x48xbf16, #tpu.memory_space<vmem>>, vector<1x256x48xbf16>
    %1 = vector.shape_cast %0 : vector<1x256x48xbf16> to vector<256x48xbf16>
    %c0_2 = arith.constant 0 : index
    %c0_3 = arith.constant 0 : index
    %c0_4 = arith.constant 0 : index
    %2 = vector.load %arg3[%c0_2, %c0_3, %c0_4] : memref<1x48x128xbf16, #tpu.memory_space<vmem>>, vector<1x48x128xbf16>
    %3 = vector.shape_cast %2 : vector<1x48x128xbf16> to vector<48x128xbf16>
    %cst = arith.constant dense<0.000000e+00> : vector<256x128xf32>
    %4 = tpu.matmul %1, %3, %cst {dimension_numbers = #tpu.dot_dimension_numbers<[1], [0], [0], [1], [0, 0, 1, 1], [], []>} : vector<256x48xbf16>, vector<48x128xbf16>, vector<256x128xf32> -> vector<256x128xf32>
    %c0_5 = arith.constant 0 : index
    %c0_6 = arith.constant 0 : index
    %5 = vector.load %arg4[%c0_5, %c0_6] : memref<1x128xf32, #tpu.memory_space<vmem>>, vector<1x128xf32>
    %6 = vector.broadcast %5 : vector<1x128xf32> to vector<256x128xf32>
    %7 = arith.addf %4, %6 : vector<256x128xf32>
    %cst_7 = arith.constant 0.000000e+00 : f32
    %8 = vector.broadcast %cst_7 : f32 to vector<256x128xf32>
    %9 = arith.maximumf %7, %8 : vector<256x128xf32>
    %c0_8 = arith.constant 0 : index
    %c0_9 = arith.constant 0 : index
    %c0_10 = arith.constant 0 : index
    %10 = vector.load %arg5[%c0_8, %c0_9, %c0_10] : memref<1x256x128xf32, #tpu.memory_space<vmem>>, vector<1x256x128xf32>
    %11 = vector.shape_cast %10 : vector<1x256x128xf32> to vector<256x128xf32>
    %12 = vector.shape_cast %9 : vector<256x128xf32> to vector<1x256x128xf32>
    tpu.vector_store %arg5[%c0_8, %c0_9, %c0_10], %12 {strides = array<i32>} : memref<1x256x128xf32, #tpu.memory_space<vmem>>, vector<1x256x128xf32>,
    return
  }
  func.func @transform_0(%arg0: i32, %arg1: i32) -> (i32, i32, i32) {
    %c0_i32 = arith.constant 0 : i32
    %c0_i32_0 = arith.constant 0 : i32
    return %arg0, %arg1, %c0_i32 : i32, i32, i32
  }
  func.func @transform_1(%arg0: i32, %arg1: i32) -> (i32, i32, i32) {
    %c0_i32 = arith.constant 0 : i32
    %c0_i32_0 = arith.constant 0 : i32
    %c0_i32_1 = arith.constant 0 : i32
    return %arg0, %c0_i32, %c0_i32_0 : i32, i32, i32
  }
  func.func @transform_2(%arg0: i32, %arg1: i32) -> (i32, i32) {
    %c0_i32 = arith.constant 0 : i32
    %c0_i32_0 = arith.constant 0 : i32
    %c0_i32_1 = arith.constant 0 : i32
    return %c0_i32, %c0_i32_0 : i32, i32
  }
  func.func @transform_3(%arg0: i32, %arg1: i32) -> (i32, i32, i32) {
    %c0_i32 = arith.constant 0 : i32
    %c0_i32_0 = arith.constant 0 : i32
    return %arg0, %arg1, %c0_i32 : i32, i32, i32
  }
}

module attributes {stable_mosaic.version = 11 : i64} {
  func.func @_mm_bias_act_kernel(%arg0: i32, %arg1: i32, %arg2: memref<1x128x512xbf16, #tpu.memory_space<vmem>>, %arg3: memref<1x512x128xbf16, #tpu.memory_space<vmem>>, %arg4: memref<1x128xf32, #tpu.memory_space<vmem>>, %arg5: memref<1x128x128xf32, #tpu.memory_space<vmem>>) attributes {dimension_semantics = [#tpu.dimension_semantics<parallel>, #tpu.dimension_semantics<parallel>], iteration_bounds = array<i64: 1, 1>, scalar_prefetch = 0 : i64, scratch_operands = 0 : i64, tpu.core_type = #tpu.core_type<tc>, window_params = [{transform_indices = @transform_0, window_bounds = array<i64: 1, 128, 512>}, {transform_indices = @transform_1, window_bounds = array<i64: 1, 512, 128>}, {pipeline_mode = #tpu.pipeline_mode<synchronous>, transform_indices = @transform_2, window_bounds = array<i64: 1, 128>}, {transform_indices = @transform_3, window_bounds = array<i64: 1, 128, 128>}]} {
    %c0 = arith.constant 0 : index
    %c0_0 = arith.constant 0 : index
    %c0_1 = arith.constant 0 : index
    %0 = vector.load %arg2[%c0, %c0_0, %c0_1] : memref<1x128x512xbf16, #tpu.memory_space<vmem>>, vector<1x128x512xbf16>
    %1 = vector.shape_cast %0 : vector<1x128x512xbf16> to vector<128x512xbf16>
    %c0_2 = arith.constant 0 : index
    %c0_3 = arith.constant 0 : index
    %c0_4 = arith.constant 0 : index
    %2 = vector.load %arg3[%c0_2, %c0_3, %c0_4] : memref<1x512x128xbf16, #tpu.memory_space<vmem>>, vector<1x512x128xbf16>
    %3 = vector.shape_cast %2 : vector<1x512x128xbf16> to vector<512x128xbf16>
    %cst = arith.constant dense<0.000000e+00> : vector<128x128xf32>
    %4 = tpu.matmul %1, %3, %cst {dimension_numbers = #tpu.dot_dimension_numbers<[1], [0], [0], [1], [0, 0, 1, 1], [], []>} : vector<128x512xbf16>, vector<512x128xbf16>, vector<128x128xf32> -> vector<128x128xf32>
    %c0_5 = arith.constant 0 : index
    %c0_6 = arith.constant 0 : index
    %5 = vector.load %arg4[%c0_5, %c0_6] : memref<1x128xf32, #tpu.memory_space<vmem>>, vector<1x128xf32>
    %6 = vector.broadcast %5 : vector<1x128xf32> to vector<128x128xf32>
    %7 = arith.addf %4, %6 : vector<128x128xf32>
    %cst_7 = arith.constant 0.000000e+00 : f32
    %8 = vector.broadcast %cst_7 : f32 to vector<128x128xf32>
    %9 = arith.maximumf %7, %8 : vector<128x128xf32>
    %c0_8 = arith.constant 0 : index
    %c0_9 = arith.constant 0 : index
    %c0_10 = arith.constant 0 : index
    %10 = vector.load %arg5[%c0_8, %c0_9, %c0_10] : memref<1x128x128xf32, #tpu.memory_space<vmem>>, vector<1x128x128xf32>
    %11 = vector.shape_cast %10 : vector<1x128x128xf32> to vector<128x128xf32>
    %12 = vector.shape_cast %9 : vector<128x128xf32> to vector<1x128x128xf32>
    tpu.vector_store %arg5[%c0_8, %c0_9, %c0_10], %12 {strides = array<i32>} : memref<1x128x128xf32, #tpu.memory_space<vmem>>, vector<1x128x128xf32>,
    return
  }
  func.func @transform_0(%arg0: i32, %arg1: i32) -> (i32, i32, i32) {
    %c0_i32 = arith.constant 0 : i32
    %c0_i32_0 = arith.constant 0 : i32
    return %arg0, %arg1, %c0_i32 : i32, i32, i32
  }
  func.func @transform_1(%arg0: i32, %arg1: i32) -> (i32, i32, i32) {
    %c0_i32 = arith.constant 0 : i32
    %c0_i32_0 = arith.constant 0 : i32
    %c0_i32_1 = arith.constant 0 : i32
    return %arg0, %c0_i32, %c0_i32_0 : i32, i32, i32
  }
  func.func @transform_2(%arg0: i32, %arg1: i32) -> (i32, i32) {
    %c0_i32 = arith.constant 0 : i32
    %c0_i32_0 = arith.constant 0 : i32
    %c0_i32_1 = arith.constant 0 : i32
    return %c0_i32, %c0_i32_0 : i32, i32
  }
  func.func @transform_3(%arg0: i32, %arg1: i32) -> (i32, i32, i32) {
    %c0_i32 = arith.constant 0 : i32
    %c0_i32_0 = arith.constant 0 : i32
    return %arg0, %arg1, %c0_i32 : i32, i32, i32
  }
}

module attributes {stable_mosaic.version = 11 : i64} {
  func.func @_mm_bias_act_kernel(%arg0: i32, %arg1: i32, %arg2: memref<1x32x1024xbf16, #tpu.memory_space<vmem>>, %arg3: memref<1x1024x128xbf16, #tpu.memory_space<vmem>>, %arg4: memref<1x128xf32, #tpu.memory_space<vmem>>, %arg5: memref<1x32x128xf32, #tpu.memory_space<vmem>>) attributes {dimension_semantics = [#tpu.dimension_semantics<parallel>, #tpu.dimension_semantics<parallel>], iteration_bounds = array<i64: 1, 1>, scalar_prefetch = 0 : i64, scratch_operands = 0 : i64, tpu.core_type = #tpu.core_type<tc>, window_params = [{transform_indices = @transform_0, window_bounds = array<i64: 1, 32, 1024>}, {transform_indices = @transform_1, window_bounds = array<i64: 1, 1024, 128>}, {pipeline_mode = #tpu.pipeline_mode<synchronous>, transform_indices = @transform_2, window_bounds = array<i64: 1, 128>}, {transform_indices = @transform_3, window_bounds = array<i64: 1, 32, 128>}]} {
    %c0 = arith.constant 0 : index
    %c0_0 = arith.constant 0 : index
    %c0_1 = arith.constant 0 : index
    %0 = vector.load %arg2[%c0, %c0_0, %c0_1] : memref<1x32x1024xbf16, #tpu.memory_space<vmem>>, vector<1x32x1024xbf16>
    %1 = vector.shape_cast %0 : vector<1x32x1024xbf16> to vector<32x1024xbf16>
    %c0_2 = arith.constant 0 : index
    %c0_3 = arith.constant 0 : index
    %c0_4 = arith.constant 0 : index
    %2 = vector.load %arg3[%c0_2, %c0_3, %c0_4] : memref<1x1024x128xbf16, #tpu.memory_space<vmem>>, vector<1x1024x128xbf16>
    %3 = vector.shape_cast %2 : vector<1x1024x128xbf16> to vector<1024x128xbf16>
    %cst = arith.constant dense<0.000000e+00> : vector<32x128xf32>
    %4 = tpu.matmul %1, %3, %cst {dimension_numbers = #tpu.dot_dimension_numbers<[1], [0], [0], [1], [0, 0, 1, 1], [], []>} : vector<32x1024xbf16>, vector<1024x128xbf16>, vector<32x128xf32> -> vector<32x128xf32>
    %c0_5 = arith.constant 0 : index
    %c0_6 = arith.constant 0 : index
    %5 = vector.load %arg4[%c0_5, %c0_6] : memref<1x128xf32, #tpu.memory_space<vmem>>, vector<1x128xf32>
    %6 = vector.broadcast %5 : vector<1x128xf32> to vector<32x128xf32>
    %7 = arith.addf %4, %6 : vector<32x128xf32>
    %cst_7 = arith.constant 0.000000e+00 : f32
    %8 = vector.broadcast %cst_7 : f32 to vector<32x128xf32>
    %9 = arith.maximumf %7, %8 : vector<32x128xf32>
    %c0_8 = arith.constant 0 : index
    %c0_9 = arith.constant 0 : index
    %c0_10 = arith.constant 0 : index
    %10 = vector.load %arg5[%c0_8, %c0_9, %c0_10] : memref<1x32x128xf32, #tpu.memory_space<vmem>>, vector<1x32x128xf32>
    %11 = vector.shape_cast %10 : vector<1x32x128xf32> to vector<32x128xf32>
    %12 = vector.shape_cast %9 : vector<32x128xf32> to vector<1x32x128xf32>
    tpu.vector_store %arg5[%c0_8, %c0_9, %c0_10], %12 {strides = array<i32>} : memref<1x32x128xf32, #tpu.memory_space<vmem>>, vector<1x32x128xf32>,
    return
  }
  func.func @transform_0(%arg0: i32, %arg1: i32) -> (i32, i32, i32) {
    %c0_i32 = arith.constant 0 : i32
    %c0_i32_0 = arith.constant 0 : i32
    return %arg0, %arg1, %c0_i32 : i32, i32, i32
  }
  func.func @transform_1(%arg0: i32, %arg1: i32) -> (i32, i32, i32) {
    %c0_i32 = arith.constant 0 : i32
    %c0_i32_0 = arith.constant 0 : i32
    %c0_i32_1 = arith.constant 0 : i32
    return %arg0, %c0_i32, %c0_i32_0 : i32, i32, i32
  }
  func.func @transform_2(%arg0: i32, %arg1: i32) -> (i32, i32) {
    %c0_i32 = arith.constant 0 : i32
    %c0_i32_0 = arith.constant 0 : i32
    %c0_i32_1 = arith.constant 0 : i32
    return %c0_i32, %c0_i32_0 : i32, i32
  }
  func.func @transform_3(%arg0: i32, %arg1: i32) -> (i32, i32, i32) {
    %c0_i32 = arith.constant 0 : i32
    %c0_i32_0 = arith.constant 0 : i32
    return %arg0, %arg1, %c0_i32 : i32, i32, i32
  }
}

module attributes {stable_mosaic.version = 11 : i64} {
  func.func @_mm_bias_act_kernel(%arg0: i32, %arg1: i32, %arg2: memref<1x8x2048xbf16, #tpu.memory_space<vmem>>, %arg3: memref<1x2048x256xbf16, #tpu.memory_space<vmem>>, %arg4: memref<1x256xf32, #tpu.memory_space<vmem>>, %arg5: memref<1x8x256xf32, #tpu.memory_space<vmem>>) attributes {dimension_semantics = [#tpu.dimension_semantics<parallel>, #tpu.dimension_semantics<parallel>], iteration_bounds = array<i64: 1, 1>, scalar_prefetch = 0 : i64, scratch_operands = 0 : i64, tpu.core_type = #tpu.core_type<tc>, window_params = [{transform_indices = @transform_0, window_bounds = array<i64: 1, 8, 2048>}, {transform_indices = @transform_1, window_bounds = array<i64: 1, 2048, 256>}, {pipeline_mode = #tpu.pipeline_mode<synchronous>, transform_indices = @transform_2, window_bounds = array<i64: 1, 256>}, {transform_indices = @transform_3, window_bounds = array<i64: 1, 8, 256>}]} {
    %c0 = arith.constant 0 : index
    %c0_0 = arith.constant 0 : index
    %c0_1 = arith.constant 0 : index
    %0 = vector.load %arg2[%c0, %c0_0, %c0_1] : memref<1x8x2048xbf16, #tpu.memory_space<vmem>>, vector<1x8x2048xbf16>
    %1 = vector.shape_cast %0 : vector<1x8x2048xbf16> to vector<8x2048xbf16>
    %c0_2 = arith.constant 0 : index
    %c0_3 = arith.constant 0 : index
    %c0_4 = arith.constant 0 : index
    %2 = vector.load %arg3[%c0_2, %c0_3, %c0_4] : memref<1x2048x256xbf16, #tpu.memory_space<vmem>>, vector<1x2048x256xbf16>
    %3 = vector.shape_cast %2 : vector<1x2048x256xbf16> to vector<2048x256xbf16>
    %cst = arith.constant dense<0.000000e+00> : vector<8x256xf32>
    %4 = tpu.matmul %1, %3, %cst {dimension_numbers = #tpu.dot_dimension_numbers<[1], [0], [0], [1], [0, 0, 1, 1], [], []>} : vector<8x2048xbf16>, vector<2048x256xbf16>, vector<8x256xf32> -> vector<8x256xf32>
    %c0_5 = arith.constant 0 : index
    %c0_6 = arith.constant 0 : index
    %5 = vector.load %arg4[%c0_5, %c0_6] : memref<1x256xf32, #tpu.memory_space<vmem>>, vector<1x256xf32>
    %6 = vector.broadcast %5 : vector<1x256xf32> to vector<8x256xf32>
    %7 = arith.addf %4, %6 : vector<8x256xf32>
    %c0_7 = arith.constant 0 : index
    %c0_8 = arith.constant 0 : index
    %c0_9 = arith.constant 0 : index
    %8 = vector.load %arg5[%c0_7, %c0_8, %c0_9] : memref<1x8x256xf32, #tpu.memory_space<vmem>>, vector<1x8x256xf32>
    %9 = vector.shape_cast %8 : vector<1x8x256xf32> to vector<8x256xf32>
    %10 = vector.shape_cast %7 : vector<8x256xf32> to vector<1x8x256xf32>
    tpu.vector_store %arg5[%c0_7, %c0_8, %c0_9], %10 {strides = array<i32>} : memref<1x8x256xf32, #tpu.memory_space<vmem>>, vector<1x8x256xf32>,
    return
  }
  func.func @transform_0(%arg0: i32, %arg1: i32) -> (i32, i32, i32) {
    %c0_i32 = arith.constant 0 : i32
    %c0_i32_0 = arith.constant 0 : i32
    return %arg0, %arg1, %c0_i32 : i32, i32, i32
  }
  func.func @transform_1(%arg0: i32, %arg1: i32) -> (i32, i32, i32) {
    %c0_i32 = arith.constant 0 : i32
    %c0_i32_0 = arith.constant 0 : i32
    %c0_i32_1 = arith.constant 0 : i32
    return %arg0, %c0_i32, %c0_i32_0 : i32, i32, i32
  }
  func.func @transform_2(%arg0: i32, %arg1: i32) -> (i32, i32) {
    %c0_i32 = arith.constant 0 : i32
    %c0_i32_0 = arith.constant 0 : i32
    %c0_i32_1 = arith.constant 0 : i32
    return %c0_i32, %c0_i32_0 : i32, i32
  }
  func.func @transform_3(%arg0: i32, %arg1: i32) -> (i32, i32, i32) {
    %c0_i32 = arith.constant 0 : i32
    %c0_i32_0 = arith.constant 0 : i32
    return %arg0, %arg1, %c0_i32 : i32, i32, i32
  }
}

module attributes {stable_mosaic.version = 11 : i64} {
  func.func @_vq_kernel(%arg0: i32, %arg1: memref<8x256xf32, #tpu.memory_space<vmem>>, %arg2: memref<128x256xf32, #tpu.memory_space<vmem>>, %arg3: memref<1x128xf32, #tpu.memory_space<vmem>>, %arg4: memref<8x256xf32, #tpu.memory_space<vmem>>, %arg5: memref<1x1xf32, #tpu.memory_space<vmem>>) attributes {dimension_semantics = [#tpu.dimension_semantics<arbitrary>], iteration_bounds = array<i64: 1>, scalar_prefetch = 0 : i64, scratch_operands = 0 : i64, tpu.core_type = #tpu.core_type<tc>, window_params = [{transform_indices = @transform_0, window_bounds = array<i64: 8, 256>}, {pipeline_mode = #tpu.pipeline_mode<synchronous>, transform_indices = @transform_1, window_bounds = array<i64: 128, 256>}, {pipeline_mode = #tpu.pipeline_mode<synchronous>, transform_indices = @transform_2, window_bounds = array<i64: 1, 128>}, {transform_indices = @transform_3, window_bounds = array<i64: 8, 256>}, {pipeline_mode = #tpu.pipeline_mode<synchronous>, transform_indices = @transform_4, window_bounds = array<i64: 1, 1>}]} {
    %c0_i32 = arith.constant 0 : i32
    %0 = arith.cmpi eq, %arg0, %c0_i32 : i32
    %1 = arith.extui %0 : i1 to i32
    %c0_i32_0 = arith.constant 0 : i32
    %2 = arith.cmpi ne, %1, %c0_i32_0 : i32
    scf.if %2 {
      %cst_19 = arith.constant 0.000000e+00 : f32
      %47 = vector.broadcast %cst_19 : f32 to vector<1x1xf32>
      %c0_20 = arith.constant 0 : index
      %c0_21 = arith.constant 0 : index
      %48 = vector.load %arg5[%c0_20, %c0_21] : memref<1x1xf32, #tpu.memory_space<vmem>>, vector<1x1xf32>
      tpu.vector_store %arg5[%c0_20, %c0_21], %47 {strides = array<i32>} : memref<1x1xf32, #tpu.memory_space<vmem>>, vector<1x1xf32>,
    } else {
    }
    %c0 = arith.constant 0 : index
    %c0_1 = arith.constant 0 : index
    %3 = vector.load %arg1[%c0, %c0_1] : memref<8x256xf32, #tpu.memory_space<vmem>>, vector<8x256xf32>
    %c0_2 = arith.constant 0 : index
    %c0_3 = arith.constant 0 : index
    %4 = vector.load %arg2[%c0_2, %c0_3] : memref<128x256xf32, #tpu.memory_space<vmem>>, vector<128x256xf32>
    %cst = arith.constant dense<0.000000e+00> : vector<8x128xf32>
    %5 = tpu.matmul %3, %4, %cst {dimension_numbers = #tpu.dot_dimension_numbers<[1], [1], [0], [0], [0, 0, 1, 0], [], []>} : vector<8x256xf32>, vector<128x256xf32>, vector<8x128xf32> -> vector<8x128xf32>
    %c0_4 = arith.constant 0 : index
    %c0_5 = arith.constant 0 : index
    %6 = vector.load %arg3[%c0_4, %c0_5] : memref<1x128xf32, #tpu.memory_space<vmem>>, vector<1x128xf32>
    %cst_6 = arith.constant 2.000000e+00 : f32
    %7 = vector.broadcast %cst_6 : f32 to vector<8x128xf32>
    %8 = arith.mulf %7, %5 : vector<8x128xf32>
    %9 = vector.broadcast %6 : vector<1x128xf32> to vector<8x128xf32>
    %10 = arith.subf %9, %8 : vector<8x128xf32>
    %cst_7 = arith.constant dense<0x7F800000> : vector<8xf32>
    %11 = vector.multi_reduction <minimumf>, %10, %cst_7 [1] : vector<8x128xf32> to vector<8xf32>
    %12 = vector.shape_cast %11 : vector<8xf32> to vector<8x1xf32>
    %13 = tpu.iota {dimensions = array<i32: 1>} : vector<8x128xi32>
    %14 = vector.broadcast %12 : vector<8x1xf32> to vector<8x128xf32>
    %15 = arith.cmpf ole, %10, %14 : vector<8x128xf32>
    %c128_i32 = arith.constant 128 : i32
    %16 = vector.broadcast %c128_i32 : i32 to vector<8x128xi32>
    %17 = arith.select %15, %13, %16 : vector<8x128xi1>, vector<8x128xi32>
    %cst_8 = arith.constant dense<2147483647> : vector<8xi32>
    %18 = vector.multi_reduction <minsi>, %17, %cst_8 [1] : vector<8x128xi32> to vector<8xi32>
    %19 = vector.shape_cast %18 : vector<8xi32> to vector<8x1xi32>
    %20 = vector.broadcast %19 : vector<8x1xi32> to vector<8x128xi32>
    %21 = arith.cmpi eq, %13, %20 : vector<8x128xi32>
    %22 = arith.extui %21 : vector<8x128xi1> to vector<8x128xi32>
    %23 = arith.sitofp %22 : vector<8x128xi32> to vector<8x128xf32>
    %cst_9 = arith.constant dense<0.000000e+00> : vector<8x256xf32>
    %24 = tpu.matmul %23, %4, %cst_9 {dimension_numbers = #tpu.dot_dimension_numbers<[1], [0], [0], [1], [0, 0, 1, 1], [], []>} : vector<8x128xf32>, vector<128x256xf32>, vector<8x256xf32> -> vector<8x256xf32>
    %c0_10 = arith.constant 0 : index
    %c0_11 = arith.constant 0 : index
    %25 = vector.load %arg4[%c0_10, %c0_11] : memref<8x256xf32, #tpu.memory_space<vmem>>, vector<8x256xf32>
    tpu.vector_store %arg4[%c0_10, %c0_11], %24 {strides = array<i32>} : memref<8x256xf32, #tpu.memory_space<vmem>>, vector<8x256xf32>,
    %26 = tpu.iota {dimensions = array<i32: 0>} : vector<8x1xi32>
    %c8_i32 = arith.constant 8 : i32
    %27 = arith.muli %arg0, %c8_i32 : i32
    %28 = vector.broadcast %27 : i32 to vector<8x1xi32>
    %29 = arith.addi %26, %28 : vector<8x1xi32>
    %c8_i32_12 = arith.constant 8 : i32
    %30 = vector.broadcast %c8_i32_12 : i32 to vector<8x1xi32>
    %31 = arith.cmpi slt, %29, %30 : vector<8x1xi32>
    %32 = arith.extui %31 : vector<8x1xi1> to vector<8x1xi32>
    %33 = arith.sitofp %32 : vector<8x1xi32> to vector<8x1xf32>
    %34 = arith.subf %3, %24 : vector<8x256xf32>
    %c0_13 = arith.constant 0 : index
    %c0_14 = arith.constant 0 : index
    %35 = vector.load %arg5[%c0_13, %c0_14] : memref<1x1xf32, #tpu.memory_space<vmem>>, vector<1x1xf32>
    %36 = arith.mulf %34, %34 : vector<8x256xf32>
    %cst_15 = arith.constant dense<0.000000e+00> : vector<8xf32>
    %37 = vector.multi_reduction <add>, %36, %cst_15 [1] : vector<8x256xf32> to vector<8xf32>
    %38 = vector.shape_cast %37 : vector<8xf32> to vector<8x1xf32>
    %39 = arith.mulf %38, %33 : vector<8x1xf32>
    %40 = vector.shape_cast %39 : vector<8x1xf32> to vector<1x8x1xf32>
    %cst_16 = arith.constant dense<0.000000e+00> : vector<1xf32>
    %41 = vector.multi_reduction <add>, %40, %cst_16 [1, 2] : vector<1x8x1xf32> to vector<1xf32>
    %42 = vector.shape_cast %41 : vector<1xf32> to vector<1x1x1xf32>
    %43 = vector.extract %42[0, 0, 0] : f32 from vector<1x1x1xf32>
    %44 = vector.broadcast %43 : f32 to vector<1x1xf32>
    %45 = arith.addf %35, %44 : vector<1x1xf32>
    %c0_17 = arith.constant 0 : index
    %c0_18 = arith.constant 0 : index
    %46 = vector.load %arg5[%c0_17, %c0_18] : memref<1x1xf32, #tpu.memory_space<vmem>>, vector<1x1xf32>
    tpu.vector_store %arg5[%c0_17, %c0_18], %45 {strides = array<i32>} : memref<1x1xf32, #tpu.memory_space<vmem>>, vector<1x1xf32>,
    return
  }
  func.func @transform_0(%arg0: i32) -> (i32, i32) {
    %c0_i32 = arith.constant 0 : i32
    %c0_i32_0 = arith.constant 0 : i32
    return %arg0, %c0_i32 : i32, i32
  }
  func.func @transform_1(%arg0: i32) -> (i32, i32) {
    %c0_i32 = arith.constant 0 : i32
    %c0_i32_0 = arith.constant 0 : i32
    %c0_i32_1 = arith.constant 0 : i32
    return %c0_i32, %c0_i32_0 : i32, i32
  }
  func.func @transform_2(%arg0: i32) -> (i32, i32) {
    %c0_i32 = arith.constant 0 : i32
    %c0_i32_0 = arith.constant 0 : i32
    %c0_i32_1 = arith.constant 0 : i32
    return %c0_i32, %c0_i32_0 : i32, i32
  }
  func.func @transform_3(%arg0: i32) -> (i32, i32) {
    %c0_i32 = arith.constant 0 : i32
    %c0_i32_0 = arith.constant 0 : i32
    return %arg0, %c0_i32 : i32, i32
  }
  func.func @transform_4(%arg0: i32) -> (i32, i32) {
    %c0_i32 = arith.constant 0 : i32
    %c0_i32_0 = arith.constant 0 : i32
    %c0_i32_1 = arith.constant 0 : i32
    return %c0_i32, %c0_i32_0 : i32, i32
  }
}

module attributes {stable_mosaic.version = 11 : i64} {
  func.func @_mm_bias_act_kernel(%arg0: i32, %arg1: i32, %arg2: memref<1x8x1024xbf16, #tpu.memory_space<vmem>>, %arg3: memref<1x1024x128xbf16, #tpu.memory_space<vmem>>, %arg4: memref<1x128xf32, #tpu.memory_space<vmem>>, %arg5: memref<1x8x128xf32, #tpu.memory_space<vmem>>) attributes {dimension_semantics = [#tpu.dimension_semantics<parallel>, #tpu.dimension_semantics<parallel>], iteration_bounds = array<i64: 4, 1>, scalar_prefetch = 0 : i64, scratch_operands = 0 : i64, tpu.core_type = #tpu.core_type<tc>, window_params = [{transform_indices = @transform_0, window_bounds = array<i64: 1, 8, 1024>}, {transform_indices = @transform_1, window_bounds = array<i64: 1, 1024, 128>}, {pipeline_mode = #tpu.pipeline_mode<synchronous>, transform_indices = @transform_2, window_bounds = array<i64: 1, 128>}, {transform_indices = @transform_3, window_bounds = array<i64: 1, 8, 128>}]} {
    %c0 = arith.constant 0 : index
    %c0_0 = arith.constant 0 : index
    %c0_1 = arith.constant 0 : index
    %0 = vector.load %arg2[%c0, %c0_0, %c0_1] : memref<1x8x1024xbf16, #tpu.memory_space<vmem>>, vector<1x8x1024xbf16>
    %1 = vector.shape_cast %0 : vector<1x8x1024xbf16> to vector<8x1024xbf16>
    %c0_2 = arith.constant 0 : index
    %c0_3 = arith.constant 0 : index
    %c0_4 = arith.constant 0 : index
    %2 = vector.load %arg3[%c0_2, %c0_3, %c0_4] : memref<1x1024x128xbf16, #tpu.memory_space<vmem>>, vector<1x1024x128xbf16>
    %3 = vector.shape_cast %2 : vector<1x1024x128xbf16> to vector<1024x128xbf16>
    %cst = arith.constant dense<0.000000e+00> : vector<8x128xf32>
    %4 = tpu.matmul %1, %3, %cst {dimension_numbers = #tpu.dot_dimension_numbers<[1], [0], [0], [1], [0, 0, 1, 1], [], []>} : vector<8x1024xbf16>, vector<1024x128xbf16>, vector<8x128xf32> -> vector<8x128xf32>
    %c0_5 = arith.constant 0 : index
    %c0_6 = arith.constant 0 : index
    %5 = vector.load %arg4[%c0_5, %c0_6] : memref<1x128xf32, #tpu.memory_space<vmem>>, vector<1x128xf32>
    %6 = vector.broadcast %5 : vector<1x128xf32> to vector<8x128xf32>
    %7 = arith.addf %4, %6 : vector<8x128xf32>
    %cst_7 = arith.constant 0.000000e+00 : f32
    %8 = vector.broadcast %cst_7 : f32 to vector<8x128xf32>
    %9 = arith.maximumf %7, %8 : vector<8x128xf32>
    %c0_8 = arith.constant 0 : index
    %c0_9 = arith.constant 0 : index
    %c0_10 = arith.constant 0 : index
    %10 = vector.load %arg5[%c0_8, %c0_9, %c0_10] : memref<1x8x128xf32, #tpu.memory_space<vmem>>, vector<1x8x128xf32>
    %11 = vector.shape_cast %10 : vector<1x8x128xf32> to vector<8x128xf32>
    %12 = vector.shape_cast %9 : vector<8x128xf32> to vector<1x8x128xf32>
    tpu.vector_store %arg5[%c0_8, %c0_9, %c0_10], %12 {strides = array<i32>} : memref<1x8x128xf32, #tpu.memory_space<vmem>>, vector<1x8x128xf32>,
    return
  }
  func.func @transform_0(%arg0: i32, %arg1: i32) -> (i32, i32, i32) {
    %c0_i32 = arith.constant 0 : i32
    %c0_i32_0 = arith.constant 0 : i32
    return %arg0, %arg1, %c0_i32 : i32, i32, i32
  }
  func.func @transform_1(%arg0: i32, %arg1: i32) -> (i32, i32, i32) {
    %c0_i32 = arith.constant 0 : i32
    %c0_i32_0 = arith.constant 0 : i32
    %c0_i32_1 = arith.constant 0 : i32
    return %arg0, %c0_i32, %c0_i32_0 : i32, i32, i32
  }
  func.func @transform_2(%arg0: i32, %arg1: i32) -> (i32, i32) {
    %c0_i32 = arith.constant 0 : i32
    %c0_i32_0 = arith.constant 0 : i32
    %c0_i32_1 = arith.constant 0 : i32
    return %c0_i32, %c0_i32_0 : i32, i32
  }
  func.func @transform_3(%arg0: i32, %arg1: i32) -> (i32, i32, i32) {
    %c0_i32 = arith.constant 0 : i32
    %c0_i32_0 = arith.constant 0 : i32
    return %arg0, %arg1, %c0_i32 : i32, i32, i32
  }
}

module attributes {stable_mosaic.version = 11 : i64} {
  func.func @_mm_bias_act_kernel(%arg0: i32, %arg1: i32, %arg2: memref<1x32x512xbf16, #tpu.memory_space<vmem>>, %arg3: memref<1x512x128xbf16, #tpu.memory_space<vmem>>, %arg4: memref<1x128xf32, #tpu.memory_space<vmem>>, %arg5: memref<1x32x128xf32, #tpu.memory_space<vmem>>) attributes {dimension_semantics = [#tpu.dimension_semantics<parallel>, #tpu.dimension_semantics<parallel>], iteration_bounds = array<i64: 4, 1>, scalar_prefetch = 0 : i64, scratch_operands = 0 : i64, tpu.core_type = #tpu.core_type<tc>, window_params = [{transform_indices = @transform_0, window_bounds = array<i64: 1, 32, 512>}, {transform_indices = @transform_1, window_bounds = array<i64: 1, 512, 128>}, {pipeline_mode = #tpu.pipeline_mode<synchronous>, transform_indices = @transform_2, window_bounds = array<i64: 1, 128>}, {transform_indices = @transform_3, window_bounds = array<i64: 1, 32, 128>}]} {
    %c0 = arith.constant 0 : index
    %c0_0 = arith.constant 0 : index
    %c0_1 = arith.constant 0 : index
    %0 = vector.load %arg2[%c0, %c0_0, %c0_1] : memref<1x32x512xbf16, #tpu.memory_space<vmem>>, vector<1x32x512xbf16>
    %1 = vector.shape_cast %0 : vector<1x32x512xbf16> to vector<32x512xbf16>
    %c0_2 = arith.constant 0 : index
    %c0_3 = arith.constant 0 : index
    %c0_4 = arith.constant 0 : index
    %2 = vector.load %arg3[%c0_2, %c0_3, %c0_4] : memref<1x512x128xbf16, #tpu.memory_space<vmem>>, vector<1x512x128xbf16>
    %3 = vector.shape_cast %2 : vector<1x512x128xbf16> to vector<512x128xbf16>
    %cst = arith.constant dense<0.000000e+00> : vector<32x128xf32>
    %4 = tpu.matmul %1, %3, %cst {dimension_numbers = #tpu.dot_dimension_numbers<[1], [0], [0], [1], [0, 0, 1, 1], [], []>} : vector<32x512xbf16>, vector<512x128xbf16>, vector<32x128xf32> -> vector<32x128xf32>
    %c0_5 = arith.constant 0 : index
    %c0_6 = arith.constant 0 : index
    %5 = vector.load %arg4[%c0_5, %c0_6] : memref<1x128xf32, #tpu.memory_space<vmem>>, vector<1x128xf32>
    %6 = vector.broadcast %5 : vector<1x128xf32> to vector<32x128xf32>
    %7 = arith.addf %4, %6 : vector<32x128xf32>
    %cst_7 = arith.constant 0.000000e+00 : f32
    %8 = vector.broadcast %cst_7 : f32 to vector<32x128xf32>
    %9 = arith.maximumf %7, %8 : vector<32x128xf32>
    %c0_8 = arith.constant 0 : index
    %c0_9 = arith.constant 0 : index
    %c0_10 = arith.constant 0 : index
    %10 = vector.load %arg5[%c0_8, %c0_9, %c0_10] : memref<1x32x128xf32, #tpu.memory_space<vmem>>, vector<1x32x128xf32>
    %11 = vector.shape_cast %10 : vector<1x32x128xf32> to vector<32x128xf32>
    %12 = vector.shape_cast %9 : vector<32x128xf32> to vector<1x32x128xf32>
    tpu.vector_store %arg5[%c0_8, %c0_9, %c0_10], %12 {strides = array<i32>} : memref<1x32x128xf32, #tpu.memory_space<vmem>>, vector<1x32x128xf32>,
    return
  }
  func.func @transform_0(%arg0: i32, %arg1: i32) -> (i32, i32, i32) {
    %c0_i32 = arith.constant 0 : i32
    %c0_i32_0 = arith.constant 0 : i32
    return %arg0, %arg1, %c0_i32 : i32, i32, i32
  }
  func.func @transform_1(%arg0: i32, %arg1: i32) -> (i32, i32, i32) {
    %c0_i32 = arith.constant 0 : i32
    %c0_i32_0 = arith.constant 0 : i32
    %c0_i32_1 = arith.constant 0 : i32
    return %arg0, %c0_i32, %c0_i32_0 : i32, i32, i32
  }
  func.func @transform_2(%arg0: i32, %arg1: i32) -> (i32, i32) {
    %c0_i32 = arith.constant 0 : i32
    %c0_i32_0 = arith.constant 0 : i32
    %c0_i32_1 = arith.constant 0 : i32
    return %c0_i32, %c0_i32_0 : i32, i32
  }
  func.func @transform_3(%arg0: i32, %arg1: i32) -> (i32, i32, i32) {
    %c0_i32 = arith.constant 0 : i32
    %c0_i32_0 = arith.constant 0 : i32
    return %arg0, %arg1, %c0_i32 : i32, i32, i32
  }
}

module attributes {stable_mosaic.version = 11 : i64} {
  func.func @_mm_bias_act_kernel(%arg0: i32, %arg1: i32, %arg2: memref<1x128x256xbf16, #tpu.memory_space<vmem>>, %arg3: memref<1x256x128xbf16, #tpu.memory_space<vmem>>, %arg4: memref<1x128xf32, #tpu.memory_space<vmem>>, %arg5: memref<1x128x128xf32, #tpu.memory_space<vmem>>) attributes {dimension_semantics = [#tpu.dimension_semantics<parallel>, #tpu.dimension_semantics<parallel>], iteration_bounds = array<i64: 4, 1>, scalar_prefetch = 0 : i64, scratch_operands = 0 : i64, tpu.core_type = #tpu.core_type<tc>, window_params = [{transform_indices = @transform_0, window_bounds = array<i64: 1, 128, 256>}, {transform_indices = @transform_1, window_bounds = array<i64: 1, 256, 128>}, {pipeline_mode = #tpu.pipeline_mode<synchronous>, transform_indices = @transform_2, window_bounds = array<i64: 1, 128>}, {transform_indices = @transform_3, window_bounds = array<i64: 1, 128, 128>}]} {
    %c0 = arith.constant 0 : index
    %c0_0 = arith.constant 0 : index
    %c0_1 = arith.constant 0 : index
    %0 = vector.load %arg2[%c0, %c0_0, %c0_1] : memref<1x128x256xbf16, #tpu.memory_space<vmem>>, vector<1x128x256xbf16>
    %1 = vector.shape_cast %0 : vector<1x128x256xbf16> to vector<128x256xbf16>
    %c0_2 = arith.constant 0 : index
    %c0_3 = arith.constant 0 : index
    %c0_4 = arith.constant 0 : index
    %2 = vector.load %arg3[%c0_2, %c0_3, %c0_4] : memref<1x256x128xbf16, #tpu.memory_space<vmem>>, vector<1x256x128xbf16>
    %3 = vector.shape_cast %2 : vector<1x256x128xbf16> to vector<256x128xbf16>
    %cst = arith.constant dense<0.000000e+00> : vector<128x128xf32>
    %4 = tpu.matmul %1, %3, %cst {dimension_numbers = #tpu.dot_dimension_numbers<[1], [0], [0], [1], [0, 0, 1, 1], [], []>} : vector<128x256xbf16>, vector<256x128xbf16>, vector<128x128xf32> -> vector<128x128xf32>
    %c0_5 = arith.constant 0 : index
    %c0_6 = arith.constant 0 : index
    %5 = vector.load %arg4[%c0_5, %c0_6] : memref<1x128xf32, #tpu.memory_space<vmem>>, vector<1x128xf32>
    %6 = vector.broadcast %5 : vector<1x128xf32> to vector<128x128xf32>
    %7 = arith.addf %4, %6 : vector<128x128xf32>
    %cst_7 = arith.constant 0.000000e+00 : f32
    %8 = vector.broadcast %cst_7 : f32 to vector<128x128xf32>
    %9 = arith.maximumf %7, %8 : vector<128x128xf32>
    %c0_8 = arith.constant 0 : index
    %c0_9 = arith.constant 0 : index
    %c0_10 = arith.constant 0 : index
    %10 = vector.load %arg5[%c0_8, %c0_9, %c0_10] : memref<1x128x128xf32, #tpu.memory_space<vmem>>, vector<1x128x128xf32>
    %11 = vector.shape_cast %10 : vector<1x128x128xf32> to vector<128x128xf32>
    %12 = vector.shape_cast %9 : vector<128x128xf32> to vector<1x128x128xf32>
    tpu.vector_store %arg5[%c0_8, %c0_9, %c0_10], %12 {strides = array<i32>} : memref<1x128x128xf32, #tpu.memory_space<vmem>>, vector<1x128x128xf32>,
    return
  }
  func.func @transform_0(%arg0: i32, %arg1: i32) -> (i32, i32, i32) {
    %c0_i32 = arith.constant 0 : i32
    %c0_i32_0 = arith.constant 0 : i32
    return %arg0, %arg1, %c0_i32 : i32, i32, i32
  }
  func.func @transform_1(%arg0: i32, %arg1: i32) -> (i32, i32, i32) {
    %c0_i32 = arith.constant 0 : i32
    %c0_i32_0 = arith.constant 0 : i32
    %c0_i32_1 = arith.constant 0 : i32
    return %arg0, %c0_i32, %c0_i32_0 : i32, i32, i32
  }
  func.func @transform_2(%arg0: i32, %arg1: i32) -> (i32, i32) {
    %c0_i32 = arith.constant 0 : i32
    %c0_i32_0 = arith.constant 0 : i32
    %c0_i32_1 = arith.constant 0 : i32
    return %c0_i32, %c0_i32_0 : i32, i32
  }
  func.func @transform_3(%arg0: i32, %arg1: i32) -> (i32, i32, i32) {
    %c0_i32 = arith.constant 0 : i32
    %c0_i32_0 = arith.constant 0 : i32
    return %arg0, %arg1, %c0_i32 : i32, i32, i32
  }
}

module attributes {stable_mosaic.version = 11 : i64} {
  func.func @_mm_bias_act_kernel(%arg0: i32, %arg1: i32, %arg2: memref<1x256x128xbf16, #tpu.memory_space<vmem>>, %arg3: memref<1x128x128xbf16, #tpu.memory_space<vmem>>, %arg4: memref<1x128xf32, #tpu.memory_space<vmem>>, %arg5: memref<1x256x128xf32, #tpu.memory_space<vmem>>) attributes {dimension_semantics = [#tpu.dimension_semantics<parallel>, #tpu.dimension_semantics<parallel>], iteration_bounds = array<i64: 4, 2>, scalar_prefetch = 0 : i64, scratch_operands = 0 : i64, tpu.core_type = #tpu.core_type<tc>, window_params = [{transform_indices = @transform_0, window_bounds = array<i64: 1, 256, 128>}, {transform_indices = @transform_1, window_bounds = array<i64: 1, 128, 128>}, {pipeline_mode = #tpu.pipeline_mode<synchronous>, transform_indices = @transform_2, window_bounds = array<i64: 1, 128>}, {transform_indices = @transform_3, window_bounds = array<i64: 1, 256, 128>}]} {
    %c0 = arith.constant 0 : index
    %c0_0 = arith.constant 0 : index
    %c0_1 = arith.constant 0 : index
    %0 = vector.load %arg2[%c0, %c0_0, %c0_1] : memref<1x256x128xbf16, #tpu.memory_space<vmem>>, vector<1x256x128xbf16>
    %1 = vector.shape_cast %0 : vector<1x256x128xbf16> to vector<256x128xbf16>
    %c0_2 = arith.constant 0 : index
    %c0_3 = arith.constant 0 : index
    %c0_4 = arith.constant 0 : index
    %2 = vector.load %arg3[%c0_2, %c0_3, %c0_4] : memref<1x128x128xbf16, #tpu.memory_space<vmem>>, vector<1x128x128xbf16>
    %3 = vector.shape_cast %2 : vector<1x128x128xbf16> to vector<128x128xbf16>
    %cst = arith.constant dense<0.000000e+00> : vector<256x128xf32>
    %4 = tpu.matmul %1, %3, %cst {dimension_numbers = #tpu.dot_dimension_numbers<[1], [0], [0], [1], [0, 0, 1, 1], [], []>} : vector<256x128xbf16>, vector<128x128xbf16>, vector<256x128xf32> -> vector<256x128xf32>
    %c0_5 = arith.constant 0 : index
    %c0_6 = arith.constant 0 : index
    %5 = vector.load %arg4[%c0_5, %c0_6] : memref<1x128xf32, #tpu.memory_space<vmem>>, vector<1x128xf32>
    %6 = vector.broadcast %5 : vector<1x128xf32> to vector<256x128xf32>
    %7 = arith.addf %4, %6 : vector<256x128xf32>
    %8 = arith.negf %7 : vector<256x128xf32>
    %9 = math.exp %8 : vector<256x128xf32>
    %cst_7 = arith.constant 1.000000e+00 : f32
    %10 = vector.broadcast %cst_7 : f32 to vector<256x128xf32>
    %11 = arith.addf %10, %9 : vector<256x128xf32>
    %12 = arith.divf %10, %11 : vector<256x128xf32>
    %c0_8 = arith.constant 0 : index
    %c0_9 = arith.constant 0 : index
    %c0_10 = arith.constant 0 : index
    %13 = vector.load %arg5[%c0_8, %c0_9, %c0_10] : memref<1x256x128xf32, #tpu.memory_space<vmem>>, vector<1x256x128xf32>
    %14 = vector.shape_cast %13 : vector<1x256x128xf32> to vector<256x128xf32>
    %15 = vector.shape_cast %12 : vector<256x128xf32> to vector<1x256x128xf32>
    tpu.vector_store %arg5[%c0_8, %c0_9, %c0_10], %15 {strides = array<i32>} : memref<1x256x128xf32, #tpu.memory_space<vmem>>, vector<1x256x128xf32>,
    return
  }
  func.func @transform_0(%arg0: i32, %arg1: i32) -> (i32, i32, i32) {
    %c0_i32 = arith.constant 0 : i32
    %c0_i32_0 = arith.constant 0 : i32
    return %arg0, %arg1, %c0_i32 : i32, i32, i32
  }
  func.func @transform_1(%arg0: i32, %arg1: i32) -> (i32, i32, i32) {
    %c0_i32 = arith.constant 0 : i32
    %c0_i32_0 = arith.constant 0 : i32
    %c0_i32_1 = arith.constant 0 : i32
    return %arg0, %c0_i32, %c0_i32_0 : i32, i32, i32
  }
  func.func @transform_2(%arg0: i32, %arg1: i32) -> (i32, i32) {
    %c0_i32 = arith.constant 0 : i32
    %c0_i32_0 = arith.constant 0 : i32
    %c0_i32_1 = arith.constant 0 : i32
    return %c0_i32, %c0_i32_0 : i32, i32
  }
  func.func @transform_3(%arg0: i32, %arg1: i32) -> (i32, i32, i32) {
    %c0_i32 = arith.constant 0 : i32
    %c0_i32_0 = arith.constant 0 : i32
    return %arg0, %arg1, %c0_i32 : i32, i32, i32
  }
}

module attributes {stable_mosaic.version = 11 : i64} {
  func.func @_sqdiff_kernel(%arg0: i32, %arg1: memref<48x128xf32, #tpu.memory_space<vmem>>, %arg2: memref<48x128xf32, #tpu.memory_space<vmem>>, %arg3: memref<1x1xf32, #tpu.memory_space<vmem>>) attributes {dimension_semantics = [#tpu.dimension_semantics<arbitrary>], iteration_bounds = array<i64: 1>, scalar_prefetch = 0 : i64, scratch_operands = 0 : i64, tpu.core_type = #tpu.core_type<tc>, window_params = [{transform_indices = @transform_0, window_bounds = array<i64: 48, 128>}, {transform_indices = @transform_1, window_bounds = array<i64: 48, 128>}, {pipeline_mode = #tpu.pipeline_mode<synchronous>, transform_indices = @transform_2, window_bounds = array<i64: 1, 1>}]} {
    %c0_i32 = arith.constant 0 : i32
    %0 = arith.cmpi eq, %arg0, %c0_i32 : i32
    %1 = arith.extui %0 : i1 to i32
    %c0_i32_0 = arith.constant 0 : i32
    %2 = arith.cmpi ne, %1, %c0_i32_0 : i32
    scf.if %2 {
      %cst_8 = arith.constant 0.000000e+00 : f32
      %15 = vector.broadcast %cst_8 : f32 to vector<1x1xf32>
      %c0_9 = arith.constant 0 : index
      %c0_10 = arith.constant 0 : index
      %16 = vector.load %arg3[%c0_9, %c0_10] : memref<1x1xf32, #tpu.memory_space<vmem>>, vector<1x1xf32>
      tpu.vector_store %arg3[%c0_9, %c0_10], %15 {strides = array<i32>} : memref<1x1xf32, #tpu.memory_space<vmem>>, vector<1x1xf32>,
    } else {
    }
    %c0 = arith.constant 0 : index
    %c0_1 = arith.constant 0 : index
    %3 = vector.load %arg1[%c0, %c0_1] : memref<48x128xf32, #tpu.memory_space<vmem>>, vector<48x128xf32>
    %c0_2 = arith.constant 0 : index
    %c0_3 = arith.constant 0 : index
    %4 = vector.load %arg2[%c0_2, %c0_3] : memref<48x128xf32, #tpu.memory_space<vmem>>, vector<48x128xf32>
    %5 = arith.subf %3, %4 : vector<48x128xf32>
    %c0_4 = arith.constant 0 : index
    %c0_5 = arith.constant 0 : index
    %6 = vector.load %arg3[%c0_4, %c0_5] : memref<1x1xf32, #tpu.memory_space<vmem>>, vector<1x1xf32>
    %7 = arith.mulf %5, %5 : vector<48x128xf32>
    %8 = vector.shape_cast %7 : vector<48x128xf32> to vector<1x48x128xf32>
    %cst = arith.constant dense<0.000000e+00> : vector<1xf32>
    %9 = vector.multi_reduction <add>, %8, %cst [1, 2] : vector<1x48x128xf32> to vector<1xf32>
    %10 = vector.shape_cast %9 : vector<1xf32> to vector<1x1x1xf32>
    %11 = vector.extract %10[0, 0, 0] : f32 from vector<1x1x1xf32>
    %12 = vector.broadcast %11 : f32 to vector<1x1xf32>
    %13 = arith.addf %6, %12 : vector<1x1xf32>
    %c0_6 = arith.constant 0 : index
    %c0_7 = arith.constant 0 : index
    %14 = vector.load %arg3[%c0_6, %c0_7] : memref<1x1xf32, #tpu.memory_space<vmem>>, vector<1x1xf32>
    tpu.vector_store %arg3[%c0_6, %c0_7], %13 {strides = array<i32>} : memref<1x1xf32, #tpu.memory_space<vmem>>, vector<1x1xf32>,
    return
  }
  func.func @transform_0(%arg0: i32) -> (i32, i32) {
    %c0_i32 = arith.constant 0 : i32
    %c0_i32_0 = arith.constant 0 : i32
    return %arg0, %c0_i32 : i32, i32
  }
  func.func @transform_1(%arg0: i32) -> (i32, i32) {
    %c0_i32 = arith.constant 0 : i32
    %c0_i32_0 = arith.constant 0 : i32
    return %arg0, %c0_i32 : i32, i32
  }
  func.func @transform_2(%arg0: i32) -> (i32, i32) {
    %c0_i32 = arith.constant 0 : i32
    %c0_i32_0 = arith.constant 0 : i32
    %c0_i32_1 = arith.constant 0 : i32
    return %c0_i32, %c0_i32_0 : i32, i32
  }
}

</mosaic_0001>

<bundles_post_ra>
// kernel: vqvae_forward.10
= control target key start
LH: loop header
LB: loop body
LE: loop exit
PB: predicated region body
PF: predicated region fallthrough
CT: control target
= control target key end

     0   :  { %s948_s12 = smov 0   ;;  %s950_s13 = smov 0   ;;  %s1099_s0 = inlined_call_operand.vmem [shape: bf16[1,512,48], index: 0, kind: input, shape index: {}]   ;;  %s1100_s1 = inlined_call_operand.vmem [shape: bf16[1,48,128], index: 1, kind: input, shape index: {}]   ;;  %s1101_s2 = inlined_call_operand.vmem [shape: f32[1,128], index: 2, kind: input, shape index: {}]   ;;  %s1102_s3 = inlined_call_operand.vmem [shape: f32[1,512,128], index: 3, kind: output, shape index: {}]  }
   0x1   :  { %s952_s14 = smov 0  }
   0x2 LB: > { %s22_s15 = sadd.s32 1, %s922_s13  ;;  %p755_p0 = scmp.ge.s32.totalorder %s926_s14, 1  ;;  %s926_s14 = sphi %s952_s14, %s13_s14   ;;  %s922_s13 = sphi %s950_s13, %s1104_s13   ;;  %s918_s12 = sphi %s948_s12, %s1103_s12  }
   0x3   : > { %p23_p1 = scmp.ge.s32.totalorder %s22_s15, 2  ;;  %p168_p2 = scmp.lt.s32.totalorder %s926_s14, 3 }
   0x5   : > { %s1106_s15 = smov (%p23_p1, %s22_s15), 0  ;;  %p169_p3 = pnand %p755_p0, %p168_p2 }
   0x6   : > { %s756_s18 = sshll.u32 (!%p169_p3), %s918_s12, 5 }
   0x7   : > { %172 = sbr.rel (%p169_p3) target bundleno = 253 (0xfd), region = 32  ;;  %p208_p4 = scmp.lt.s32.totalorder (!%p169_p3), %s756_s18, 63 }
   0xc   : > { %v885_v0 = vld [vmem:[%s1100_s1 + $0x10] sm:$0xff]   ;;  %v886_v1 = vld [vmem:[%s1100_s1 + $0x8] sm:$0xff]   ;;  %s1108_s18 = smov (!%p208_p4, %s756_s18), 63  ;;  %v887_v2 = vld [vmem:[%s1100_s1] sm:$0xff]   ;;  %vm374_vm0 = vcmask 392192  }
   0xd   : > { %817 = vmatprep.subr.bf16.mxu0 %v885_v0  ;;  %855 = vmatprep.subr.bf16.mxu1 %v885_v0  ;;  %s757_s23 = sshll.u32 %s1108_s18, 2  ;;  %v1018_v19 = vld [vmem:[%s1101_s2] ss:$0 sm:$0xff]  ;;  %s759_s29 = sshll.u32 %s1108_s18, 3 }
   0xe   : > { %818 = vmatpush3.bf16.msra.mxu0 %v885_v0  ;;  %858 = vmatpush3.bf16.msra.mxu1 %v885_v0  ;;  %s981_s26 = scalar_lea.vmem %s1099_s0, %s757_s23  ;;  %s1026_s5 = scalar_lea.vmem %s1102_s3, %s759_s29 }
   0xf   : > { %819 = vmatprep.subr.bf16.mxu0 %v886_v1  ;;  %856 = vmatprep.subr.bf16.mxu1 %v886_v1  ;;  %v888_v3 = vld [vmem:[%s981_s26] sm:$0xff]   ;;  %v890_v5 = vld [vmem:[%s981_s26 + $0x8] sm:$0xff]   ;;  %v892_v7 = vld [vmem:[%s981_s26 + $0x10] sm:$0xff]  }
  0x10   : > { %v889_v4 = vld [vmem:[%s981_s26 + $0x40] sm:$0xff]   ;;  %823 = vmatprep.mubr.msk.bf16.mxu0 %vm374_vm0, %v888_v3  ;;  %v891_v6 = vld [vmem:[%s981_s26 + $0x48] sm:$0xff]   ;;  %v893_v8 = vld [vmem:[%s981_s26 + $0x50] sm:$0xff]  }
  0x11   : > { %839 = vmatprep.mubr.msk.bf16.mxu1 %vm374_vm0, %v889_v4  ;;  %v894_v9 = vld [vmem:[%s981_s26 + $0x18] sm:$0xff]   ;;  %v896_v11 = vld [vmem:[%s981_s26 + $0x20] sm:$0xff]   ;;  %v898_v13 = vld [vmem:[%s981_s26 + $0x28] sm:$0xff]  }
  0x12   : > { %820 = vmatpush3.bf16.msra.mxu0 %v886_v1  ;;  %859 = vmatpush3.bf16.msra.mxu1 %v886_v1  ;;  %v895_v10 = vld [vmem:[%s981_s26 + $0x58] sm:$0xff]   ;;  %v897_v12 = vld [vmem:[%s981_s26 + $0x60] sm:$0xff]   ;;  %v899_v14 = vld [vmem:[%s981_s26 + $0x68] sm:$0xff]  }
  0x13   : > { %821 = vmatprep.subr.bf16.mxu0 %v887_v2  ;;  %857 = vmatprep.subr.bf16.mxu1 %v887_v2  ;;  %v900_v15 = vld [vmem:[%s981_s26 + $0x30] sm:$0xff]   ;;  %v902_v17 = vld [vmem:[%s981_s26 + $0x38] sm:$0xff]  }
  0x14   : > { %v901_v16 = vld [vmem:[%s981_s26 + $0x70] sm:$0xff]   ;;  %v903_v18 = vld [vmem:[%s981_s26 + $0x78] sm:$0xff]  }
  0x16   : > { %822 = vmatpush3.bf16.msra.mxu0 %v887_v2  ;;  %860 = vmatpush3.bf16.msra.mxu1 %v887_v2 }
  0x19   : > { %824 = vmatmul.mubr.msk.bf16.vlgmr.msra.gmra.mxu0 %vm374_vm0, %v890_v5  ;;  %840 = vmatmul.mubr.msk.bf16.vlgmr.msra.gmra.mxu1 %vm374_vm0, %v891_v6 }
  0x1a   : > { %827 = vmatprep.mubr.msk.bf16.mxu0 %vm374_vm0, %v892_v7  ;;  %843 = vmatprep.mubr.msk.bf16.mxu1 %vm374_vm0, %v893_v8 }
  0x21   : > { %828 = vmatmul.mubr.msk.bf16.gmra.mxu0 %vm374_vm0, %v894_v9  ;;  %844 = vmatmul.mubr.msk.bf16.gmra.mxu1 %vm374_vm0, %v895_v10 }
  0x22   : > { %831 = vmatprep.mubr.msk.bf16.mxu0 %vm374_vm0, %v896_v11  ;;  %847 = vmatprep.mubr.msk.bf16.mxu1 %vm374_vm0, %v897_v12 }
  0x29   : > { %832 = vmatmul.mubr.msk.bf16.gmra.mxu0 %vm374_vm0, %v898_v13  ;;  %848 = vmatmul.mubr.msk.bf16.gmra.mxu1 %vm374_vm0, %v899_v14 }
  0x2a   : > { %835 = vmatprep.mubr.msk.bf16.mxu0 %vm374_vm0, %v900_v15  ;;  %851 = vmatprep.mubr.msk.bf16.mxu1 %vm374_vm0, %v901_v16 }
  0x31   : > { %836 = vmatmul.mubr.msk.bf16.gmra.mxu0 %vm374_vm0, %v902_v17  ;;  %852 = vmatmul.mubr.msk.bf16.gmra.mxu1 %vm374_vm0, %v903_v18 }
  0xd9   : > { %v825_v20 = vpop.f32.mrf.mxu0  ;;  %v841_v21 = vpop.f32.mrf.mxu1 }
  0xda   : > { %v466_v22 = vadd.f32 %v825_v20, %v1018_v19  ;;  %v530_v23 = vadd.f32 %v841_v21, %v1018_v19 }
  0xdb   : > { %v457_v24 = vpop.f32.mrf.mxu0  ;;  %v521_v25 = vpop.f32.mrf.mxu1 }
  0xdc   : > { %v586_v26 = vmax.f32 %v466_v22, 0.0  ;;  %v602_v27 = vmax.f32 %v530_v23, 0.0  ;;  %v458_v28 = vadd.f32 %v1018_v19, %v457_v24  ;;  %v522_v29 = vadd.f32 %v1018_v19, %v521_v25 }
  0xdd   : > { %v826_v30 = vpop.f32.mrf.mxu0  ;;  %v842_v31 = vpop.f32.mrf.mxu1 }
  0xde   : > { %618 = vst [vmem:[%s1026_s5 + $0x10] sm:$0xff] %v586_v26  ;;  %634 = vst [vmem:[%s1026_s5 + $0x90] sm:$0xff] %v602_v27  ;;  %v584_v32 = vmax.f32 %v458_v28, 0.0  ;;  %v600_v33 = vmax.f32 %v522_v29, 0.0  ;;  %v469_v34 = vadd.f32 %v826_v30, %v1018_v19  ;;  %v533_v35 = vadd.f32 %v842_v31, %v1018_v19 }
  0xdf   : > { %v460_v36 = vpop.f32.mrf.mxu0  ;;  %v524_v37 = vpop.f32.mrf.mxu1 }
  0xe0   : > { %616 = vst [vmem:[%s1026_s5] sm:$0xff] %v584_v32  ;;  %632 = vst [vmem:[%s1026_s5 + $0x80] sm:$0xff] %v600_v33  ;;  %v587_v38 = vmax.f32 %v469_v34, 0.0  ;;  %v603_v39 = vmax.f32 %v533_v35, 0.0  ;;  %v461_v40 = vadd.f32 %v1018_v19, %v460_v36  ;;  %v525_v41 = vadd.f32 %v1018_v19, %v524_v37 }
  0xe1   : > { %v829_v42 = vpop.f32.mrf.mxu0  ;;  %v845_v43 = vpop.f32.mrf.mxu1 }
  0xe2   : > { %619 = vst [vmem:[%s1026_s5 + $0x18] sm:$0xff] %v587_v38  ;;  %635 = vst [vmem:[%s1026_s5 + $0x98] sm:$0xff] %v603_v39  ;;  %v585_v44 = vmax.f32 %v461_v40, 0.0  ;;  %v601_v45 = vmax.f32 %v525_v41, 0.0  ;;  %v482_v46 = vadd.f32 %v829_v42, %v1018_v19  ;;  %v546_v47 = vadd.f32 %v845_v43, %v1018_v19 }
  0xe3   : > { %v473_v48 = vpop.f32.mrf.mxu0  ;;  %v537_v49 = vpop.f32.mrf.mxu1 }
  0xe4   : > { %617 = vst [vmem:[%s1026_s5 + $0x8] sm:$0xff] %v585_v44  ;;  %633 = vst [vmem:[%s1026_s5 + $0x88] sm:$0xff] %v601_v45  ;;  %v590_v50 = vmax.f32 %v482_v46, 0.0  ;;  %v606_v51 = vmax.f32 %v546_v47, 0.0  ;;  %v474_v52 = vadd.f32 %v1018_v19, %v473_v48  ;;  %v538_v53 = vadd.f32 %v1018_v19, %v537_v49 }
  0xe5   : > { %v830_v54 = vpop.f32.mrf.mxu0  ;;  %v846_v55 = vpop.f32.mrf.mxu1 }
  0xe6   : > { %622 = vst [vmem:[%s1026_s5 + $0x30] sm:$0xff] %v590_v50  ;;  %638 = vst [vmem:[%s1026_s5 + $0xb0] sm:$0xff] %v606_v51  ;;  %v588_v56 = vmax.f32 %v474_v52, 0.0  ;;  %v604_v57 = vmax.f32 %v538_v53, 0.0  ;;  %v485_v58 = vadd.f32 %v830_v54, %v1018_v19  ;;  %v549_v59 = vadd.f32 %v846_v55, %v1018_v19 }
  0xe7   : > { %v476_v60 = vpop.f32.mrf.mxu0  ;;  %v540_v61 = vpop.f32.mrf.mxu1 }
  0xe8   : > { %620 = vst [vmem:[%s1026_s5 + $0x20] sm:$0xff] %v588_v56  ;;  %636 = vst [vmem:[%s1026_s5 + $0xa0] sm:$0xff] %v604_v57  ;;  %v591_v62 = vmax.f32 %v485_v58, 0.0  ;;  %v607_v63 = vmax.f32 %v549_v59, 0.0  ;;  %v477_v0 = vadd.f32 %v1018_v19, %v476_v60  ;;  %v541_v1 = vadd.f32 %v1018_v19, %v540_v61 }
  0xe9   : > { %v833_v2 = vpop.f32.mrf.mxu0  ;;  %v849_v3 = vpop.f32.mrf.mxu1 }
  0xea   : > { %623 = vst [vmem:[%s1026_s5 + $0x38] sm:$0xff] %v591_v62  ;;  %639 = vst [vmem:[%s1026_s5 + $0xb8] sm:$0xff] %v607_v63  ;;  %v589_v4 = vmax.f32 %v477_v0, 0.0  ;;  %v605_v5 = vmax.f32 %v541_v1, 0.0  ;;  %v498_v6 = vadd.f32 %v833_v2, %v1018_v19  ;;  %v562_v7 = vadd.f32 %v849_v3, %v1018_v19 }
  0xeb   : > { %v489_v8 = vpop.f32.mrf.mxu0  ;;  %v553_v9 = vpop.f32.mrf.mxu1 }
  0xec   : > { %621 = vst [vmem:[%s1026_s5 + $0x28] sm:$0xff] %v589_v4  ;;  %637 = vst [vmem:[%s1026_s5 + $0xa8] sm:$0xff] %v605_v5  ;;  %v594_v10 = vmax.f32 %v498_v6, 0.0  ;;  %v610_v11 = vmax.f32 %v562_v7, 0.0  ;;  %v490_v12 = vadd.f32 %v1018_v19, %v489_v8  ;;  %v554_v13 = vadd.f32 %v1018_v19, %v553_v9 }
  0xed   : > { %v834_v14 = vpop.f32.mrf.mxu0  ;;  %v850_v15 = vpop.f32.mrf.mxu1 }
  0xee   : > { %626 = vst [vmem:[%s1026_s5 + $0x50] sm:$0xff] %v594_v10  ;;  %642 = vst [vmem:[%s1026_s5 + $0xd0] sm:$0xff] %v610_v11  ;;  %v592_v16 = vmax.f32 %v490_v12, 0.0  ;;  %v608_v17 = vmax.f32 %v554_v13, 0.0  ;;  %v501_v18 = vadd.f32 %v834_v14, %v1018_v19  ;;  %v565_v20 = vadd.f32 %v850_v15, %v1018_v19 }
  0xef   : > { %v492_v21 = vpop.f32.mrf.mxu0  ;;  %v556_v22 = vpop.f32.mrf.mxu1 }
  0xf0   : > { %624 = vst [vmem:[%s1026_s5 + $0x40] sm:$0xff] %v592_v16  ;;  %640 = vst [vmem:[%s1026_s5 + $0xc0] sm:$0xff] %v608_v17  ;;  %v595_v23 = vmax.f32 %v501_v18, 0.0  ;;  %v611_v24 = vmax.f32 %v565_v20, 0.0  ;;  %v493_v25 = vadd.f32 %v1018_v19, %v492_v21  ;;  %v557_v26 = vadd.f32 %v1018_v19, %v556_v22 }
  0xf1   : > { %v837_v27 = vpop.f32.mrf.mxu0  ;;  %v853_v28 = vpop.f32.mrf.mxu1 }
  0xf2   : > { %627 = vst [vmem:[%s1026_s5 + $0x58] sm:$0xff] %v595_v23  ;;  %643 = vst [vmem:[%s1026_s5 + $0xd8] sm:$0xff] %v611_v24  ;;  %v593_v29 = vmax.f32 %v493_v25, 0.0  ;;  %v609_v30 = vmax.f32 %v557_v26, 0.0  ;;  %v514_v31 = vadd.f32 %v837_v27, %v1018_v19  ;;  %v578_v32 = vadd.f32 %v853_v28, %v1018_v19 }
  0xf3   : > { %v505_v33 = vpop.f32.mrf.mxu0  ;;  %v569_v34 = vpop.f32.mrf.mxu1 }
  0xf4   : > { %625 = vst [vmem:[%s1026_s5 + $0x48] sm:$0xff] %v593_v29  ;;  %641 = vst [vmem:[%s1026_s5 + $0xc8] sm:$0xff] %v609_v30  ;;  %v598_v35 = vmax.f32 %v514_v31, 0.0  ;;  %v614_v36 = vmax.f32 %v578_v32, 0.0  ;;  %v506_v37 = vadd.f32 %v1018_v19, %v505_v33  ;;  %v570_v38 = vadd.f32 %v1018_v19, %v569_v34 }
  0xf5   : > { %v838_v39 = vpop.f32.mrf.mxu0  ;;  %v854_v40 = vpop.f32.mrf.mxu1 }
  0xf6   : > { %630 = vst [vmem:[%s1026_s5 + $0x70] sm:$0xff] %v598_v35  ;;  %646 = vst [vmem:[%s1026_s5 + $0xf0] sm:$0xff] %v614_v36  ;;  %v596_v41 = vmax.f32 %v506_v37, 0.0  ;;  %v612_v42 = vmax.f32 %v570_v38, 0.0  ;;  %v517_v43 = vadd.f32 %v838_v39, %v1018_v19  ;;  %v581_v44 = vadd.f32 %v854_v40, %v1018_v19 }
  0xf7   : > { %v508_v45 = vpop.f32.mrf.mxu0  ;;  %v572_v46 = vpop.f32.mrf.mxu1 }
  0xf8   : > { %628 = vst [vmem:[%s1026_s5 + $0x60] sm:$0xff] %v596_v41  ;;  %644 = vst [vmem:[%s1026_s5 + $0xe0] sm:$0xff] %v612_v42  ;;  %v599_v47 = vmax.f32 %v517_v43, 0.0  ;;  %v615_v48 = vmax.f32 %v581_v44, 0.0  ;;  %v509_v49 = vadd.f32 %v1018_v19, %v508_v45  ;;  %v573_v50 = vadd.f32 %v1018_v19, %v572_v46 }
  0xfa   : > { %631 = vst [vmem:[%s1026_s5 + $0x78] sm:$0xff] %v599_v47  ;;  %647 = vst [vmem:[%s1026_s5 + $0xf8] sm:$0xff] %v615_v48  ;;  %v597_v51 = vmax.f32 %v509_v49, 0.0  ;;  %v613_v52 = vmax.f32 %v573_v50, 0.0 }
  0xfc   : > { %629 = vst [vmem:[%s1026_s5 + $0x68] sm:$0xff] %v597_v51  ;;  %645 = vst [vmem:[%s1026_s5 + $0xe8] sm:$0xff] %v613_v52 }
  0xfd PF: > { %s13_s14 = sadd.s32 1, %s926_s14   ;;  %s1103_s12 = smov %s922_s13 }
  0xfe   : > { %p10_p5 = scmp.ge.s32.totalorder %s13_s14, 4   ;;  %s1104_s13 = smov %s1106_s15 }
 0x100   :  { %12 = sbr.rel (!%p10_p5) target bundleno = 2 (0x2), region = 65 }

// kernel: vqvae_forward.11
= control target key start
LH: loop header
LB: loop body
LE: loop exit
PB: predicated region body
PF: predicated region fallthrough
CT: control target
= control target key end

     0   :  { %s1254_s1 = inlined_call_operand.vmem [shape: bf16[1,512,128], index: 1, kind: input, shape index: {}]   ;;  %s1255_s0 = inlined_call_operand.vmem [shape: bf16[1,128,512], index: 0, kind: input, shape index: {}]   ;;  %s1256_s2 = inlined_call_operand.vmem [shape: f32[1,128], index: 2, kind: input, shape index: {}]   ;;  %s1257_s3 = inlined_call_operand.vmem [shape: f32[1,128,128], index: 3, kind: output, shape index: {}]  }
   0x1   :  { %v893_v0 = vld [vmem:[%s1254_s1 + $0x78] sm:$0xff]   ;;  %v897_v4 = vld [vmem:[%s1254_s1 + $0x70] sm:$0xff]   ;;  %v901_v8 = vld [vmem:[%s1254_s1 + $0x68] sm:$0xff]  }
   0x2   :  { %v894_v1 = vld [vmem:[%s1254_s1 + $0xf8] sm:$0xff]   ;;  %765 = vmatprep.subr.bf16.mxu0 %v893_v0  ;;  %v898_v5 = vld [vmem:[%s1254_s1 + $0xf0] sm:$0xff]   ;;  %v902_v9 = vld [vmem:[%s1254_s1 + $0xe8] sm:$0xff]  }
   0x3   :  { %v895_v2 = vld [vmem:[%s1254_s1 + $0x38] sm:$0xff]   ;;  %829 = vmatprep.subr.bf16.mxu1 %v894_v1  ;;  %v899_v6 = vld [vmem:[%s1254_s1 + $0x30] sm:$0xff]   ;;  %v903_v10 = vld [vmem:[%s1254_s1 + $0x28] sm:$0xff]  }
   0x4   :  { %v896_v3 = vld [vmem:[%s1254_s1 + $0xb8] sm:$0xff]   ;;  %766 = vmatpush3.bf16.msra.mxu0 %v895_v2  ;;  %v900_v7 = vld [vmem:[%s1254_s1 + $0xb0] sm:$0xff]   ;;  %v904_v11 = vld [vmem:[%s1254_s1 + $0xa8] sm:$0xff]  }
   0x5   :  { %830 = vmatpush3.bf16.msra.mxu1 %v896_v3  ;;  %767 = vmatprep.subr.bf16.mxu0 %v897_v4  ;;  %v905_v12 = vld [vmem:[%s1254_s1 + $0x60] sm:$0xff]   ;;  %v909_v16 = vld [vmem:[%s1254_s1 + $0x58] sm:$0xff]   ;;  %v913_v20 = vld [vmem:[%s1254_s1 + $0x50] sm:$0xff]  }
   0x6   :  { %831 = vmatprep.subr.bf16.mxu1 %v898_v5  ;;  %v906_v13 = vld [vmem:[%s1254_s1 + $0xe0] sm:$0xff]   ;;  %v910_v17 = vld [vmem:[%s1254_s1 + $0xd8] sm:$0xff]   ;;  %v914_v21 = vld [vmem:[%s1254_s1 + $0xd0] sm:$0xff]  }
   0x7   :  { %v907_v14 = vld [vmem:[%s1254_s1 + $0x20] sm:$0xff]   ;;  %v911_v18 = vld [vmem:[%s1254_s1 + $0x18] sm:$0xff]   ;;  %v915_v22 = vld [vmem:[%s1254_s1 + $0x10] sm:$0xff]  }
   0x8   :  { %768 = vmatpush3.bf16.msra.mxu0 %v899_v6  ;;  %v908_v15 = vld [vmem:[%s1254_s1 + $0xa0] sm:$0xff]   ;;  %v912_v19 = vld [vmem:[%s1254_s1 + $0x98] sm:$0xff]   ;;  %v916_v23 = vld [vmem:[%s1254_s1 + $0x90] sm:$0xff]  }
   0x9   :  { %832 = vmatpush3.bf16.msra.mxu1 %v900_v7  ;;  %769 = vmatprep.subr.bf16.mxu0 %v901_v8  ;;  %v917_v24 = vld [vmem:[%s1254_s1 + $0x48] sm:$0xff]   ;;  %v921_v28 = vld [vmem:[%s1254_s1 + $0x40] sm:$0xff]  }
   0xa   :  { %833 = vmatprep.subr.bf16.mxu1 %v902_v9  ;;  %v918_v25 = vld [vmem:[%s1254_s1 + $0xc8] sm:$0xff]   ;;  %v922_v29 = vld [vmem:[%s1254_s1 + $0xc0] sm:$0xff]  }
   0xb   :  { %v919_v26 = vld [vmem:[%s1254_s1 + $0x8] sm:$0xff]   ;;  %v923_v30 = vld [vmem:[%s1254_s1] sm:$0xff]  }
   0xc   :  { %770 = vmatpush3.bf16.msra.mxu0 %v903_v10  ;;  %v920_v27 = vld [vmem:[%s1254_s1 + $0x88] sm:$0xff]   ;;  %v924_v31 = vld [vmem:[%s1254_s1 + $0x80] sm:$0xff]  }
   0xd   :  { %834 = vmatpush3.bf16.msra.mxu1 %v904_v11  ;;  %771 = vmatprep.subr.bf16.mxu0 %v905_v12  ;;  %v925_v32 = vld [vmem:[%s1255_s0] ss:$16 sps:$4 sm:$0xff]   ;;  %v927_v33 = vld [vmem:[%s1255_s0 + $0x4] ss:$16 sps:$4 sm:$0xff]   ;;  %v928_v34 = vld [vmem:[%s1255_s0 + $0x8] ss:$16 sps:$4 sm:$0xff]  }
   0xe   :  { %835 = vmatprep.subr.bf16.mxu1 %v906_v13  ;;  %v930_v35 = vld [vmem:[%s1255_s0 + $0xc] ss:$16 sps:$4 sm:$0xff]   ;;  %502 = vmatprep.mubr.bf16.mxu0 %v927_v33  ;;  %v931_v36 = vld [vmem:[%s1255_s0 + $0x24] ss:$16 sps:$4 sm:$0xff]   ;;  %v935_v38 = vld [vmem:[%s1255_s0 + $0x20] ss:$16 sps:$4 sm:$0xff]  }
   0xf   :  { %599 = vmatprep.mubr.bf16.mxu1 %v930_v35  ;;  %v933_v37 = vld [vmem:[%s1255_s0 + $0x2c] ss:$16 sps:$4 sm:$0xff]   ;;  %v936_v39 = vld [vmem:[%s1255_s0 + $0x28] ss:$16 sps:$4 sm:$0xff]   ;;  %v937_v40 = vld [vmem:[%s1255_s0 + $0x44] ss:$16 sps:$4 sm:$0xff]  }
  0x10   :  { %772 = vmatpush3.bf16.msra.mxu0 %v907_v14  ;;  %v939_v41 = vld [vmem:[%s1255_s0 + $0x4c] ss:$16 sps:$4 sm:$0xff]   ;;  %v941_v42 = vld [vmem:[%s1255_s0 + $0x40] ss:$16 sps:$4 sm:$0xff]   ;;  %v942_v43 = vld [vmem:[%s1255_s0 + $0x48] ss:$16 sps:$4 sm:$0xff]  }
  0x11   :  { %836 = vmatpush3.bf16.msra.mxu1 %v908_v15  ;;  %773 = vmatprep.subr.bf16.mxu0 %v909_v16  ;;  %v943_v44 = vld [vmem:[%s1255_s0 + $0x64] ss:$16 sps:$4 sm:$0xff]   ;;  %v945_v45 = vld [vmem:[%s1255_s0 + $0x6c] ss:$16 sps:$4 sm:$0xff]   ;;  %v947_v46 = vld [vmem:[%s1255_s0 + $0x60] ss:$16 sps:$4 sm:$0xff]  }
  0x12   :  { %837 = vmatprep.subr.bf16.mxu1 %v910_v17  ;;  %v948_v47 = vld [vmem:[%s1255_s0 + $0x68] ss:$16 sps:$4 sm:$0xff]   ;;  %v949_v48 = vld [vmem:[%s1255_s0 + $0x84] ss:$16 sps:$4 sm:$0xff]   ;;  %v951_v49 = vld [vmem:[%s1255_s0 + $0x8c] ss:$16 sps:$4 sm:$0xff]  }
  0x13   :  { %v953_v50 = vld [vmem:[%s1255_s0 + $0x80] ss:$16 sps:$4 sm:$0xff]   ;;  %v954_v51 = vld [vmem:[%s1255_s0 + $0x88] ss:$16 sps:$4 sm:$0xff]   ;;  %v955_v52 = vld [vmem:[%s1255_s0 + $0xa4] ss:$16 sps:$4 sm:$0xff]  }
  0x14   :  { %774 = vmatpush3.bf16.msra.mxu0 %v911_v18  ;;  %v957_v53 = vld [vmem:[%s1255_s0 + $0xac] ss:$16 sps:$4 sm:$0xff]   ;;  %v959_v54 = vld [vmem:[%s1255_s0 + $0xa0] ss:$16 sps:$4 sm:$0xff]   ;;  %v960_v55 = vld [vmem:[%s1255_s0 + $0xa8] ss:$16 sps:$4 sm:$0xff]  }
  0x15   :  { %838 = vmatpush3.bf16.msra.mxu1 %v912_v19  ;;  %775 = vmatprep.subr.bf16.mxu0 %v913_v20  ;;  %v961_v56 = vld [vmem:[%s1255_s0 + $0xc4] ss:$16 sps:$4 sm:$0xff]   ;;  %v963_v57 = vld [vmem:[%s1255_s0 + $0xcc] ss:$16 sps:$4 sm:$0xff]   ;;  %v965_v58 = vld [vmem:[%s1255_s0 + $0xc0] ss:$16 sps:$4 sm:$0xff]  }
  0x16   :  { %839 = vmatprep.subr.bf16.mxu1 %v914_v21  ;;  %v966_v59 = vld [vmem:[%s1255_s0 + $0xc8] ss:$16 sps:$4 sm:$0xff]   ;;  %v967_v60 = vld [vmem:[%s1255_s0 + $0xe4] ss:$16 sps:$4 sm:$0xff]   ;;  %v969_v61 = vld [vmem:[%s1255_s0 + $0xec] ss:$16 sps:$4 sm:$0xff]  }
  0x17   :  { %v971_v62 = vld [vmem:[%s1255_s0 + $0xe0] ss:$16 sps:$4 sm:$0xff]   ;;  %v972_v63 = vld [vmem:[%s1255_s0 + $0xe8] ss:$16 sps:$4 sm:$0xff]  }
  0x18   :  { %776 = vmatpush3.bf16.msra.mxu0 %v915_v22  ;;  %v1188_v2 = vld [vmem:[%s1256_s2] ss:$0 sm:$0xff] }
  0x19   :  { %840 = vmatpush3.bf16.msra.mxu1 %v916_v23  ;;  %777 = vmatprep.subr.bf16.mxu0 %v917_v24 }
  0x1a   :  { %841 = vmatprep.subr.bf16.mxu1 %v918_v25 }
  0x1c   :  { %778 = vmatpush3.bf16.msra.mxu0 %v919_v26 }
  0x1d   :  { %842 = vmatpush3.bf16.msra.mxu1 %v920_v27  ;;  %779 = vmatprep.subr.bf16.mxu0 %v921_v28 }
  0x1e   :  { %843 = vmatprep.subr.bf16.mxu1 %v922_v29 }
  0x20   :  { %780 = vmatpush3.bf16.msra.mxu0 %v923_v30 }
  0x21   :  { %844 = vmatpush3.bf16.msra.mxu1 %v924_v31 }
  0x23   :  { %503 = vmatmul.mubr.bf16.vlgmr.msra.gmra.mxu0 %v925_v32 }
  0x24   :  { %600 = vmatmul.mubr.bf16.vlgmr.msra.gmra.mxu1 %v928_v34  ;;  %510 = vmatprep.mubr.bf16.mxu0 %v931_v36 }
  0x25   :  { %607 = vmatprep.mubr.bf16.mxu1 %v933_v37 }
  0x2b   :  { %511 = vmatmul.mubr.bf16.gmra.mxu0 %v935_v38 }
  0x2c   :  { %608 = vmatmul.mubr.bf16.gmra.mxu1 %v936_v39  ;;  %518 = vmatprep.mubr.bf16.mxu0 %v937_v40 }
  0x2d   :  { %615 = vmatprep.mubr.bf16.mxu1 %v939_v41 }
  0x33   :  { %519 = vmatmul.mubr.bf16.gmra.mxu0 %v941_v42 }
  0x34   :  { %616 = vmatmul.mubr.bf16.gmra.mxu1 %v942_v43  ;;  %526 = vmatprep.mubr.bf16.mxu0 %v943_v44 }
  0x35   :  { %623 = vmatprep.mubr.bf16.mxu1 %v945_v45 }
  0x3b   :  { %527 = vmatmul.mubr.bf16.gmra.mxu0 %v947_v46 }
  0x3c   :  { %624 = vmatmul.mubr.bf16.gmra.mxu1 %v948_v47  ;;  %534 = vmatprep.mubr.bf16.mxu0 %v949_v48 }
  0x3d   :  { %631 = vmatprep.mubr.bf16.mxu1 %v951_v49 }
  0x43   :  { %535 = vmatmul.mubr.bf16.gmra.mxu0 %v953_v50 }
  0x44   :  { %632 = vmatmul.mubr.bf16.gmra.mxu1 %v954_v51  ;;  %542 = vmatprep.mubr.bf16.mxu0 %v955_v52 }
  0x45   :  { %639 = vmatprep.mubr.bf16.mxu1 %v957_v53 }
  0x4b   :  { %543 = vmatmul.mubr.bf16.gmra.mxu0 %v959_v54 }
  0x4c   :  { %640 = vmatmul.mubr.bf16.gmra.mxu1 %v960_v55  ;;  %550 = vmatprep.mubr.bf16.mxu0 %v961_v56 }
  0x4d   :  { %647 = vmatprep.mubr.bf16.mxu1 %v963_v57 }
  0x53   :  { %551 = vmatmul.mubr.bf16.gmra.mxu0 %v965_v58 }
  0x54   :  { %648 = vmatmul.mubr.bf16.gmra.mxu1 %v966_v59  ;;  %558 = vmatprep.mubr.bf16.mxu0 %v967_v60 }
  0x55   :  { %655 = vmatprep.mubr.bf16.mxu1 %v969_v61 }
  0x5b   :  { %559 = vmatmul.mubr.bf16.gmra.mxu0 %v971_v62 }
  0x5c   :  { %656 = vmatmul.mubr.bf16.gmra.mxu1 %v972_v63 }
  0xe3   :  { %v781_v0 = vpop.f32.mrf.mxu0 }
  0xe4   :  { %v845_v1 = vpop.f32.mrf.mxu1 }
  0xe5   :  { %v782_v3 = vpop.f32.mrf.mxu0 }
  0xe6   :  { %v783_v4 = vadd.f32 %v782_v3, %v781_v0  ;;  %v846_v5 = vpop.f32.mrf.mxu1 }
  0xe7   :  { %v784_v6 = vpop.f32.mrf.mxu0  ;;  %v847_v8 = vadd.f32 %v846_v5, %v845_v1 }
  0xe8   :  { %v505_v7 = vadd.f32 %v783_v4, %v1188_v2  ;;  %v848_v9 = vpop.f32.mrf.mxu1 }
  0xe9   :  { %v785_v10 = vpop.f32.mrf.mxu0 }
  0xea   :  { %v602_v11 = vadd.f32 %v847_v8, %v505_v7  ;;  %v786_v12 = vadd.f32 %v785_v10, %v784_v6  ;;  %v849_v13 = vpop.f32.mrf.mxu1 }
  0xeb   :  { %v787_v14 = vpop.f32.mrf.mxu0  ;;  %v850_v17 = vadd.f32 %v849_v13, %v848_v9 }
  0xec   :  { %v664_v15 = vmax.f32 %v602_v11, 0.0  ;;  %v508_v16 = vadd.f32 %v786_v12, %v1188_v2  ;;  %v851_v18 = vpop.f32.mrf.mxu1 }
  0xed   :  { %v788_v19 = vpop.f32.mrf.mxu0 }
  0xee   :  { %680 = vst [vmem:[%s1257_s3] sm:$0xff] %v664_v15  ;;  %v605_v20 = vadd.f32 %v850_v17, %v508_v16  ;;  %v789_v21 = vadd.f32 %v788_v19, %v787_v14  ;;  %v852_v22 = vpop.f32.mrf.mxu1 }
  0xef   :  { %v790_v23 = vpop.f32.mrf.mxu0  ;;  %v853_v26 = vadd.f32 %v852_v22, %v851_v18 }
  0xf0   :  { %v665_v24 = vmax.f32 %v605_v20, 0.0  ;;  %v513_v25 = vadd.f32 %v789_v21, %v1188_v2  ;;  %v854_v27 = vpop.f32.mrf.mxu1 }
  0xf1   :  { %v791_v28 = vpop.f32.mrf.mxu0 }
  0xf2   :  { %681 = vst [vmem:[%s1257_s3 + $0x8] sm:$0xff] %v665_v24  ;;  %v610_v29 = vadd.f32 %v853_v26, %v513_v25  ;;  %v792_v30 = vadd.f32 %v791_v28, %v790_v23  ;;  %v855_v31 = vpop.f32.mrf.mxu1 }
  0xf3   :  { %v793_v32 = vpop.f32.mrf.mxu0  ;;  %v856_v35 = vadd.f32 %v855_v31, %v854_v27 }
  0xf4   :  { %v666_v33 = vmax.f32 %v610_v29, 0.0  ;;  %v516_v34 = vadd.f32 %v792_v30, %v1188_v2  ;;  %v857_v36 = vpop.f32.mrf.mxu1 }
  0xf5   :  { %v794_v37 = vpop.f32.mrf.mxu0 }
  0xf6   :  { %682 = vst [vmem:[%s1257_s3 + $0x10] sm:$0xff] %v666_v33  ;;  %v613_v38 = vadd.f32 %v856_v35, %v516_v34  ;;  %v795_v39 = vadd.f32 %v794_v37, %v793_v32  ;;  %v858_v40 = vpop.f32.mrf.mxu1 }
  0xf7   :  { %v796_v41 = vpop.f32.mrf.mxu0  ;;  %v859_v44 = vadd.f32 %v858_v40, %v857_v36 }
  0xf8   :  { %v667_v42 = vmax.f32 %v613_v38, 0.0  ;;  %v521_v43 = vadd.f32 %v795_v39, %v1188_v2  ;;  %v860_v45 = vpop.f32.mrf.mxu1 }
  0xf9   :  { %v797_v46 = vpop.f32.mrf.mxu0 }
  0xfa   :  { %683 = vst [vmem:[%s1257_s3 + $0x18] sm:$0xff] %v667_v42  ;;  %v618_v47 = vadd.f32 %v859_v44, %v521_v43  ;;  %v798_v48 = vadd.f32 %v797_v46, %v796_v41  ;;  %v861_v49 = vpop.f32.mrf.mxu1 }
  0xfb   :  { %v799_v50 = vpop.f32.mrf.mxu0  ;;  %v862_v53 = vadd.f32 %v861_v49, %v860_v45 }
  0xfc   :  { %v668_v51 = vmax.f32 %v618_v47, 0.0  ;;  %v524_v52 = vadd.f32 %v798_v48, %v1188_v2  ;;  %v863_v54 = vpop.f32.mrf.mxu1 }
  0xfd   :  { %v800_v55 = vpop.f32.mrf.mxu0 }
  0xfe   :  { %684 = vst [vmem:[%s1257_s3 + $0x20] sm:$0xff] %v668_v51  ;;  %v621_v56 = vadd.f32 %v862_v53, %v524_v52  ;;  %v801_v57 = vadd.f32 %v800_v55, %v799_v50  ;;  %v864_v58 = vpop.f32.mrf.mxu1 }
  0xff   :  { %v802_v59 = vpop.f32.mrf.mxu0  ;;  %v865_v62 = vadd.f32 %v864_v58, %v863_v54 }
 0x100   :  { %v669_v60 = vmax.f32 %v621_v56, 0.0  ;;  %v529_v61 = vadd.f32 %v801_v57, %v1188_v2  ;;  %v866_v63 = vpop.f32.mrf.mxu1 }
 0x101   :  { %v803_v0 = vpop.f32.mrf.mxu0 }
 0x102   :  { %685 = vst [vmem:[%s1257_s3 + $0x28] sm:$0xff] %v669_v60  ;;  %v626_v1 = vadd.f32 %v865_v62, %v529_v61  ;;  %v804_v3 = vadd.f32 %v803_v0, %v802_v59  ;;  %v867_v4 = vpop.f32.mrf.mxu1 }
 0x103   :  { %v805_v5 = vpop.f32.mrf.mxu0  ;;  %v868_v8 = vadd.f32 %v867_v4, %v866_v63 }
 0x104   :  { %v670_v6 = vmax.f32 %v626_v1, 0.0  ;;  %v532_v7 = vadd.f32 %v804_v3, %v1188_v2  ;;  %v869_v9 = vpop.f32.mrf.mxu1 }
 0x105   :  { %v806_v10 = vpop.f32.mrf.mxu0 }
 0x106   :  { %686 = vst [vmem:[%s1257_s3 + $0x30] sm:$0xff] %v670_v6  ;;  %v629_v11 = vadd.f32 %v868_v8, %v532_v7  ;;  %v807_v12 = vadd.f32 %v806_v10, %v805_v5  ;;  %v870_v13 = vpop.f32.mrf.mxu1 }
 0x107   :  { %v808_v14 = vpop.f32.mrf.mxu0  ;;  %v871_v17 = vadd.f32 %v870_v13, %v869_v9 }
 0x108   :  { %v671_v15 = vmax.f32 %v629_v11, 0.0  ;;  %v537_v16 = vadd.f32 %v807_v12, %v1188_v2  ;;  %v872_v18 = vpop.f32.mrf.mxu1 }
 0x109   :  { %v809_v19 = vpop.f32.mrf.mxu0 }
 0x10a   :  { %687 = vst [vmem:[%s1257_s3 + $0x38] sm:$0xff] %v671_v15  ;;  %v634_v20 = vadd.f32 %v871_v17, %v537_v16  ;;  %v810_v21 = vadd.f32 %v809_v19, %v808_v14  ;;  %v873_v22 = vpop.f32.mrf.mxu1 }
 0x10b   :  { %v811_v23 = vpop.f32.mrf.mxu0  ;;  %v874_v26 = vadd.f32 %v873_v22, %v872_v18 }
 0x10c   :  { %v672_v24 = vmax.f32 %v634_v20, 0.0  ;;  %v540_v25 = vadd.f32 %v810_v21, %v1188_v2  ;;  %v875_v27 = vpop.f32.mrf.mxu1 }
 0x10d   :  { %v812_v28 = vpop.f32.mrf.mxu0 }
 0x10e   :  { %688 = vst [vmem:[%s1257_s3 + $0x40] sm:$0xff] %v672_v24  ;;  %v637_v29 = vadd.f32 %v874_v26, %v540_v25  ;;  %v813_v30 = vadd.f32 %v812_v28, %v811_v23  ;;  %v876_v31 = vpop.f32.mrf.mxu1 }
 0x10f   :  { %v814_v32 = vpop.f32.mrf.mxu0  ;;  %v877_v35 = vadd.f32 %v876_v31, %v875_v27 }
 0x110   :  { %v673_v33 = vmax.f32 %v637_v29, 0.0  ;;  %v545_v34 = vadd.f32 %v813_v30, %v1188_v2  ;;  %v878_v36 = vpop.f32.mrf.mxu1 }
 0x111   :  { %v815_v37 = vpop.f32.mrf.mxu0 }
 0x112   :  { %689 = vst [vmem:[%s1257_s3 + $0x48] sm:$0xff] %v673_v33  ;;  %v642_v38 = vadd.f32 %v877_v35, %v545_v34  ;;  %v816_v39 = vadd.f32 %v815_v37, %v814_v32  ;;  %v879_v40 = vpop.f32.mrf.mxu1 }
 0x113   :  { %v817_v41 = vpop.f32.mrf.mxu0  ;;  %v880_v44 = vadd.f32 %v879_v40, %v878_v36 }
 0x114   :  { %v674_v42 = vmax.f32 %v642_v38, 0.0  ;;  %v548_v43 = vadd.f32 %v816_v39, %v1188_v2  ;;  %v881_v45 = vpop.f32.mrf.mxu1 }
 0x115   :  { %v818_v46 = vpop.f32.mrf.mxu0 }
 0x116   :  { %690 = vst [vmem:[%s1257_s3 + $0x50] sm:$0xff] %v674_v42  ;;  %v645_v47 = vadd.f32 %v880_v44, %v548_v43  ;;  %v819_v48 = vadd.f32 %v818_v46, %v817_v41  ;;  %v882_v49 = vpop.f32.mrf.mxu1 }
 0x117   :  { %v820_v50 = vpop.f32.mrf.mxu0  ;;  %v883_v53 = vadd.f32 %v882_v49, %v881_v45 }
 0x118   :  { %v675_v51 = vmax.f32 %v645_v47, 0.0  ;;  %v553_v52 = vadd.f32 %v819_v48, %v1188_v2  ;;  %v884_v54 = vpop.f32.mrf.mxu1 }
 0x119   :  { %v821_v55 = vpop.f32.mrf.mxu0 }
 0x11a   :  { %691 = vst [vmem:[%s1257_s3 + $0x58] sm:$0xff] %v675_v51  ;;  %v650_v56 = vadd.f32 %v883_v53, %v553_v52  ;;  %v822_v57 = vadd.f32 %v821_v55, %v820_v50  ;;  %v885_v58 = vpop.f32.mrf.mxu1 }
 0x11b   :  { %v823_v59 = vpop.f32.mrf.mxu0  ;;  %v886_v62 = vadd.f32 %v885_v58, %v884_v54 }
 0x11c   :  { %v676_v60 = vmax.f32 %v650_v56, 0.0  ;;  %v556_v61 = vadd.f32 %v822_v57, %v1188_v2  ;;  %v887_v63 = vpop.f32.mrf.mxu1 }
 0x11d   :  { %v824_v0 = vpop.f32.mrf.mxu0 }
 0x11e   :  { %692 = vst [vmem:[%s1257_s3 + $0x60] sm:$0xff] %v676_v60  ;;  %v653_v1 = vadd.f32 %v886_v62, %v556_v61  ;;  %v825_v3 = vadd.f32 %v824_v0, %v823_v59  ;;  %v888_v4 = vpop.f32.mrf.mxu1 }
 0x11f   :  { %v826_v5 = vpop.f32.mrf.mxu0  ;;  %v889_v8 = vadd.f32 %v888_v4, %v887_v63 }
 0x120   :  { %v677_v6 = vmax.f32 %v653_v1, 0.0  ;;  %v561_v7 = vadd.f32 %v825_v3, %v1188_v2  ;;  %v890_v9 = vpop.f32.mrf.mxu1 }
 0x121   :  { %v827_v10 = vpop.f32.mrf.mxu0 }
 0x122   :  { %693 = vst [vmem:[%s1257_s3 + $0x68] sm:$0xff] %v677_v6  ;;  %v658_v11 = vadd.f32 %v889_v8, %v561_v7  ;;  %v828_v12 = vadd.f32 %v827_v10, %v826_v5  ;;  %v891_v13 = vpop.f32.mrf.mxu1 }
 0x123   :  { %v892_v16 = vadd.f32 %v891_v13, %v890_v9 }
 0x124   :  { %v678_v14 = vmax.f32 %v658_v11, 0.0  ;;  %v564_v15 = vadd.f32 %v828_v12, %v1188_v2 }
 0x126   :  { %694 = vst [vmem:[%s1257_s3 + $0x70] sm:$0xff] %v678_v14  ;;  %v661_v17 = vadd.f32 %v892_v16, %v564_v15 }
 0x128   :  { %v679_v18 = vmax.f32 %v661_v17, 0.0 }
 0x12a   :  { %695 = vst [vmem:[%s1257_s3 + $0x78] sm:$0xff] %v679_v18 }

// kernel: vqvae_forward.12
= control target key start
LH: loop header
LB: loop body
LE: loop exit
PB: predicated region body
PF: predicated region fallthrough
CT: control target
= control target key end

     0   :  { %s1370_s1 = inlined_call_operand.vmem [shape: bf16[1,1024,128], index: 1, kind: input, shape index: {}]   ;;  %s1371_s0 = inlined_call_operand.vmem [shape: bf16[1,32,1024], index: 0, kind: input, shape index: {}]   ;;  %s1372_s2 = inlined_call_operand.vmem [shape: f32[1,128], index: 2, kind: input, shape index: {}]   ;;  %s1373_s3 = inlined_call_operand.vmem [shape: f32[1,32,128], index: 3, kind: output, shape index: {}]  }
   0x1   :  { %v1031_v0 = vld [vmem:[%s1370_s1 + $0x78] sm:$0xff]   ;;  %v1035_v4 = vld [vmem:[%s1370_s1 + $0x70] sm:$0xff]   ;;  %v1039_v8 = vld [vmem:[%s1370_s1 + $0x68] sm:$0xff]  }
   0x2   :  { %v1032_v1 = vld [vmem:[%s1370_s1 + $0xf8] sm:$0xff]   ;;  %919 = vmatprep.subr.bf16.mxu0 %v1031_v0  ;;  %v1036_v5 = vld [vmem:[%s1370_s1 + $0xf0] sm:$0xff]   ;;  %v1040_v9 = vld [vmem:[%s1370_s1 + $0xe8] sm:$0xff]  }
   0x3   :  { %v1033_v2 = vld [vmem:[%s1370_s1 + $0x38] sm:$0xff]   ;;  %947 = vmatprep.subr.bf16.mxu1 %v1032_v1  ;;  %v1037_v6 = vld [vmem:[%s1370_s1 + $0x30] sm:$0xff]   ;;  %v1041_v10 = vld [vmem:[%s1370_s1 + $0x28] sm:$0xff]  }
   0x4   :  { %v1034_v3 = vld [vmem:[%s1370_s1 + $0xb8] sm:$0xff]   ;;  %920 = vmatpush3.bf16.msra.mxu0 %v1033_v2  ;;  %v1038_v7 = vld [vmem:[%s1370_s1 + $0xb0] sm:$0xff]   ;;  %v1042_v11 = vld [vmem:[%s1370_s1 + $0xa8] sm:$0xff]  }
   0x5   :  { %948 = vmatpush3.bf16.msra.mxu1 %v1034_v3  ;;  %921 = vmatprep.subr.bf16.mxu0 %v1035_v4  ;;  %v1043_v12 = vld [vmem:[%s1370_s1 + $0x60] sm:$0xff]   ;;  %v1047_v16 = vld [vmem:[%s1370_s1 + $0x58] sm:$0xff]   ;;  %v1051_v20 = vld [vmem:[%s1370_s1 + $0x50] sm:$0xff]  }
   0x6   :  { %949 = vmatprep.subr.bf16.mxu1 %v1036_v5  ;;  %v1044_v13 = vld [vmem:[%s1370_s1 + $0xe0] sm:$0xff]   ;;  %v1048_v17 = vld [vmem:[%s1370_s1 + $0xd8] sm:$0xff]   ;;  %v1052_v21 = vld [vmem:[%s1370_s1 + $0xd0] sm:$0xff]  }
   0x7   :  { %v1045_v14 = vld [vmem:[%s1370_s1 + $0x20] sm:$0xff]   ;;  %v1049_v18 = vld [vmem:[%s1370_s1 + $0x18] sm:$0xff]   ;;  %v1053_v22 = vld [vmem:[%s1370_s1 + $0x10] sm:$0xff]  }
   0x8   :  { %922 = vmatpush3.bf16.msra.mxu0 %v1037_v6  ;;  %v1046_v15 = vld [vmem:[%s1370_s1 + $0xa0] sm:$0xff]   ;;  %v1050_v19 = vld [vmem:[%s1370_s1 + $0x98] sm:$0xff]   ;;  %v1054_v23 = vld [vmem:[%s1370_s1 + $0x90] sm:$0xff]  }
   0x9   :  { %950 = vmatpush3.bf16.msra.mxu1 %v1038_v7  ;;  %923 = vmatprep.subr.bf16.mxu0 %v1039_v8  ;;  %v1055_v24 = vld [vmem:[%s1370_s1 + $0x48] sm:$0xff]   ;;  %v1059_v28 = vld [vmem:[%s1370_s1 + $0x40] sm:$0xff]   ;;  %v1063_v40 = vld [vmem:[%s1370_s1 + $0x178] sm:$0xff]  }
   0xa   :  { %951 = vmatprep.subr.bf16.mxu1 %v1040_v9  ;;  %v1056_v25 = vld [vmem:[%s1370_s1 + $0xc8] sm:$0xff]   ;;  %v1060_v29 = vld [vmem:[%s1370_s1 + $0xc0] sm:$0xff]   ;;  %v1064_v41 = vld [vmem:[%s1370_s1 + $0x1f8] sm:$0xff]  }
   0xb   :  { %v1057_v26 = vld [vmem:[%s1370_s1 + $0x8] sm:$0xff]   ;;  %v1061_v30 = vld [vmem:[%s1370_s1] sm:$0xff]   ;;  %v1065_v42 = vld [vmem:[%s1370_s1 + $0x138] sm:$0xff]  }
   0xc   :  { %924 = vmatpush3.bf16.msra.mxu0 %v1041_v10  ;;  %v1058_v27 = vld [vmem:[%s1370_s1 + $0x88] sm:$0xff]   ;;  %v1062_v31 = vld [vmem:[%s1370_s1 + $0x80] sm:$0xff]   ;;  %v1066_v43 = vld [vmem:[%s1370_s1 + $0x1b8] sm:$0xff]  }
   0xd   :  { %952 = vmatpush3.bf16.msra.mxu1 %v1042_v11  ;;  %925 = vmatprep.subr.bf16.mxu0 %v1043_v12  ;;  %v15_v32 = vld [vmem:[%s1371_s0] sm:$0xff]  ;;  %v16_v34 = vld [vmem:[%s1371_s0 + $0x8] sm:$0xff]  ;;  %v1067_v44 = vld [vmem:[%s1370_s1 + $0x170] sm:$0xff]  }
   0xe   :  { %953 = vmatprep.subr.bf16.mxu1 %v1044_v13  ;;  %v19_v33 = vld [vmem:[%s1371_s0 + $0x20] sm:$0xff]  ;;  %v20_v37 = vld [vmem:[%s1371_s0 + $0x28] sm:$0xff]  ;;  %v1068_v45 = vld [vmem:[%s1370_s1 + $0x1f0] sm:$0xff]  }
   0xf   :  { %v839_v35 = vcombine.low %v15_v32, %v19_v33  ;;  %v840_v36 = vcombine.high %v15_v32, %v19_v33  ;;  %v841_v38 = vcombine.low %v16_v34, %v20_v37  ;;  %v842_v39 = vcombine.high %v16_v34, %v20_v37  ;;  %v1069_v46 = vld [vmem:[%s1370_s1 + $0x130] sm:$0xff]   ;;  %v1071_v48 = vld [vmem:[%s1370_s1 + $0x168] sm:$0xff]   ;;  %v1075_v52 = vld [vmem:[%s1370_s1 + $0x160] sm:$0xff]  }
  0x10   :  { %926 = vmatpush3.bf16.msra.mxu0 %v1045_v14  ;;  %v1070_v47 = vld [vmem:[%s1370_s1 + $0x1b0] sm:$0xff]   ;;  %v1072_v49 = vld [vmem:[%s1370_s1 + $0x1e8] sm:$0xff]   ;;  %v1076_v53 = vld [vmem:[%s1370_s1 + $0x1e0] sm:$0xff]  }
  0x11   :  { %954 = vmatpush3.bf16.msra.mxu1 %v1046_v15  ;;  %927 = vmatprep.subr.bf16.mxu0 %v1047_v16  ;;  %v1073_v50 = vld [vmem:[%s1370_s1 + $0x128] sm:$0xff]   ;;  %v1077_v54 = vld [vmem:[%s1370_s1 + $0x120] sm:$0xff]   ;;  %v1079_v56 = vld [vmem:[%s1370_s1 + $0x158] sm:$0xff]  }
  0x12   :  { %955 = vmatprep.subr.bf16.mxu1 %v1048_v17  ;;  %662 = vmatprep.mubr.bf16.mxu0 %v840_v36  ;;  %v1074_v51 = vld [vmem:[%s1370_s1 + $0x1a8] sm:$0xff]   ;;  %v1078_v55 = vld [vmem:[%s1370_s1 + $0x1a0] sm:$0xff]   ;;  %v1080_v57 = vld [vmem:[%s1370_s1 + $0x1d8] sm:$0xff]  }
  0x13   :  { %711 = vmatprep.mubr.bf16.mxu1 %v842_v39  ;;  %v23_v58 = vld [vmem:[%s1371_s0 + $0x40] sm:$0xff]  ;;  %v1081_v61 = vld [vmem:[%s1370_s1 + $0x118] sm:$0xff]   ;;  %v24_v0 = vld [vmem:[%s1371_s0 + $0x48] sm:$0xff] }
  0x14   :  { %928 = vmatpush3.bf16.msra.mxu0 %v1049_v18  ;;  %v27_v59 = vld [vmem:[%s1371_s0 + $0x60] sm:$0xff]  ;;  %v1082_v63 = vld [vmem:[%s1370_s1 + $0x198] sm:$0xff]   ;;  %v28_v1 = vld [vmem:[%s1371_s0 + $0x68] sm:$0xff] }
  0x15   :  { %956 = vmatpush3.bf16.msra.mxu1 %v1050_v19  ;;  %929 = vmatprep.subr.bf16.mxu0 %v1051_v20  ;;  %v848_v60 = vcombine.high %v23_v58, %v27_v59  ;;  %v847_v62 = vcombine.low %v23_v58, %v27_v59  ;;  %v850_v2 = vcombine.high %v24_v0, %v28_v1  ;;  %v1083_v4 = vld [vmem:[%s1370_s1 + $0x150] sm:$0xff]   ;;  %v1087_v8 = vld [vmem:[%s1370_s1 + $0x148] sm:$0xff]   ;;  %v1091_v12 = vld [vmem:[%s1370_s1 + $0x140] sm:$0xff]  }
  0x16   :  { %957 = vmatprep.subr.bf16.mxu1 %v1052_v21  ;;  %v849_v3 = vcombine.low %v24_v0, %v28_v1  ;;  %v1084_v5 = vld [vmem:[%s1370_s1 + $0x1d0] sm:$0xff]   ;;  %v1088_v9 = vld [vmem:[%s1370_s1 + $0x1c8] sm:$0xff]   ;;  %v1092_v13 = vld [vmem:[%s1370_s1 + $0x1c0] sm:$0xff]  }
  0x17   :  { %v1085_v6 = vld [vmem:[%s1370_s1 + $0x110] sm:$0xff]   ;;  %v1089_v10 = vld [vmem:[%s1370_s1 + $0x108] sm:$0xff]   ;;  %v1093_v14 = vld [vmem:[%s1370_s1 + $0x100] sm:$0xff]  }
  0x18   :  { %930 = vmatpush3.bf16.msra.mxu0 %v1053_v22  ;;  %v1086_v7 = vld [vmem:[%s1370_s1 + $0x190] sm:$0xff]   ;;  %v1090_v11 = vld [vmem:[%s1370_s1 + $0x188] sm:$0xff]   ;;  %v1094_v15 = vld [vmem:[%s1370_s1 + $0x180] sm:$0xff]  }
  0x19   :  { %958 = vmatpush3.bf16.msra.mxu1 %v1054_v23  ;;  %931 = vmatprep.subr.bf16.mxu0 %v1055_v24  ;;  %v17_v16 = vld [vmem:[%s1371_s0 + $0x10] sm:$0xff]  ;;  %v18_v18 = vld [vmem:[%s1371_s0 + $0x18] sm:$0xff] }
  0x1a   :  { %959 = vmatprep.subr.bf16.mxu1 %v1056_v25  ;;  %v21_v17 = vld [vmem:[%s1371_s0 + $0x30] sm:$0xff]  ;;  %v22_v19 = vld [vmem:[%s1371_s0 + $0x38] sm:$0xff] }
  0x1b   :  { %v843_v20 = vcombine.low %v17_v16, %v21_v17  ;;  %v844_v21 = vcombine.high %v17_v16, %v21_v17  ;;  %v845_v22 = vcombine.low %v18_v18, %v22_v19  ;;  %v846_v23 = vcombine.high %v18_v18, %v22_v19  ;;  %v25_v24 = vld [vmem:[%s1371_s0 + $0x50] sm:$0xff] }
  0x1c   :  { %932 = vmatpush3.bf16.msra.mxu0 %v1057_v26  ;;  %v29_v25 = vld [vmem:[%s1371_s0 + $0x70] sm:$0xff]  ;;  %v26_v26 = vld [vmem:[%s1371_s0 + $0x58] sm:$0xff] }
  0x1d   :  { %960 = vmatpush3.bf16.msra.mxu1 %v1058_v27  ;;  %933 = vmatprep.subr.bf16.mxu0 %v1059_v28  ;;  %v852_v27 = vcombine.high %v25_v24, %v29_v25  ;;  %v30_v28 = vld [vmem:[%s1371_s0 + $0x78] sm:$0xff] }
  0x1e   :  { %961 = vmatprep.subr.bf16.mxu1 %v1060_v29  ;;  %v854_v29 = vcombine.high %v26_v26, %v30_v28 }
  0x20   :  { %934 = vmatpush3.bf16.msra.mxu0 %v1061_v30  ;;  %v851_v30 = vcombine.low %v25_v24, %v29_v25 }
  0x21   :  { %962 = vmatpush3.bf16.msra.mxu1 %v1062_v31  ;;  %975 = vmatprep.subr.bf16.mxu0 %v1063_v40  ;;  %v853_v31 = vcombine.low %v26_v26, %v30_v28 }
  0x22   :  { %1003 = vmatprep.subr.bf16.mxu1 %v1064_v41 }
  0x23   :  { %663 = vmatmul.mubr.bf16.vlgmr.msra.gmra.mxu0 %v839_v35 }
  0x24   :  { %712 = vmatmul.mubr.bf16.vlgmr.msra.gmra.mxu1 %v841_v38  ;;  %976 = vmatpush3.bf16.msra.mxu0 %v1065_v42 }
  0x25   :  { %1004 = vmatpush3.bf16.msra.mxu1 %v1066_v43  ;;  %977 = vmatprep.subr.bf16.mxu0 %v1067_v44 }
  0x26   :  { %1005 = vmatprep.subr.bf16.mxu1 %v1068_v45  ;;  %670 = vmatprep.mubr.bf16.mxu0 %v848_v60 }
  0x27   :  { %719 = vmatprep.mubr.bf16.mxu1 %v850_v2 }
  0x28   :  { %978 = vmatpush3.bf16.msra.mxu0 %v1069_v46 }
  0x29   :  { %1006 = vmatpush3.bf16.msra.mxu1 %v1070_v47  ;;  %979 = vmatprep.subr.bf16.mxu0 %v1071_v48  ;;  %v838_v47 = vld [vmem:[%s1372_s2] ss:$0 sm:$0xff] }
  0x2a   :  { %1007 = vmatprep.subr.bf16.mxu1 %v1072_v49 }
  0x2b   :  { %671 = vmatmul.mubr.bf16.gmra.mxu0 %v847_v62 }
  0x2c   :  { %980 = vmatpush3.bf16.msra.mxu0 %v1073_v50  ;;  %720 = vmatmul.mubr.bf16.gmra.mxu1 %v849_v3 }
  0x2d   :  { %1008 = vmatpush3.bf16.msra.mxu1 %v1074_v51  ;;  %981 = vmatprep.subr.bf16.mxu0 %v1075_v52 }
  0x2e   :  { %1009 = vmatprep.subr.bf16.mxu1 %v1076_v53  ;;  %760 = vmatprep.mubr.bf16.mxu0 %v844_v21 }
  0x2f   :  { %809 = vmatprep.mubr.bf16.mxu1 %v846_v23 }
  0x30   :  { %982 = vmatpush3.bf16.msra.mxu0 %v1077_v54 }
  0x31   :  { %1010 = vmatpush3.bf16.msra.mxu1 %v1078_v55  ;;  %983 = vmatprep.subr.bf16.mxu0 %v1079_v56 }
  0x32   :  { %1011 = vmatprep.subr.bf16.mxu1 %v1080_v57 }
  0x34   :  { %984 = vmatpush3.bf16.msra.mxu0 %v1081_v61 }
  0x35   :  { %1012 = vmatpush3.bf16.msra.mxu1 %v1082_v63  ;;  %985 = vmatprep.subr.bf16.mxu0 %v1083_v4 }
  0x36   :  { %1013 = vmatprep.subr.bf16.mxu1 %v1084_v5 }
  0x38   :  { %986 = vmatpush3.bf16.msra.mxu0 %v1085_v6 }
  0x39   :  { %1014 = vmatpush3.bf16.msra.mxu1 %v1086_v7  ;;  %987 = vmatprep.subr.bf16.mxu0 %v1087_v8 }
  0x3a   :  { %1015 = vmatprep.subr.bf16.mxu1 %v1088_v9 }
  0x3c   :  { %988 = vmatpush3.bf16.msra.mxu0 %v1089_v10 }
  0x3d   :  { %1016 = vmatpush3.bf16.msra.mxu1 %v1090_v11  ;;  %989 = vmatprep.subr.bf16.mxu0 %v1091_v12 }
  0x3e   :  { %1017 = vmatprep.subr.bf16.mxu1 %v1092_v13 }
  0x40   :  { %990 = vmatpush3.bf16.msra.mxu0 %v1093_v14 }
  0x41   :  { %1018 = vmatpush3.bf16.msra.mxu1 %v1094_v15 }
  0x43   :  { %761 = vmatmul.mubr.bf16.vlgmr.msra.gmra.mxu0 %v843_v20 }
  0x44   :  { %810 = vmatmul.mubr.bf16.vlgmr.msra.gmra.mxu1 %v845_v22  ;;  %768 = vmatprep.mubr.bf16.mxu0 %v852_v27 }
  0x45   :  { %817 = vmatprep.mubr.bf16.mxu1 %v854_v29 }
  0x4b   :  { %769 = vmatmul.mubr.bf16.gmra.mxu0 %v851_v30 }
  0x4c   :  { %818 = vmatmul.mubr.bf16.gmra.mxu1 %v853_v31 }
  0xe3   :  { %v935_v32 = vpop.f32.mrf.mxu0 }
  0xe4   :  { %v963_v33 = vpop.f32.mrf.mxu1 }
  0xe5   :  { %v936_v34 = vpop.f32.mrf.mxu0 }
  0xe6   :  { %v964_v35 = vpop.f32.mrf.mxu1  ;;  %v937_v46 = vadd.f32 %v936_v34, %v935_v32 }
  0xe7   :  { %v938_v36 = vpop.f32.mrf.mxu0  ;;  %v965_v51 = vadd.f32 %v964_v35, %v963_v33 }
  0xe8   :  { %v966_v37 = vpop.f32.mrf.mxu1  ;;  %v665_v50 = vadd.f32 %v937_v46, %v838_v47 }
  0xe9   :  { %v939_v38 = vpop.f32.mrf.mxu0 }
  0xea   :  { %v967_v39 = vpop.f32.mrf.mxu1  ;;  %v940_v52 = vadd.f32 %v939_v38, %v938_v36  ;;  %v714_v58 = vadd.f32 %v965_v51, %v665_v50 }
  0xeb   :  { %v941_v40 = vpop.f32.mrf.mxu0  ;;  %v968_v63 = vadd.f32 %v967_v39, %v966_v37 }
  0xec   :  { %v969_v41 = vpop.f32.mrf.mxu1  ;;  %v668_v59 = vadd.f32 %v940_v52, %v838_v47 }
  0xed   :  { %v942_v42 = vpop.f32.mrf.mxu0 }
  0xee   :  { %v970_v43 = vpop.f32.mrf.mxu1  ;;  %v943_v55 = vadd.f32 %v942_v42, %v941_v40  ;;  %v717_v6 = vadd.f32 %v968_v63, %v668_v59 }
  0xef   :  { %v944_v44 = vpop.f32.mrf.mxu0  ;;  %v971_v3 = vadd.f32 %v970_v43, %v969_v41 }
  0xf0   :  { %v972_v45 = vpop.f32.mrf.mxu1  ;;  %v673_v2 = vadd.f32 %v943_v55, %v838_v47 }
  0xf1   :  { %v945_v48 = vpop.f32.mrf.mxu0 }
  0xf2   :  { %v973_v49 = vpop.f32.mrf.mxu1  ;;  %v946_v7 = vadd.f32 %v945_v48, %v944_v44  ;;  %v722_v15 = vadd.f32 %v971_v3, %v673_v2 }
  0xf3   :  { %v974_v19 = vadd.f32 %v973_v49, %v972_v45 }
  0xf4   :  { %v676_v18 = vadd.f32 %v946_v7, %v838_v47 }
  0xf6   :  { %v725_v29 = vadd.f32 %v974_v19, %v676_v18 }
 0x103   :  { %v991_v53 = vpop.f32.mrf.mxu0 }
 0x104   :  { %v1019_v54 = vpop.f32.mrf.mxu1 }
 0x105   :  { %v992_v56 = vpop.f32.mrf.mxu0 }
 0x106   :  { %v1020_v57 = vpop.f32.mrf.mxu1  ;;  %v993_v60 = vadd.f32 %v992_v56, %v991_v53 }
 0x107   :  { %v994_v61 = vpop.f32.mrf.mxu0  ;;  %v1021_v1 = vadd.f32 %v1020_v57, %v1019_v54 }
 0x108   :  { %v1022_v62 = vpop.f32.mrf.mxu1  ;;  %v763_v0 = vadd.f32 %v993_v60, %v714_v58 }
 0x109   :  { %v995_v4 = vpop.f32.mrf.mxu0 }
 0x10a   :  { %v1023_v5 = vpop.f32.mrf.mxu1  ;;  %v812_v8 = vadd.f32 %v1021_v1, %v763_v0  ;;  %v996_v9 = vadd.f32 %v995_v4, %v994_v61 }
 0x10b   :  { %v997_v10 = vpop.f32.mrf.mxu0  ;;  %v1024_v14 = vadd.f32 %v1023_v5, %v1022_v62 }
 0x10c   :  { %v1025_v11 = vpop.f32.mrf.mxu1  ;;  %v826_v12 = vmax.f32 %v812_v8, 0.0  ;;  %v766_v13 = vadd.f32 %v996_v9, %v717_v6 }
 0x10d   :  { %v998_v16 = vpop.f32.mrf.mxu0 }
 0x10e   :  { %v1026_v17 = vpop.f32.mrf.mxu1  ;;  %830 = vst [vmem:[%s1373_s3] sm:$0xff] %v826_v12  ;;  %v815_v20 = vadd.f32 %v1024_v14, %v766_v13  ;;  %v999_v21 = vadd.f32 %v998_v16, %v997_v10 }
 0x10f   :  { %v1000_v22 = vpop.f32.mrf.mxu0  ;;  %v1027_v26 = vadd.f32 %v1026_v17, %v1025_v11 }
 0x110   :  { %v1028_v23 = vpop.f32.mrf.mxu1  ;;  %v827_v24 = vmax.f32 %v815_v20, 0.0  ;;  %v771_v25 = vadd.f32 %v999_v21, %v722_v15 }
 0x111   :  { %v1001_v27 = vpop.f32.mrf.mxu0 }
 0x112   :  { %v1029_v28 = vpop.f32.mrf.mxu1  ;;  %831 = vst [vmem:[%s1373_s3 + $0x8] sm:$0xff] %v827_v24  ;;  %v820_v30 = vadd.f32 %v1027_v26, %v771_v25  ;;  %v1002_v31 = vadd.f32 %v1001_v27, %v1000_v22 }
 0x113   :  { %v1030_v34 = vadd.f32 %v1029_v28, %v1028_v23 }
 0x114   :  { %v828_v32 = vmax.f32 %v820_v30, 0.0  ;;  %v774_v33 = vadd.f32 %v1002_v31, %v725_v29 }
 0x116   :  { %832 = vst [vmem:[%s1373_s3 + $0x10] sm:$0xff] %v828_v32  ;;  %v823_v35 = vadd.f32 %v1030_v34, %v774_v33 }
 0x118   :  { %v829_v36 = vmax.f32 %v823_v35, 0.0 }
 0x11a   :  { %833 = vst [vmem:[%s1373_s3 + $0x18] sm:$0xff] %v829_v36 }

// kernel: vqvae_forward.13
= control target key start
LH: loop header
LB: loop body
LE: loop exit
PB: predicated region body
PF: predicated region fallthrough
CT: control target
= control target key end

     0   :  { %s3489_s1 = inlined_call_operand.vmem [shape: bf16[1,2048,256], index: 1, kind: input, shape index: {}]   ;;  %s3490_s0 = inlined_call_operand.vmem [shape: bf16[1,8,2048], index: 0, kind: input, shape index: {}]   ;;  %s3491_s2 = inlined_call_operand.vmem [shape: f32[1,256], index: 2, kind: input, shape index: {}]   ;;  %s3492_s3 = inlined_call_operand.vmem [shape: f32[1,8,256], index: 3, kind: output, shape index: {}]  }
   0x1   :  { %v2232_v0 = vld [vmem:[%s3489_s1 + $0x74] ss:$8 sps:$4 sm:$0xff]   ;;  %v2236_v2 = vld [vmem:[%s3489_s1 + $0x70] ss:$8 sps:$4 sm:$0xff]   ;;  %v2238_v4 = vld [vmem:[%s3489_s1 + $0x64] ss:$8 sps:$4 sm:$0xff]  }
   0x2   :  { %v2234_v1 = vld [vmem:[%s3489_s1 + $0x174] ss:$8 sps:$4 sm:$0xff]   ;;  %1626 = vmatprep.subr.bf16.mxu0 %v2232_v0  ;;  %v2237_v3 = vld [vmem:[%s3489_s1 + $0x170] ss:$8 sps:$4 sm:$0xff]   ;;  %v2240_v5 = vld [vmem:[%s3489_s1 + $0x164] ss:$8 sps:$4 sm:$0xff]  }
   0x3   :  { %1667 = vmatprep.subr.bf16.mxu1 %v2234_v1  ;;  %1627 = vmatpush1.bf16.msra.mxu0 %v2236_v2  ;;  %v2242_v6 = vld [vmem:[%s3489_s1 + $0x60] ss:$8 sps:$4 sm:$0xff]   ;;  %v2244_v8 = vld [vmem:[%s3489_s1 + $0x54] ss:$8 sps:$4 sm:$0xff]   ;;  %v2248_v10 = vld [vmem:[%s3489_s1 + $0x50] ss:$8 sps:$4 sm:$0xff]  }
   0x4   :  { %1668 = vmatpush1.bf16.msra.mxu1 %v2237_v3  ;;  %1628 = vmatprep.subr.bf16.mxu0 %v2238_v4  ;;  %v2243_v7 = vld [vmem:[%s3489_s1 + $0x160] ss:$8 sps:$4 sm:$0xff]   ;;  %v2246_v9 = vld [vmem:[%s3489_s1 + $0x154] ss:$8 sps:$4 sm:$0xff]   ;;  %v2249_v11 = vld [vmem:[%s3489_s1 + $0x150] ss:$8 sps:$4 sm:$0xff]  }
   0x5   :  { %1669 = vmatprep.subr.bf16.mxu1 %v2240_v5  ;;  %v2250_v12 = vld [vmem:[%s3489_s1 + $0x44] ss:$8 sps:$4 sm:$0xff]   ;;  %v2254_v14 = vld [vmem:[%s3489_s1 + $0x40] ss:$8 sps:$4 sm:$0xff]   ;;  %v2256_v16 = vld [vmem:[%s3489_s1 + $0x34] ss:$8 sps:$4 sm:$0xff]  }
   0x6   :  { %v2252_v13 = vld [vmem:[%s3489_s1 + $0x144] ss:$8 sps:$4 sm:$0xff]   ;;  %v2255_v15 = vld [vmem:[%s3489_s1 + $0x140] ss:$8 sps:$4 sm:$0xff]   ;;  %v2258_v17 = vld [vmem:[%s3489_s1 + $0x134] ss:$8 sps:$4 sm:$0xff]  }
   0x7   :  { %1629 = vmatpush1.bf16.msra.mxu0 %v2242_v6  ;;  %v2260_v18 = vld [vmem:[%s3489_s1 + $0x30] ss:$8 sps:$4 sm:$0xff]   ;;  %v2262_v20 = vld [vmem:[%s3489_s1 + $0x24] ss:$8 sps:$4 sm:$0xff]   ;;  %v2266_v22 = vld [vmem:[%s3489_s1 + $0x20] ss:$8 sps:$4 sm:$0xff]  }
   0x8   :  { %1670 = vmatpush1.bf16.msra.mxu1 %v2243_v7  ;;  %1630 = vmatprep.subr.bf16.mxu0 %v2244_v8  ;;  %v2261_v19 = vld [vmem:[%s3489_s1 + $0x130] ss:$8 sps:$4 sm:$0xff]   ;;  %v2264_v21 = vld [vmem:[%s3489_s1 + $0x124] ss:$8 sps:$4 sm:$0xff]   ;;  %v2267_v23 = vld [vmem:[%s3489_s1 + $0x120] ss:$8 sps:$4 sm:$0xff]  }
   0x9   :  { %1671 = vmatprep.subr.bf16.mxu1 %v2246_v9  ;;  %v2268_v24 = vld [vmem:[%s3489_s1 + $0x14] ss:$8 sps:$4 sm:$0xff]   ;;  %v2272_v26 = vld [vmem:[%s3489_s1 + $0x10] ss:$8 sps:$4 sm:$0xff]   ;;  %v2274_v28 = vld [vmem:[%s3489_s1 + $0x4] ss:$8 sps:$4 sm:$0xff]  }
   0xa   :  { %v2270_v25 = vld [vmem:[%s3489_s1 + $0x114] ss:$8 sps:$4 sm:$0xff]   ;;  %v2273_v27 = vld [vmem:[%s3489_s1 + $0x110] ss:$8 sps:$4 sm:$0xff]   ;;  %v2276_v29 = vld [vmem:[%s3489_s1 + $0x104] ss:$8 sps:$4 sm:$0xff]  }
   0xb   :  { %1631 = vmatpush1.bf16.msra.mxu0 %v2248_v10  ;;  %v2278_v30 = vld [vmem:[%s3489_s1] ss:$8 sps:$4 sm:$0xff]   ;;  %v2280_v32 = vld [vmem:[%s3489_s1 + $0xf4] ss:$8 sps:$4 sm:$0xff]   ;;  %v2284_v34 = vld [vmem:[%s3489_s1 + $0xf0] ss:$8 sps:$4 sm:$0xff]  }
   0xc   :  { %1672 = vmatpush1.bf16.msra.mxu1 %v2249_v11  ;;  %1632 = vmatprep.subr.bf16.mxu0 %v2250_v12  ;;  %v2279_v31 = vld [vmem:[%s3489_s1 + $0x100] ss:$8 sps:$4 sm:$0xff]   ;;  %v2282_v33 = vld [vmem:[%s3489_s1 + $0x1f4] ss:$8 sps:$4 sm:$0xff]   ;;  %v2285_v35 = vld [vmem:[%s3489_s1 + $0x1f0] ss:$8 sps:$4 sm:$0xff]  }
   0xd   :  { %1673 = vmatprep.subr.bf16.mxu1 %v2252_v13  ;;  %v2286_v36 = vld [vmem:[%s3489_s1 + $0xe4] ss:$8 sps:$4 sm:$0xff]   ;;  %v2290_v38 = vld [vmem:[%s3489_s1 + $0xe0] ss:$8 sps:$4 sm:$0xff]   ;;  %v2292_v40 = vld [vmem:[%s3489_s1 + $0xd4] ss:$8 sps:$4 sm:$0xff]  }
   0xe   :  { %v2288_v37 = vld [vmem:[%s3489_s1 + $0x1e4] ss:$8 sps:$4 sm:$0xff]   ;;  %v2291_v39 = vld [vmem:[%s3489_s1 + $0x1e0] ss:$8 sps:$4 sm:$0xff]   ;;  %v2294_v41 = vld [vmem:[%s3489_s1 + $0x1d4] ss:$8 sps:$4 sm:$0xff]  }
   0xf   :  { %1633 = vmatpush1.bf16.msra.mxu0 %v2254_v14  ;;  %v2296_v42 = vld [vmem:[%s3489_s1 + $0xd0] ss:$8 sps:$4 sm:$0xff]   ;;  %v2298_v44 = vld [vmem:[%s3489_s1 + $0xc4] ss:$8 sps:$4 sm:$0xff]   ;;  %v2302_v49 = vld [vmem:[%s3489_s1 + $0xc0] ss:$8 sps:$4 sm:$0xff]  }
  0x10   :  { %1674 = vmatpush1.bf16.msra.mxu1 %v2255_v15  ;;  %1634 = vmatprep.subr.bf16.mxu0 %v2256_v16  ;;  %v2297_v43 = vld [vmem:[%s3489_s1 + $0x1d0] ss:$8 sps:$4 sm:$0xff]   ;;  %v2300_v45 = vld [vmem:[%s3489_s1 + $0x1c4] ss:$8 sps:$4 sm:$0xff]   ;;  %v2303_v50 = vld [vmem:[%s3489_s1 + $0x1c0] ss:$8 sps:$4 sm:$0xff]  }
  0x11   :  { %1675 = vmatprep.subr.bf16.mxu1 %v2258_v17  ;;  %v14_v46 = vld [vmem:[%s3490_s0] sm:$0xff]  ;;  %v15_v48 = vld [vmem:[%s3490_s0 + $0x8] sm:$0xff]  ;;  %v2304_v52 = vld [vmem:[%s3489_s1 + $0xb4] ss:$8 sps:$4 sm:$0xff]  }
  0x12   :  { %v1961_v47 = vcombine.high %v14_v46, %v14_v46  ;;  %v1963_v51 = vcombine.high %v15_v48, %v15_v48  ;;  %v2306_v53 = vld [vmem:[%s3489_s1 + $0x1b4] ss:$8 sps:$4 sm:$0xff]   ;;  %v2308_v54 = vld [vmem:[%s3489_s1 + $0xb0] ss:$8 sps:$4 sm:$0xff]   ;;  %v2310_v56 = vld [vmem:[%s3489_s1 + $0xa4] ss:$8 sps:$4 sm:$0xff]   ;;  %v1960_v6 = vcombine.low %v14_v46, %v14_v46  ;;  %v1962_v7 = vcombine.low %v15_v48, %v15_v48 }
  0x13   :  { %1635 = vmatpush1.bf16.msra.mxu0 %v2260_v18  ;;  %v2309_v55 = vld [vmem:[%s3489_s1 + $0x1b0] ss:$8 sps:$4 sm:$0xff]   ;;  %v2312_v57 = vld [vmem:[%s3489_s1 + $0x1a4] ss:$8 sps:$4 sm:$0xff]   ;;  %v2314_v58 = vld [vmem:[%s3489_s1 + $0xa0] ss:$8 sps:$4 sm:$0xff]  }
  0x14   :  { %1676 = vmatpush1.bf16.msra.mxu1 %v2261_v19  ;;  %1636 = vmatprep.subr.bf16.mxu0 %v2262_v20  ;;  %v2315_v59 = vld [vmem:[%s3489_s1 + $0x1a0] ss:$8 sps:$4 sm:$0xff]   ;;  %v2316_v60 = vld [vmem:[%s3489_s1 + $0x94] ss:$8 sps:$4 sm:$0xff]   ;;  %v2320_v62 = vld [vmem:[%s3489_s1 + $0x90] ss:$8 sps:$4 sm:$0xff]  }
  0x15   :  { %1677 = vmatprep.subr.bf16.mxu1 %v2264_v21  ;;  %1658 = vmatprep.mubr.bf16.mxu0 %v1961_v47  ;;  %v2318_v61 = vld [vmem:[%s3489_s1 + $0x194] ss:$8 sps:$4 sm:$0xff]   ;;  %v2321_v63 = vld [vmem:[%s3489_s1 + $0x190] ss:$8 sps:$4 sm:$0xff]   ;;  %v2322_v0 = vld [vmem:[%s3489_s1 + $0x84] ss:$8 sps:$4 sm:$0xff]  }
  0x16   :  { %1699 = vmatprep.mubr.bf16.mxu1 %v1963_v51  ;;  %v2324_v1 = vld [vmem:[%s3489_s1 + $0x184] ss:$8 sps:$4 sm:$0xff]   ;;  %v2326_v2 = vld [vmem:[%s3489_s1 + $0x80] ss:$8 sps:$4 sm:$0xff]   ;;  %v2334_v4 = vld [vmem:[%s3489_s1 + $0x274] ss:$8 sps:$4 sm:$0xff]  }
  0x17   :  { %1637 = vmatpush1.bf16.msra.mxu0 %v2266_v22  ;;  %v2327_v3 = vld [vmem:[%s3489_s1 + $0x180] ss:$8 sps:$4 sm:$0xff]   ;;  %v2337_v5 = vld [vmem:[%s3489_s1 + $0x374] ss:$8 sps:$4 sm:$0xff]   ;;  %v2332_v8 = vld [vmem:[%s3489_s1 + $0x270] ss:$8 sps:$4 sm:$0xff]  }
  0x18   :  { %1678 = vmatpush1.bf16.msra.mxu1 %v2267_v23  ;;  %1638 = vmatprep.subr.bf16.mxu0 %v2268_v24  ;;  %v2335_v9 = vld [vmem:[%s3489_s1 + $0x370] ss:$8 sps:$4 sm:$0xff]   ;;  %v2340_v10 = vld [vmem:[%s3489_s1 + $0x264] ss:$8 sps:$4 sm:$0xff]   ;;  %v2338_v12 = vld [vmem:[%s3489_s1 + $0x260] ss:$8 sps:$4 sm:$0xff]  }
  0x19   :  { %1679 = vmatprep.subr.bf16.mxu1 %v2270_v25  ;;  %v2343_v11 = vld [vmem:[%s3489_s1 + $0x364] ss:$8 sps:$4 sm:$0xff]   ;;  %v2341_v13 = vld [vmem:[%s3489_s1 + $0x360] ss:$8 sps:$4 sm:$0xff]   ;;  %v2346_v14 = vld [vmem:[%s3489_s1 + $0x254] ss:$8 sps:$4 sm:$0xff]  }
  0x1a   :  { %v2349_v15 = vld [vmem:[%s3489_s1 + $0x354] ss:$8 sps:$4 sm:$0xff]   ;;  %v2344_v16 = vld [vmem:[%s3489_s1 + $0x250] ss:$8 sps:$4 sm:$0xff]   ;;  %v2352_v18 = vld [vmem:[%s3489_s1 + $0x244] ss:$8 sps:$4 sm:$0xff]  }
  0x1b   :  { %1639 = vmatpush1.bf16.msra.mxu0 %v2272_v26  ;;  %v2347_v17 = vld [vmem:[%s3489_s1 + $0x350] ss:$8 sps:$4 sm:$0xff]   ;;  %v2355_v19 = vld [vmem:[%s3489_s1 + $0x344] ss:$8 sps:$4 sm:$0xff]   ;;  %v2350_v20 = vld [vmem:[%s3489_s1 + $0x240] ss:$8 sps:$4 sm:$0xff]  }
  0x1c   :  { %1680 = vmatpush1.bf16.msra.mxu1 %v2273_v27  ;;  %1640 = vmatprep.subr.bf16.mxu0 %v2274_v28  ;;  %v2353_v21 = vld [vmem:[%s3489_s1 + $0x340] ss:$8 sps:$4 sm:$0xff]   ;;  %v2358_v22 = vld [vmem:[%s3489_s1 + $0x234] ss:$8 sps:$4 sm:$0xff]   ;;  %v2356_v24 = vld [vmem:[%s3489_s1 + $0x230] ss:$8 sps:$4 sm:$0xff]  }
  0x1d   :  { %1681 = vmatprep.subr.bf16.mxu1 %v2276_v29  ;;  %v2361_v23 = vld [vmem:[%s3489_s1 + $0x334] ss:$8 sps:$4 sm:$0xff]   ;;  %v2359_v25 = vld [vmem:[%s3489_s1 + $0x330] ss:$8 sps:$4 sm:$0xff]   ;;  %v2364_v26 = vld [vmem:[%s3489_s1 + $0x224] ss:$8 sps:$4 sm:$0xff]  }
  0x1e   :  { %v2367_v27 = vld [vmem:[%s3489_s1 + $0x324] ss:$8 sps:$4 sm:$0xff]   ;;  %v2362_v28 = vld [vmem:[%s3489_s1 + $0x220] ss:$8 sps:$4 sm:$0xff]   ;;  %v2397_v51 = vld [vmem:[%s3489_s1 + $0x3d4] ss:$8 sps:$4 sm:$0xff]  }
  0x1f   :  { %1641 = vmatpush1.bf16.msra.mxu0 %v2278_v30  ;;  %v2365_v29 = vld [vmem:[%s3489_s1 + $0x320] ss:$8 sps:$4 sm:$0xff]   ;;  %v2370_v30 = vld [vmem:[%s3489_s1 + $0x214] ss:$8 sps:$4 sm:$0xff]   ;;  %v2388_v46 = vld [vmem:[%s3489_s1 + $0x2e4] ss:$8 sps:$4 sm:$0xff]  }
  0x20   :  { %1682 = vmatpush1.bf16.msra.mxu1 %v2279_v31  ;;  %1642 = vmatprep.subr.bf16.mxu0 %v2280_v32  ;;  %v2373_v31 = vld [vmem:[%s3489_s1 + $0x314] ss:$8 sps:$4 sm:$0xff]   ;;  %v2391_v47 = vld [vmem:[%s3489_s1 + $0x3e4] ss:$8 sps:$4 sm:$0xff]   ;;  %v2386_v48 = vld [vmem:[%s3489_s1 + $0x2e0] ss:$8 sps:$4 sm:$0xff]  }
  0x21   :  { %1683 = vmatprep.subr.bf16.mxu1 %v2282_v33  ;;  %v2931_v32 = vld [vmem:[%s3490_s0 + $0x10] sm:$0xff]  ;;  %v2936_v33 = vld [vmem:[%s3490_s0 + $0x18] sm:$0xff] }
  0x23   :  { %1643 = vmatpush2.bf16.msra.mxu0 %v2284_v34  ;;  %v2368_v34 = vld [vmem:[%s3489_s1 + $0x210] ss:$8 sps:$4 sm:$0xff]  }
  0x24   :  { %1684 = vmatpush2.bf16.msra.mxu1 %v2285_v35  ;;  %1644 = vmatprep.subr.bf16.mxu0 %v2286_v36  ;;  %v2371_v35 = vld [vmem:[%s3489_s1 + $0x310] ss:$8 sps:$4 sm:$0xff]   ;;  %v1965_v36 = vcombine.high %v2931_v32, %v2931_v32 }
  0x25   :  { %1685 = vmatprep.subr.bf16.mxu1 %v2288_v37  ;;  %v1967_v37 = vcombine.high %v2936_v33, %v2936_v33 }
  0x27   :  { %1645 = vmatpush2.bf16.msra.mxu0 %v2290_v38  ;;  %v2376_v38 = vld [vmem:[%s3489_s1 + $0x204] ss:$8 sps:$4 sm:$0xff]  }
  0x28   :  { %1686 = vmatpush2.bf16.msra.mxu1 %v2291_v39  ;;  %1646 = vmatprep.subr.bf16.mxu0 %v2292_v40  ;;  %v2379_v39 = vld [vmem:[%s3489_s1 + $0x304] ss:$8 sps:$4 sm:$0xff]   ;;  %v2374_v40 = vld [vmem:[%s3489_s1 + $0x200] ss:$8 sps:$4 sm:$0xff]  }
  0x29   :  { %1687 = vmatprep.subr.bf16.mxu1 %v2294_v41  ;;  %v2377_v41 = vld [vmem:[%s3489_s1 + $0x300] ss:$8 sps:$4 sm:$0xff]  }
  0x2b   :  { %1647 = vmatpush2.bf16.msra.mxu0 %v2296_v42  ;;  %v2382_v42 = vld [vmem:[%s3489_s1 + $0x2f4] ss:$8 sps:$4 sm:$0xff]  }
  0x2c   :  { %1688 = vmatpush2.bf16.msra.mxu1 %v2297_v43  ;;  %1648 = vmatprep.subr.bf16.mxu0 %v2298_v44  ;;  %v2385_v43 = vld [vmem:[%s3489_s1 + $0x3f4] ss:$8 sps:$4 sm:$0xff]   ;;  %v2380_v44 = vld [vmem:[%s3489_s1 + $0x2f0] ss:$8 sps:$4 sm:$0xff]  }
  0x2d   :  { %1689 = vmatprep.subr.bf16.mxu1 %v2300_v45  ;;  %v2383_v45 = vld [vmem:[%s3489_s1 + $0x3f0] ss:$8 sps:$4 sm:$0xff]  }
  0x2f   :  { %1649 = vmatpush2.bf16.msra.mxu0 %v2302_v49  ;;  %v2389_v49 = vld [vmem:[%s3489_s1 + $0x3e0] ss:$8 sps:$4 sm:$0xff]  }
  0x30   :  { %1690 = vmatpush2.bf16.msra.mxu1 %v2303_v50  ;;  %1650 = vmatprep.subr.bf16.mxu0 %v2304_v52  ;;  %v2394_v50 = vld [vmem:[%s3489_s1 + $0x2d4] ss:$8 sps:$4 sm:$0xff]   ;;  %v2392_v52 = vld [vmem:[%s3489_s1 + $0x2d0] ss:$8 sps:$4 sm:$0xff]  }
  0x31   :  { %1691 = vmatprep.subr.bf16.mxu1 %v2306_v53  ;;  %v2395_v53 = vld [vmem:[%s3489_s1 + $0x3d0] ss:$8 sps:$4 sm:$0xff]  }
  0x33   :  { %1651 = vmatpush2.bf16.msra.mxu0 %v2308_v54  ;;  %v2400_v54 = vld [vmem:[%s3489_s1 + $0x2c4] ss:$8 sps:$4 sm:$0xff]  }
  0x34   :  { %1692 = vmatpush2.bf16.msra.mxu1 %v2309_v55  ;;  %1652 = vmatprep.subr.bf16.mxu0 %v2310_v56  ;;  %v2403_v55 = vld [vmem:[%s3489_s1 + $0x3c4] ss:$8 sps:$4 sm:$0xff]   ;;  %v2398_v56 = vld [vmem:[%s3489_s1 + $0x2c0] ss:$8 sps:$4 sm:$0xff]  }
  0x35   :  { %1693 = vmatprep.subr.bf16.mxu1 %v2312_v57  ;;  %v2401_v57 = vld [vmem:[%s3489_s1 + $0x3c0] ss:$8 sps:$4 sm:$0xff]  }
  0x37   :  { %1653 = vmatpush2.bf16.msra.mxu0 %v2314_v58  ;;  %v2406_v58 = vld [vmem:[%s3489_s1 + $0x2b4] ss:$8 sps:$4 sm:$0xff]  }
  0x38   :  { %1694 = vmatpush2.bf16.msra.mxu1 %v2315_v59  ;;  %1654 = vmatprep.subr.bf16.mxu0 %v2316_v60  ;;  %v2409_v59 = vld [vmem:[%s3489_s1 + $0x3b4] ss:$8 sps:$4 sm:$0xff]   ;;  %v2404_v60 = vld [vmem:[%s3489_s1 + $0x2b0] ss:$8 sps:$4 sm:$0xff]  }
  0x39   :  { %1695 = vmatprep.subr.bf16.mxu1 %v2318_v61  ;;  %v2407_v61 = vld [vmem:[%s3489_s1 + $0x3b0] ss:$8 sps:$4 sm:$0xff]  }
  0x3b   :  { %1655 = vmatpush2.bf16.msra.mxu0 %v2320_v62  ;;  %v2412_v62 = vld [vmem:[%s3489_s1 + $0x2a4] ss:$8 sps:$4 sm:$0xff]  }
  0x3c   :  { %1696 = vmatpush2.bf16.msra.mxu1 %v2321_v63  ;;  %1656 = vmatprep.subr.bf16.mxu0 %v2322_v0  ;;  %v2415_v63 = vld [vmem:[%s3489_s1 + $0x3a4] ss:$8 sps:$4 sm:$0xff]   ;;  %v2410_v0 = vld [vmem:[%s3489_s1 + $0x2a0] ss:$8 sps:$4 sm:$0xff]  }
  0x3d   :  { %1697 = vmatprep.subr.bf16.mxu1 %v2324_v1  ;;  %v2413_v1 = vld [vmem:[%s3489_s1 + $0x3a0] ss:$8 sps:$4 sm:$0xff]  }
  0x3f   :  { %1657 = vmatpush2.bf16.msra.mxu0 %v2326_v2  ;;  %v2418_v2 = vld [vmem:[%s3489_s1 + $0x294] ss:$8 sps:$4 sm:$0xff]  }
  0x40   :  { %1698 = vmatpush2.bf16.msra.mxu1 %v2327_v3  ;;  %1708 = vmatprep.subr.bf16.mxu0 %v2334_v4  ;;  %v2421_v3 = vld [vmem:[%s3489_s1 + $0x394] ss:$8 sps:$4 sm:$0xff]   ;;  %v2416_v4 = vld [vmem:[%s3489_s1 + $0x290] ss:$8 sps:$4 sm:$0xff]  }
  0x41   :  { %1749 = vmatprep.subr.bf16.mxu1 %v2337_v5  ;;  %v2419_v5 = vld [vmem:[%s3489_s1 + $0x390] ss:$8 sps:$4 sm:$0xff]  }
  0x42   :  { %1659 = vmatmul.mubr.bf16.vlgmr.msra.gmra.mxu0 %v1960_v6  ;;  %v2424_v6 = vld [vmem:[%s3489_s1 + $0x284] ss:$8 sps:$4 sm:$0xff]  }
  0x43   :  { %1700 = vmatmul.mubr.bf16.vlgmr.msra.gmra.mxu1 %v1962_v7  ;;  %1709 = vmatpush1.bf16.msra.mxu0 %v2332_v8  ;;  %v2427_v7 = vld [vmem:[%s3489_s1 + $0x384] ss:$8 sps:$4 sm:$0xff]   ;;  %v2422_v8 = vld [vmem:[%s3489_s1 + $0x280] ss:$8 sps:$4 sm:$0xff]  }
  0x44   :  { %1750 = vmatpush1.bf16.msra.mxu1 %v2335_v9  ;;  %1710 = vmatprep.subr.bf16.mxu0 %v2340_v10  ;;  %v2425_v9 = vld [vmem:[%s3489_s1 + $0x380] ss:$8 sps:$4 sm:$0xff]   ;;  %v2434_v10 = vld [vmem:[%s3489_s1 + $0x474] ss:$8 sps:$4 sm:$0xff]  }
  0x45   :  { %1751 = vmatprep.subr.bf16.mxu1 %v2343_v11  ;;  %1740 = vmatprep.mubr.bf16.mxu0 %v1965_v36  ;;  %v2437_v11 = vld [vmem:[%s3489_s1 + $0x574] ss:$8 sps:$4 sm:$0xff]   ;;  %v2464_v36 = vld [vmem:[%s3489_s1 + $0x424] ss:$8 sps:$4 sm:$0xff]  }
  0x46   :  { %1781 = vmatprep.mubr.bf16.mxu1 %v1967_v37  ;;  %v2467_v37 = vld [vmem:[%s3489_s1 + $0x524] ss:$8 sps:$4 sm:$0xff]  }
  0x47   :  { %1711 = vmatpush1.bf16.msra.mxu0 %v2338_v12  ;;  %v1964_v12 = vcombine.low %v2931_v32, %v2931_v32  ;;  %v2458_v32 = vld [vmem:[%s3489_s1 + $0x434] ss:$8 sps:$4 sm:$0xff]  }
  0x48   :  { %1752 = vmatpush1.bf16.msra.mxu1 %v2341_v13  ;;  %1712 = vmatprep.subr.bf16.mxu0 %v2346_v14  ;;  %v1966_v13 = vcombine.low %v2936_v33, %v2936_v33  ;;  %v2432_v14 = vld [vmem:[%s3489_s1 + $0x470] ss:$8 sps:$4 sm:$0xff]   ;;  %v2461_v33 = vld [vmem:[%s3489_s1 + $0x534] ss:$8 sps:$4 sm:$0xff]  }
  0x49   :  { %1753 = vmatprep.subr.bf16.mxu1 %v2349_v15  ;;  %v2435_v15 = vld [vmem:[%s3489_s1 + $0x570] ss:$8 sps:$4 sm:$0xff]  }
  0x4b   :  { %1713 = vmatpush1.bf16.msra.mxu0 %v2344_v16  ;;  %v2440_v16 = vld [vmem:[%s3489_s1 + $0x464] ss:$8 sps:$4 sm:$0xff]  }
  0x4c   :  { %1754 = vmatpush1.bf16.msra.mxu1 %v2347_v17  ;;  %1714 = vmatprep.subr.bf16.mxu0 %v2352_v18  ;;  %v2443_v17 = vld [vmem:[%s3489_s1 + $0x564] ss:$8 sps:$4 sm:$0xff]  }
  0x4d   :  { %1755 = vmatprep.subr.bf16.mxu1 %v2355_v19  ;;  %v3081_v18 = vld [vmem:[%s3490_s0 + $0x20] sm:$0xff]  ;;  %v3086_v19 = vld [vmem:[%s3490_s0 + $0x28] sm:$0xff] }
  0x4f   :  { %1715 = vmatpush1.bf16.msra.mxu0 %v2350_v20  ;;  %v1969_v20 = vcombine.high %v3081_v18, %v3081_v18 }
  0x50   :  { %1756 = vmatpush1.bf16.msra.mxu1 %v2353_v21  ;;  %1716 = vmatprep.subr.bf16.mxu0 %v2358_v22  ;;  %v1971_v21 = vcombine.high %v3086_v19, %v3086_v19  ;;  %v2438_v22 = vld [vmem:[%s3489_s1 + $0x460] ss:$8 sps:$4 sm:$0xff]  }
  0x51   :  { %1757 = vmatprep.subr.bf16.mxu1 %v2361_v23  ;;  %v2441_v23 = vld [vmem:[%s3489_s1 + $0x560] ss:$8 sps:$4 sm:$0xff]  }
  0x53   :  { %1717 = vmatpush1.bf16.msra.mxu0 %v2356_v24  ;;  %v2446_v24 = vld [vmem:[%s3489_s1 + $0x454] ss:$8 sps:$4 sm:$0xff]  }
  0x54   :  { %1758 = vmatpush1.bf16.msra.mxu1 %v2359_v25  ;;  %1718 = vmatprep.subr.bf16.mxu0 %v2364_v26  ;;  %v2449_v25 = vld [vmem:[%s3489_s1 + $0x554] ss:$8 sps:$4 sm:$0xff]   ;;  %v2444_v26 = vld [vmem:[%s3489_s1 + $0x450] ss:$8 sps:$4 sm:$0xff]  }
  0x55   :  { %1759 = vmatprep.subr.bf16.mxu1 %v2367_v27  ;;  %v2447_v27 = vld [vmem:[%s3489_s1 + $0x550] ss:$8 sps:$4 sm:$0xff]  }
  0x57   :  { %1719 = vmatpush1.bf16.msra.mxu0 %v2362_v28  ;;  %v2452_v28 = vld [vmem:[%s3489_s1 + $0x444] ss:$8 sps:$4 sm:$0xff]  }
  0x58   :  { %1760 = vmatpush1.bf16.msra.mxu1 %v2365_v29  ;;  %1720 = vmatprep.subr.bf16.mxu0 %v2370_v30  ;;  %v2455_v29 = vld [vmem:[%s3489_s1 + $0x544] ss:$8 sps:$4 sm:$0xff]   ;;  %v2450_v30 = vld [vmem:[%s3489_s1 + $0x440] ss:$8 sps:$4 sm:$0xff]  }
  0x59   :  { %1761 = vmatprep.subr.bf16.mxu1 %v2373_v31  ;;  %v2453_v31 = vld [vmem:[%s3489_s1 + $0x540] ss:$8 sps:$4 sm:$0xff]  }
  0x5b   :  { %1721 = vmatpush1.bf16.msra.mxu0 %v2368_v34  ;;  %v2456_v34 = vld [vmem:[%s3489_s1 + $0x430] ss:$8 sps:$4 sm:$0xff]  }
  0x5c   :  { %1762 = vmatpush1.bf16.msra.mxu1 %v2371_v35  ;;  %1722 = vmatprep.subr.bf16.mxu0 %v2376_v38  ;;  %v2459_v35 = vld [vmem:[%s3489_s1 + $0x530] ss:$8 sps:$4 sm:$0xff]   ;;  %v2462_v38 = vld [vmem:[%s3489_s1 + $0x420] ss:$8 sps:$4 sm:$0xff]  }
  0x5d   :  { %1763 = vmatprep.subr.bf16.mxu1 %v2379_v39  ;;  %v2465_v39 = vld [vmem:[%s3489_s1 + $0x520] ss:$8 sps:$4 sm:$0xff]  }
  0x5f   :  { %1723 = vmatpush1.bf16.msra.mxu0 %v2374_v40  ;;  %v2470_v40 = vld [vmem:[%s3489_s1 + $0x414] ss:$8 sps:$4 sm:$0xff]  }
  0x60   :  { %1764 = vmatpush1.bf16.msra.mxu1 %v2377_v41  ;;  %1724 = vmatprep.subr.bf16.mxu0 %v2382_v42  ;;  %v2473_v41 = vld [vmem:[%s3489_s1 + $0x514] ss:$8 sps:$4 sm:$0xff]   ;;  %v2468_v42 = vld [vmem:[%s3489_s1 + $0x410] ss:$8 sps:$4 sm:$0xff]  }
  0x61   :  { %1765 = vmatprep.subr.bf16.mxu1 %v2385_v43  ;;  %v2471_v43 = vld [vmem:[%s3489_s1 + $0x510] ss:$8 sps:$4 sm:$0xff]  }
  0x63   :  { %1725 = vmatpush2.bf16.msra.mxu0 %v2380_v44  ;;  %v2476_v44 = vld [vmem:[%s3489_s1 + $0x404] ss:$8 sps:$4 sm:$0xff]  }
  0x64   :  { %1766 = vmatpush2.bf16.msra.mxu1 %v2383_v45  ;;  %1726 = vmatprep.subr.bf16.mxu0 %v2388_v46  ;;  %v2479_v45 = vld [vmem:[%s3489_s1 + $0x504] ss:$8 sps:$4 sm:$0xff]   ;;  %v2474_v46 = vld [vmem:[%s3489_s1 + $0x400] ss:$8 sps:$4 sm:$0xff]  }
  0x65   :  { %1767 = vmatprep.subr.bf16.mxu1 %v2391_v47  ;;  %v2477_v47 = vld [vmem:[%s3489_s1 + $0x500] ss:$8 sps:$4 sm:$0xff]  }
  0x67   :  { %1727 = vmatpush2.bf16.msra.mxu0 %v2386_v48  ;;  %v2482_v48 = vld [vmem:[%s3489_s1 + $0x4f4] ss:$8 sps:$4 sm:$0xff]  }
  0x68   :  { %1768 = vmatpush2.bf16.msra.mxu1 %v2389_v49  ;;  %1728 = vmatprep.subr.bf16.mxu0 %v2394_v50  ;;  %v2485_v49 = vld [vmem:[%s3489_s1 + $0x5f4] ss:$8 sps:$4 sm:$0xff]   ;;  %v2480_v50 = vld [vmem:[%s3489_s1 + $0x4f0] ss:$8 sps:$4 sm:$0xff]  }
  0x69   :  { %1769 = vmatprep.subr.bf16.mxu1 %v2397_v51  ;;  %v2483_v51 = vld [vmem:[%s3489_s1 + $0x5f0] ss:$8 sps:$4 sm:$0xff]  }
  0x6b   :  { %1729 = vmatpush2.bf16.msra.mxu0 %v2392_v52  ;;  %v2488_v52 = vld [vmem:[%s3489_s1 + $0x4e4] ss:$8 sps:$4 sm:$0xff]  }
  0x6c   :  { %1770 = vmatpush2.bf16.msra.mxu1 %v2395_v53  ;;  %1730 = vmatprep.subr.bf16.mxu0 %v2400_v54  ;;  %v2491_v53 = vld [vmem:[%s3489_s1 + $0x5e4] ss:$8 sps:$4 sm:$0xff]   ;;  %v2486_v54 = vld [vmem:[%s3489_s1 + $0x4e0] ss:$8 sps:$4 sm:$0xff]  }
  0x6d   :  { %1771 = vmatprep.subr.bf16.mxu1 %v2403_v55  ;;  %v2489_v55 = vld [vmem:[%s3489_s1 + $0x5e0] ss:$8 sps:$4 sm:$0xff]  }
  0x6f   :  { %1731 = vmatpush2.bf16.msra.mxu0 %v2398_v56  ;;  %v2494_v56 = vld [vmem:[%s3489_s1 + $0x4d4] ss:$8 sps:$4 sm:$0xff]  }
  0x70   :  { %1772 = vmatpush2.bf16.msra.mxu1 %v2401_v57  ;;  %1732 = vmatprep.subr.bf16.mxu0 %v2406_v58  ;;  %v2497_v57 = vld [vmem:[%s3489_s1 + $0x5d4] ss:$8 sps:$4 sm:$0xff]   ;;  %v2492_v58 = vld [vmem:[%s3489_s1 + $0x4d0] ss:$8 sps:$4 sm:$0xff]  }
  0x71   :  { %1773 = vmatprep.subr.bf16.mxu1 %v2409_v59  ;;  %v2495_v59 = vld [vmem:[%s3489_s1 + $0x5d0] ss:$8 sps:$4 sm:$0xff]  }
  0x73   :  { %1733 = vmatpush2.bf16.msra.mxu0 %v2404_v60  ;;  %v2500_v60 = vld [vmem:[%s3489_s1 + $0x4c4] ss:$8 sps:$4 sm:$0xff]  }
  0x74   :  { %1774 = vmatpush2.bf16.msra.mxu1 %v2407_v61  ;;  %1734 = vmatprep.subr.bf16.mxu0 %v2412_v62  ;;  %v2503_v61 = vld [vmem:[%s3489_s1 + $0x5c4] ss:$8 sps:$4 sm:$0xff]   ;;  %v2498_v62 = vld [vmem:[%s3489_s1 + $0x4c0] ss:$8 sps:$4 sm:$0xff]  }
  0x75   :  { %1775 = vmatprep.subr.bf16.mxu1 %v2415_v63  ;;  %v2501_v63 = vld [vmem:[%s3489_s1 + $0x5c0] ss:$8 sps:$4 sm:$0xff]  }
  0x77   :  { %1735 = vmatpush2.bf16.msra.mxu0 %v2410_v0  ;;  %v2506_v0 = vld [vmem:[%s3489_s1 + $0x4b4] ss:$8 sps:$4 sm:$0xff]  }
  0x78   :  { %1776 = vmatpush2.bf16.msra.mxu1 %v2413_v1  ;;  %1736 = vmatprep.subr.bf16.mxu0 %v2418_v2  ;;  %v2509_v1 = vld [vmem:[%s3489_s1 + $0x5b4] ss:$8 sps:$4 sm:$0xff]   ;;  %v2504_v2 = vld [vmem:[%s3489_s1 + $0x4b0] ss:$8 sps:$4 sm:$0xff]  }
  0x79   :  { %1777 = vmatprep.subr.bf16.mxu1 %v2421_v3  ;;  %v2507_v3 = vld [vmem:[%s3489_s1 + $0x5b0] ss:$8 sps:$4 sm:$0xff]  }
  0x7b   :  { %1737 = vmatpush2.bf16.msra.mxu0 %v2416_v4  ;;  %v2512_v4 = vld [vmem:[%s3489_s1 + $0x4a4] ss:$8 sps:$4 sm:$0xff]  }
  0x7c   :  { %1778 = vmatpush2.bf16.msra.mxu1 %v2419_v5  ;;  %1738 = vmatprep.subr.bf16.mxu0 %v2424_v6  ;;  %v2515_v5 = vld [vmem:[%s3489_s1 + $0x5a4] ss:$8 sps:$4 sm:$0xff]   ;;  %v2510_v6 = vld [vmem:[%s3489_s1 + $0x4a0] ss:$8 sps:$4 sm:$0xff]  }
  0x7d   :  { %1779 = vmatprep.subr.bf16.mxu1 %v2427_v7  ;;  %v2513_v7 = vld [vmem:[%s3489_s1 + $0x5a0] ss:$8 sps:$4 sm:$0xff]  }
  0x7f   :  { %1739 = vmatpush2.bf16.msra.mxu0 %v2422_v8  ;;  %v2518_v8 = vld [vmem:[%s3489_s1 + $0x494] ss:$8 sps:$4 sm:$0xff]  }
  0x80   :  { %1780 = vmatpush2.bf16.msra.mxu1 %v2425_v9  ;;  %1790 = vmatprep.subr.bf16.mxu0 %v2434_v10  ;;  %v2521_v9 = vld [vmem:[%s3489_s1 + $0x594] ss:$8 sps:$4 sm:$0xff]   ;;  %v2516_v10 = vld [vmem:[%s3489_s1 + $0x490] ss:$8 sps:$4 sm:$0xff]  }
  0x81   :  { %1831 = vmatprep.subr.bf16.mxu1 %v2437_v11  ;;  %v2519_v11 = vld [vmem:[%s3489_s1 + $0x590] ss:$8 sps:$4 sm:$0xff]  }
  0x82   :  { %1741 = vmatmul.mubr.bf16.vlgmr.msra.gmra.mxu0 %v1964_v12  ;;  %v2524_v12 = vld [vmem:[%s3489_s1 + $0x484] ss:$8 sps:$4 sm:$0xff]  }
  0x83   :  { %1782 = vmatmul.mubr.bf16.vlgmr.msra.gmra.mxu1 %v1966_v13  ;;  %1791 = vmatpush1.bf16.msra.mxu0 %v2432_v14  ;;  %v2527_v13 = vld [vmem:[%s3489_s1 + $0x584] ss:$8 sps:$4 sm:$0xff]   ;;  %v2522_v14 = vld [vmem:[%s3489_s1 + $0x480] ss:$8 sps:$4 sm:$0xff]  }
  0x84   :  { %1832 = vmatpush1.bf16.msra.mxu1 %v2435_v15  ;;  %1792 = vmatprep.subr.bf16.mxu0 %v2440_v16  ;;  %v2525_v15 = vld [vmem:[%s3489_s1 + $0x580] ss:$8 sps:$4 sm:$0xff]   ;;  %v2534_v16 = vld [vmem:[%s3489_s1 + $0x674] ss:$8 sps:$4 sm:$0xff]  }
  0x85   :  { %1833 = vmatprep.subr.bf16.mxu1 %v2443_v17  ;;  %1822 = vmatprep.mubr.bf16.mxu0 %v1969_v20  ;;  %v2537_v17 = vld [vmem:[%s3489_s1 + $0x774] ss:$8 sps:$4 sm:$0xff]   ;;  %v1968_v20 = vcombine.low %v3081_v18, %v3081_v18  ;;  %v2535_v18 = vld [vmem:[%s3489_s1 + $0x770] ss:$8 sps:$4 sm:$0xff]  }
  0x86   :  { %1863 = vmatprep.mubr.bf16.mxu1 %v1971_v21  ;;  %v1970_v21 = vcombine.low %v3086_v19, %v3086_v19  ;;  %v2540_v19 = vld [vmem:[%s3489_s1 + $0x664] ss:$8 sps:$4 sm:$0xff]  }
  0x87   :  { %1793 = vmatpush1.bf16.msra.mxu0 %v2438_v22  ;;  %v3279_v22 = vld [vmem:[%s3490_s0 + $0x30] sm:$0xff] }
  0x88   :  { %1834 = vmatpush1.bf16.msra.mxu1 %v2441_v23  ;;  %1794 = vmatprep.subr.bf16.mxu0 %v2446_v24  ;;  %v3284_v23 = vld [vmem:[%s3490_s0 + $0x38] sm:$0xff] }
  0x89   :  { %1835 = vmatprep.subr.bf16.mxu1 %v2449_v25  ;;  %v2532_v24 = vld [vmem:[%s3489_s1 + $0x670] ss:$8 sps:$4 sm:$0xff]   ;;  %v2543_v25 = vld [vmem:[%s3489_s1 + $0x764] ss:$8 sps:$4 sm:$0xff]  }
  0x8b   :  { %1795 = vmatpush1.bf16.msra.mxu0 %v2444_v26  ;;  %v1973_v26 = vcombine.high %v3279_v22, %v3279_v22 }
  0x8c   :  { %1836 = vmatpush1.bf16.msra.mxu1 %v2447_v27  ;;  %1796 = vmatprep.subr.bf16.mxu0 %v2452_v28  ;;  %v1975_v27 = vcombine.high %v3284_v23, %v3284_v23  ;;  %v2538_v28 = vld [vmem:[%s3489_s1 + $0x660] ss:$8 sps:$4 sm:$0xff]  }
  0x8d   :  { %1837 = vmatprep.subr.bf16.mxu1 %v2455_v29  ;;  %v2541_v29 = vld [vmem:[%s3489_s1 + $0x760] ss:$8 sps:$4 sm:$0xff]  }
  0x8f   :  { %1797 = vmatpush1.bf16.msra.mxu0 %v2450_v30  ;;  %v2546_v30 = vld [vmem:[%s3489_s1 + $0x654] ss:$8 sps:$4 sm:$0xff]  }
  0x90   :  { %1838 = vmatpush1.bf16.msra.mxu1 %v2453_v31  ;;  %1798 = vmatprep.subr.bf16.mxu0 %v2458_v32  ;;  %v2549_v31 = vld [vmem:[%s3489_s1 + $0x754] ss:$8 sps:$4 sm:$0xff]   ;;  %v2544_v32 = vld [vmem:[%s3489_s1 + $0x650] ss:$8 sps:$4 sm:$0xff]  }
  0x91   :  { %1839 = vmatprep.subr.bf16.mxu1 %v2461_v33  ;;  %v2547_v33 = vld [vmem:[%s3489_s1 + $0x750] ss:$8 sps:$4 sm:$0xff]  }
  0x93   :  { %1799 = vmatpush1.bf16.msra.mxu0 %v2456_v34  ;;  %v2552_v34 = vld [vmem:[%s3489_s1 + $0x644] ss:$8 sps:$4 sm:$0xff]  }
  0x94   :  { %1840 = vmatpush1.bf16.msra.mxu1 %v2459_v35  ;;  %1800 = vmatprep.subr.bf16.mxu0 %v2464_v36  ;;  %v2555_v35 = vld [vmem:[%s3489_s1 + $0x744] ss:$8 sps:$4 sm:$0xff]   ;;  %v2550_v36 = vld [vmem:[%s3489_s1 + $0x640] ss:$8 sps:$4 sm:$0xff]  }
  0x95   :  { %1841 = vmatprep.subr.bf16.mxu1 %v2467_v37  ;;  %v2553_v37 = vld [vmem:[%s3489_s1 + $0x740] ss:$8 sps:$4 sm:$0xff]  }
  0x97   :  { %1801 = vmatpush1.bf16.msra.mxu0 %v2462_v38  ;;  %v2558_v38 = vld [vmem:[%s3489_s1 + $0x634] ss:$8 sps:$4 sm:$0xff]  }
  0x98   :  { %1842 = vmatpush1.bf16.msra.mxu1 %v2465_v39  ;;  %1802 = vmatprep.subr.bf16.mxu0 %v2470_v40  ;;  %v2561_v39 = vld [vmem:[%s3489_s1 + $0x734] ss:$8 sps:$4 sm:$0xff]   ;;  %v2556_v40 = vld [vmem:[%s3489_s1 + $0x630] ss:$8 sps:$4 sm:$0xff]  }
  0x99   :  { %1843 = vmatprep.subr.bf16.mxu1 %v2473_v41  ;;  %v2559_v41 = vld [vmem:[%s3489_s1 + $0x730] ss:$8 sps:$4 sm:$0xff]  }
  0x9b   :  { %1803 = vmatpush1.bf16.msra.mxu0 %v2468_v42  ;;  %v2564_v42 = vld [vmem:[%s3489_s1 + $0x624] ss:$8 sps:$4 sm:$0xff]  }
  0x9c   :  { %1844 = vmatpush1.bf16.msra.mxu1 %v2471_v43  ;;  %1804 = vmatprep.subr.bf16.mxu0 %v2476_v44  ;;  %v2567_v43 = vld [vmem:[%s3489_s1 + $0x724] ss:$8 sps:$4 sm:$0xff]   ;;  %v2562_v44 = vld [vmem:[%s3489_s1 + $0x620] ss:$8 sps:$4 sm:$0xff]  }
  0x9d   :  { %1845 = vmatprep.subr.bf16.mxu1 %v2479_v45  ;;  %v2565_v45 = vld [vmem:[%s3489_s1 + $0x720] ss:$8 sps:$4 sm:$0xff]  }
  0x9f   :  { %1805 = vmatpush1.bf16.msra.mxu0 %v2474_v46  ;;  %v2570_v46 = vld [vmem:[%s3489_s1 + $0x614] ss:$8 sps:$4 sm:$0xff]  }
  0xa0   :  { %1846 = vmatpush1.bf16.msra.mxu1 %v2477_v47  ;;  %1806 = vmatprep.subr.bf16.mxu0 %v2482_v48  ;;  %v2573_v47 = vld [vmem:[%s3489_s1 + $0x714] ss:$8 sps:$4 sm:$0xff]   ;;  %v2568_v48 = vld [vmem:[%s3489_s1 + $0x610] ss:$8 sps:$4 sm:$0xff]  }
  0xa1   :  { %1847 = vmatprep.subr.bf16.mxu1 %v2485_v49  ;;  %v2571_v49 = vld [vmem:[%s3489_s1 + $0x710] ss:$8 sps:$4 sm:$0xff]  }
  0xa3   :  { %1807 = vmatpush2.bf16.msra.mxu0 %v2480_v50  ;;  %v2576_v50 = vld [vmem:[%s3489_s1 + $0x604] ss:$8 sps:$4 sm:$0xff]  }
  0xa4   :  { %1848 = vmatpush2.bf16.msra.mxu1 %v2483_v51  ;;  %1808 = vmatprep.subr.bf16.mxu0 %v2488_v52  ;;  %v2579_v51 = vld [vmem:[%s3489_s1 + $0x704] ss:$8 sps:$4 sm:$0xff]   ;;  %v2574_v52 = vld [vmem:[%s3489_s1 + $0x600] ss:$8 sps:$4 sm:$0xff]  }
  0xa5   :  { %1849 = vmatprep.subr.bf16.mxu1 %v2491_v53  ;;  %v2577_v53 = vld [vmem:[%s3489_s1 + $0x700] ss:$8 sps:$4 sm:$0xff]  }
  0xa7   :  { %1809 = vmatpush2.bf16.msra.mxu0 %v2486_v54  ;;  %v2582_v54 = vld [vmem:[%s3489_s1 + $0x6f4] ss:$8 sps:$4 sm:$0xff]  }
  0xa8   :  { %1850 = vmatpush2.bf16.msra.mxu1 %v2489_v55  ;;  %1810 = vmatprep.subr.bf16.mxu0 %v2494_v56  ;;  %v2585_v55 = vld [vmem:[%s3489_s1 + $0x7f4] ss:$8 sps:$4 sm:$0xff]   ;;  %v2580_v56 = vld [vmem:[%s3489_s1 + $0x6f0] ss:$8 sps:$4 sm:$0xff]  }
  0xa9   :  { %1851 = vmatprep.subr.bf16.mxu1 %v2497_v57  ;;  %v2583_v57 = vld [vmem:[%s3489_s1 + $0x7f0] ss:$8 sps:$4 sm:$0xff]  }
  0xab   :  { %1811 = vmatpush2.bf16.msra.mxu0 %v2492_v58  ;;  %v2588_v58 = vld [vmem:[%s3489_s1 + $0x6e4] ss:$8 sps:$4 sm:$0xff]  }
  0xac   :  { %1852 = vmatpush2.bf16.msra.mxu1 %v2495_v59  ;;  %1812 = vmatprep.subr.bf16.mxu0 %v2500_v60  ;;  %v2591_v59 = vld [vmem:[%s3489_s1 + $0x7e4] ss:$8 sps:$4 sm:$0xff]   ;;  %v2586_v60 = vld [vmem:[%s3489_s1 + $0x6e0] ss:$8 sps:$4 sm:$0xff]  }
  0xad   :  { %1853 = vmatprep.subr.bf16.mxu1 %v2503_v61  ;;  %v2589_v61 = vld [vmem:[%s3489_s1 + $0x7e0] ss:$8 sps:$4 sm:$0xff]  }
  0xaf   :  { %1813 = vmatpush2.bf16.msra.mxu0 %v2498_v62  ;;  %v2594_v62 = vld [vmem:[%s3489_s1 + $0x6d4] ss:$8 sps:$4 sm:$0xff]  }
  0xb0   :  { %1854 = vmatpush2.bf16.msra.mxu1 %v2501_v63  ;;  %1814 = vmatprep.subr.bf16.mxu0 %v2506_v0  ;;  %v2597_v63 = vld [vmem:[%s3489_s1 + $0x7d4] ss:$8 sps:$4 sm:$0xff]   ;;  %v2592_v0 = vld [vmem:[%s3489_s1 + $0x6d0] ss:$8 sps:$4 sm:$0xff]  }
  0xb1   :  { %1855 = vmatprep.subr.bf16.mxu1 %v2509_v1  ;;  %v2595_v1 = vld [vmem:[%s3489_s1 + $0x7d0] ss:$8 sps:$4 sm:$0xff]  }
  0xb3   :  { %1815 = vmatpush2.bf16.msra.mxu0 %v2504_v2  ;;  %v2600_v2 = vld [vmem:[%s3489_s1 + $0x6c4] ss:$8 sps:$4 sm:$0xff]  }
  0xb4   :  { %1856 = vmatpush2.bf16.msra.mxu1 %v2507_v3  ;;  %1816 = vmatprep.subr.bf16.mxu0 %v2512_v4  ;;  %v2603_v3 = vld [vmem:[%s3489_s1 + $0x7c4] ss:$8 sps:$4 sm:$0xff]   ;;  %v2598_v4 = vld [vmem:[%s3489_s1 + $0x6c0] ss:$8 sps:$4 sm:$0xff]  }
  0xb5   :  { %1857 = vmatprep.subr.bf16.mxu1 %v2515_v5  ;;  %v2601_v5 = vld [vmem:[%s3489_s1 + $0x7c0] ss:$8 sps:$4 sm:$0xff]  }
  0xb7   :  { %1817 = vmatpush2.bf16.msra.mxu0 %v2510_v6  ;;  %v2606_v6 = vld [vmem:[%s3489_s1 + $0x6b4] ss:$8 sps:$4 sm:$0xff]  }
  0xb8   :  { %1858 = vmatpush2.bf16.msra.mxu1 %v2513_v7  ;;  %1818 = vmatprep.subr.bf16.mxu0 %v2518_v8  ;;  %v2609_v7 = vld [vmem:[%s3489_s1 + $0x7b4] ss:$8 sps:$4 sm:$0xff]   ;;  %v2604_v8 = vld [vmem:[%s3489_s1 + $0x6b0] ss:$8 sps:$4 sm:$0xff]  }
  0xb9   :  { %1859 = vmatprep.subr.bf16.mxu1 %v2521_v9  ;;  %v2607_v9 = vld [vmem:[%s3489_s1 + $0x7b0] ss:$8 sps:$4 sm:$0xff]  }
  0xbb   :  { %1819 = vmatpush2.bf16.msra.mxu0 %v2516_v10  ;;  %v2612_v10 = vld [vmem:[%s3489_s1 + $0x6a4] ss:$8 sps:$4 sm:$0xff]  }
  0xbc   :  { %1860 = vmatpush2.bf16.msra.mxu1 %v2519_v11  ;;  %1820 = vmatprep.subr.bf16.mxu0 %v2524_v12  ;;  %v2615_v11 = vld [vmem:[%s3489_s1 + $0x7a4] ss:$8 sps:$4 sm:$0xff]   ;;  %v2610_v12 = vld [vmem:[%s3489_s1 + $0x6a0] ss:$8 sps:$4 sm:$0xff]  }
  0xbd   :  { %1861 = vmatprep.subr.bf16.mxu1 %v2527_v13  ;;  %v2613_v13 = vld [vmem:[%s3489_s1 + $0x7a0] ss:$8 sps:$4 sm:$0xff]  }
  0xbf   :  { %1821 = vmatpush2.bf16.msra.mxu0 %v2522_v14  ;;  %v280_v14 = vlaneseq }
  0xc0   :  { %1862 = vmatpush2.bf16.msra.mxu1 %v2525_v15  ;;  %1872 = vmatprep.subr.bf16.mxu0 %v2534_v16  ;;  %v2618_v15 = vld [vmem:[%s3489_s1 + $0x694] ss:$8 sps:$4 sm:$0xff]  }
  0xc1   :  { %1913 = vmatprep.subr.bf16.mxu1 %v2537_v17  ;;  %v2621_v16 = vld [vmem:[%s3489_s1 + $0x794] ss:$8 sps:$4 sm:$0xff]   ;;  %v2616_v17 = vld [vmem:[%s3489_s1 + $0x690] ss:$8 sps:$4 sm:$0xff]  }
  0xc2   :  { %1823 = vmatmul.mubr.bf16.vlgmr.msra.gmra.mxu0 %v1968_v20  ;;  %v2619_v20 = vld [vmem:[%s3489_s1 + $0x790] ss:$8 sps:$4 sm:$0xff]  }
  0xc3   :  { %1864 = vmatmul.mubr.bf16.vlgmr.msra.gmra.mxu1 %v1970_v21  ;;  %1873 = vmatpush1.bf16.msra.mxu0 %v2532_v24  ;;  %v281_v21 = vshrl.u32 %v280_v14, 7  ;;  %v2624_v24 = vld [vmem:[%s3489_s1 + $0x684] ss:$8 sps:$4 sm:$0xff]  }
  0xc4   :  { %1914 = vmatpush1.bf16.msra.mxu1 %v2535_v18  ;;  %1874 = vmatprep.subr.bf16.mxu0 %v2540_v19  ;;  %v2627_v18 = vld [vmem:[%s3489_s1 + $0x784] ss:$8 sps:$4 sm:$0xff]   ;;  %v2622_v19 = vld [vmem:[%s3489_s1 + $0x680] ss:$8 sps:$4 sm:$0xff]  }
  0xc5   :  { %1915 = vmatprep.subr.bf16.mxu1 %v2543_v25  ;;  %1904 = vmatprep.mubr.bf16.mxu0 %v1973_v26  ;;  %v2625_v25 = vld [vmem:[%s3489_s1 + $0x780] ss:$8 sps:$4 sm:$0xff]   ;;  %v282_v26 = vsub.s32 0, %v281_v21 }
  0xc6   :  { %1945 = vmatprep.mubr.bf16.mxu1 %v1975_v27  ;;  %v278_v27 = vld [vmem:[%s3491_s2] sm:$0x3] }
  0xc7   :  { %1875 = vmatpush1.bf16.msra.mxu0 %v2538_v28  ;;  %v286_v28 = vsub.s32 1, %v281_v21 }
  0xc8   :  { %1916 = vmatpush1.bf16.msra.mxu1 %v2541_v29  ;;  %1876 = vmatprep.subr.bf16.mxu0 %v2546_v30  ;;  %v1972_v29 = vcombine.low %v3279_v22, %v3279_v22  ;;  %v1974_v30 = vcombine.low %v3284_v23, %v3284_v23 }
  0xc9   :  { %1917 = vmatprep.subr.bf16.mxu1 %v2549_v31  ;;  %v283_v31 = vrot.slane %v278_v27, %v282_v26 }
  0xcb   :  { %1877 = vmatpush1.bf16.msra.mxu0 %v2544_v32  ;;  %v287_v32 = vrot.slane %v278_v27, %v286_v28 }
  0xcc   :  { %1918 = vmatpush1.bf16.msra.mxu1 %v2547_v33  ;;  %1878 = vmatprep.subr.bf16.mxu0 %v2552_v34 }
  0xcd   :  { %1919 = vmatprep.subr.bf16.mxu1 %v2555_v35 }
  0xcf   :  { %1879 = vmatpush1.bf16.msra.mxu0 %v2550_v36 }
  0xd0   :  { %1920 = vmatpush1.bf16.msra.mxu1 %v2553_v37  ;;  %1880 = vmatprep.subr.bf16.mxu0 %v2558_v38 }
  0xd1   :  { %1921 = vmatprep.subr.bf16.mxu1 %v2561_v39 }
  0xd3   :  { %1881 = vmatpush1.bf16.msra.mxu0 %v2556_v40 }
  0xd4   :  { %1922 = vmatpush1.bf16.msra.mxu1 %v2559_v41  ;;  %1882 = vmatprep.subr.bf16.mxu0 %v2564_v42 }
  0xd5   :  { %1923 = vmatprep.subr.bf16.mxu1 %v2567_v43 }
  0xd7   :  { %1883 = vmatpush1.bf16.msra.mxu0 %v2562_v44 }
  0xd8   :  { %1924 = vmatpush1.bf16.msra.mxu1 %v2565_v45  ;;  %1884 = vmatprep.subr.bf16.mxu0 %v2570_v46 }
  0xd9   :  { %1925 = vmatprep.subr.bf16.mxu1 %v2573_v47 }
  0xdb   :  { %1885 = vmatpush1.bf16.msra.mxu0 %v2568_v48 }
  0xdc   :  { %1926 = vmatpush1.bf16.msra.mxu1 %v2571_v49  ;;  %1886 = vmatprep.subr.bf16.mxu0 %v2576_v50 }
  0xdd   :  { %1927 = vmatprep.subr.bf16.mxu1 %v2579_v51 }
  0xdf   :  { %1887 = vmatpush1.bf16.msra.mxu0 %v2574_v52 }
  0xe0   :  { %1928 = vmatpush1.bf16.msra.mxu1 %v2577_v53  ;;  %1888 = vmatprep.subr.bf16.mxu0 %v2582_v54 }
  0xe1   :  { %1929 = vmatprep.subr.bf16.mxu1 %v2585_v55 }
  0xe3   :  { %1889 = vmatpush2.bf16.msra.mxu0 %v2580_v56 }
  0xe4   :  { %1930 = vmatpush2.bf16.msra.mxu1 %v2583_v57  ;;  %1890 = vmatprep.subr.bf16.mxu0 %v2588_v58 }
  0xe5   :  { %1931 = vmatprep.subr.bf16.mxu1 %v2591_v59 }
  0xe7   :  { %1891 = vmatpush2.bf16.msra.mxu0 %v2586_v60 }
  0xe8   :  { %1932 = vmatpush2.bf16.msra.mxu1 %v2589_v61  ;;  %1892 = vmatprep.subr.bf16.mxu0 %v2594_v62 }
  0xe9   :  { %1933 = vmatprep.subr.bf16.mxu1 %v2597_v63 }
  0xeb   :  { %1893 = vmatpush2.bf16.msra.mxu0 %v2592_v0 }
  0xec   :  { %1934 = vmatpush2.bf16.msra.mxu1 %v2595_v1  ;;  %1894 = vmatprep.subr.bf16.mxu0 %v2600_v2 }
  0xed   :  { %1935 = vmatprep.subr.bf16.mxu1 %v2603_v3 }
  0xef   :  { %1895 = vmatpush2.bf16.msra.mxu0 %v2598_v4 }
  0xf0   :  { %1936 = vmatpush2.bf16.msra.mxu1 %v2601_v5  ;;  %1896 = vmatprep.subr.bf16.mxu0 %v2606_v6 }
  0xf1   :  { %1937 = vmatprep.subr.bf16.mxu1 %v2609_v7 }
  0xf3   :  { %1897 = vmatpush2.bf16.msra.mxu0 %v2604_v8 }
  0xf4   :  { %1938 = vmatpush2.bf16.msra.mxu1 %v2607_v9  ;;  %1898 = vmatprep.subr.bf16.mxu0 %v2612_v10 }
  0xf5   :  { %1939 = vmatprep.subr.bf16.mxu1 %v2615_v11 }
  0xf7   :  { %1899 = vmatpush2.bf16.msra.mxu0 %v2610_v12 }
  0xf8   :  { %1940 = vmatpush2.bf16.msra.mxu1 %v2613_v13  ;;  %1900 = vmatprep.subr.bf16.mxu0 %v2618_v15 }
  0xf9   :  { %1941 = vmatprep.subr.bf16.mxu1 %v2621_v16 }
  0xfb   :  { %1901 = vmatpush2.bf16.msra.mxu0 %v2616_v17 }
  0xfc   :  { %1942 = vmatpush2.bf16.msra.mxu1 %v2619_v20  ;;  %1902 = vmatprep.subr.bf16.mxu0 %v2624_v24 }
  0xfd   :  { %1943 = vmatprep.subr.bf16.mxu1 %v2627_v18 }
  0xff   :  { %1903 = vmatpush2.bf16.msra.mxu0 %v2622_v19 }
 0x100   :  { %1944 = vmatpush2.bf16.msra.mxu1 %v2625_v25 }
 0x102   :  { %v1660_v33 = vpop.f32.mrf.mxu0  ;;  %1905 = vmatmul.mubr.bf16.vlgmr.msra.gmra.mxu0 %v1972_v29 }
 0x103   :  { %v1701_v34 = vpop.f32.mrf.mxu1  ;;  %1946 = vmatmul.mubr.bf16.vlgmr.msra.gmra.mxu1 %v1974_v30  ;;  %v1661_v35 = vadd.f32 %v1660_v33, %v283_v31 }
 0x104   :  { %v1662_v36 = vpop.f32.mrf.mxu0 }
 0x105   :  { %v1703_v37 = vpop.f32.mrf.mxu1  ;;  %v1702_v38 = vadd.f32 %v1701_v34, %v1661_v35  ;;  %v1663_v39 = vadd.f32 %v1662_v36, %v287_v32 }
 0x106   :  { %v1664_v40 = vpop.f32.mrf.mxu0 }
 0x107   :  { %v1705_v41 = vpop.f32.mrf.mxu1  ;;  %v1704_v42 = vadd.f32 %v1703_v37, %v1663_v39 }
 0x108   :  { %v1665_v22 = vpop.f32.mrf.mxu0 }
 0x109   :  { %v1706_v43 = vpop.f32.mrf.mxu1 }
 0x142   :  { %v1742_v44 = vpop.f32.mrf.mxu0 }
 0x143   :  { %v1783_v23 = vpop.f32.mrf.mxu1  ;;  %v1743_v45 = vadd.f32 %v1742_v44, %v1702_v38 }
 0x144   :  { %v1744_v46 = vpop.f32.mrf.mxu0 }
 0x145   :  { %v1785_v47 = vpop.f32.mrf.mxu1  ;;  %v1784_v48 = vadd.f32 %v1783_v23, %v1743_v45  ;;  %v1745_v49 = vadd.f32 %v1744_v46, %v1704_v42 }
 0x146   :  { %v1746_v50 = vpop.f32.mrf.mxu0 }
 0x147   :  { %v1787_v51 = vpop.f32.mrf.mxu1  ;;  %v1786_v52 = vadd.f32 %v1785_v47, %v1745_v49 }
 0x148   :  { %v1747_v53 = vpop.f32.mrf.mxu0 }
 0x149   :  { %v1788_v54 = vpop.f32.mrf.mxu1 }
 0x182   :  { %v1824_v55 = vpop.f32.mrf.mxu0 }
 0x183   :  { %v1865_v56 = vpop.f32.mrf.mxu1  ;;  %v1825_v63 = vadd.f32 %v1824_v55, %v1784_v48 }
 0x184   :  { %v1826_v57 = vpop.f32.mrf.mxu0 }
 0x185   :  { %v1867_v58 = vpop.f32.mrf.mxu1  ;;  %v1827_v0 = vadd.f32 %v1826_v57, %v1786_v52  ;;  %v1866_v1 = vadd.f32 %v1865_v56, %v1825_v63 }
 0x186   :  { %v1828_v59 = vpop.f32.mrf.mxu0 }
 0x187   :  { %v1869_v60 = vpop.f32.mrf.mxu1  ;;  %v1868_v4 = vadd.f32 %v1867_v58, %v1827_v0 }
 0x188   :  { %v1829_v61 = vpop.f32.mrf.mxu0 }
 0x189   :  { %v1870_v62 = vpop.f32.mrf.mxu1 }
 0x1c2   :  { %v1906_v2 = vpop.f32.mrf.mxu0 }
 0x1c3   :  { %v1947_v3 = vpop.f32.mrf.mxu1  ;;  %v1907_v5 = vadd.f32 %v1906_v2, %v1866_v1 }
 0x1c4   :  { %v1908_v6 = vpop.f32.mrf.mxu0 }
 0x1c5   :  { %v1949_v7 = vpop.f32.mrf.mxu1  ;;  %v1948_v8 = vadd.f32 %v1947_v3, %v1907_v5  ;;  %v1909_v9 = vadd.f32 %v1908_v6, %v1868_v4 }
 0x1c6   :  { %v1910_v10 = vpop.f32.mrf.mxu0 }
 0x1c7   :  { %v1951_v11 = vpop.f32.mrf.mxu1  ;;  %1954 = vst [vmem:[%s3492_s3] sm:$0xff] %v1948_v8  ;;  %v1950_v12 = vadd.f32 %v1949_v7, %v1909_v9 }
 0x1c8   :  { %v1911_v13 = vpop.f32.mrf.mxu0 }
 0x1c9   :  { %v1952_v14 = vpop.f32.mrf.mxu1  ;;  %1955 = vst [vmem:[%s3492_s3 + $0x8] sm:$0xff] %v1950_v12 }

// kernel: vqvae_forward.14
= control target key start
LH: loop header
LB: loop body
LE: loop exit
PB: predicated region body
PF: predicated region fallthrough
CT: control target
= control target key end

     0   :  { %s460_s0 = inlined_call_operand.vmem [shape: f32[8,256], index: 0, kind: input, shape index: {}]   ;;  %s461_s1 = inlined_call_operand.vmem [shape: f32[128,256], index: 1, kind: input, shape index: {}]   ;;  %s462_s2 = inlined_call_operand.vmem [shape: f32[1,128], index: 2, kind: input, shape index: {}]   ;;  %s463_s3 = inlined_call_operand.vmem [shape: f32[8,256], index: 3, kind: output, shape index: {0}]   ;;  %s464_s4 = inlined_call_operand.hbm [shape: f32[1,1], index: 4, kind: output, shape index: {1}]  }
   0x1   :  { %v56_v0 = vld [vmem:[%s461_s1 + $0xf8] sm:$0xff]  ;;  %v55_v1 = vld [vmem:[%s461_s1 + $0xf0] sm:$0xff]  ;;  %v54_v2 = vld [vmem:[%s461_s1 + $0xe8] sm:$0xff] }
   0x2   :  { %57 = vmatprep.subr.mxu0 %v56_v0  ;;  %159 = vmatprep.subr.mxu1 %v56_v0  ;;  %v53_v3 = vld [vmem:[%s461_s1 + $0xe0] sm:$0xff]  ;;  %v52_v4 = vld [vmem:[%s461_s1 + $0xd8] sm:$0xff]  ;;  %v51_v5 = vld [vmem:[%s461_s1 + $0xd0] sm:$0xff] }
   0x3   :  { %58 = vmatpush1.xpose.msra.mxu0 %v55_v1  ;;  %160 = vmatpush1.msra.mxu1 %v55_v1  ;;  %v50_v6 = vld [vmem:[%s461_s1 + $0xc8] sm:$0xff]  ;;  %v49_v7 = vld [vmem:[%s461_s1 + $0xc0] sm:$0xff]  ;;  %v48_v8 = vld [vmem:[%s461_s1 + $0xb8] sm:$0xff] }
   0x4   :  { %59 = vmatprep.subr.mxu0 %v54_v2  ;;  %161 = vmatprep.subr.mxu1 %v54_v2  ;;  %v47_v9 = vld [vmem:[%s461_s1 + $0xb0] sm:$0xff]  ;;  %v373_v10 = vld [vmem:[%s460_s0 + $0x8] sm:$0xff] }
   0x5   :  { %162 = vmatpush1.msra.mxu1 %v53_v3  ;;  %v46_v11 = vld [vmem:[%s461_s1 + $0xa8] sm:$0xff]  ;;  %121 = vmatprep.mubr.f32.mxu0 %v373_v10 }
   0x6   :  { %163 = vmatprep.subr.mxu1 %v52_v4 }
   0x7   :  { %60 = vmatpush1.xpose.msra.mxu0 %v53_v3  ;;  %164 = vmatpush1.msra.mxu1 %v51_v5 }
   0x8   :  { %61 = vmatprep.subr.mxu0 %v52_v4  ;;  %165 = vmatprep.subr.mxu1 %v50_v6 }
   0x9   :  { %166 = vmatpush1.msra.mxu1 %v49_v7 }
   0xa   :  { %167 = vmatprep.subr.mxu1 %v48_v8 }
   0xb   :  { %62 = vmatpush1.xpose.msra.mxu0 %v51_v5  ;;  %168 = vmatpush1.msra.mxu1 %v47_v9 }
   0xc   :  { %63 = vmatprep.subr.mxu0 %v50_v6 }
   0xd   :  { %10 = vsyncpa [#allocation3], 0  ;;  %v45_v12 = vld [vmem:[%s461_s1 + $0xa0] sm:$0xff]  ;;  %169 = vmatprep.subr.mxu1 %v46_v11  ;;  %v44_v13 = vld [vmem:[%s461_s1 + $0x98] sm:$0xff]  ;;  %v138_v39 = vlaneseq  ;;  %vm21_vm2 = vcmask 0   ;;  %v312_v49 = vmov 0.0  }
   0xe   :  { %170 = vmatpush1.msra.mxu1 %v45_v12  ;;  %v43_v14 = vld [vmem:[%s461_s1 + $0x90] sm:$0xff]  ;;  %v42_v15 = vld [vmem:[%s461_s1 + $0x88] sm:$0xff]  ;;  %v41_v16 = vld [vmem:[%s461_s1 + $0x80] sm:$0xff]  ;;  %22 = vst.msk [vmem:[#allocation2] sm:$0x1] %vm21_vm2, %v312_v49  ;;  %223 = vmatprep.mubr.f32.mxu1 %v312_v49  ;;  %v313_v55 = vmov 1.0  }
   0xf   :  { %64 = vmatpush1.xpose.msra.mxu0 %v49_v7  ;;  %171 = vmatprep.subr.mxu1 %v44_v13  ;;  %v40_v17 = vld [vmem:[%s461_s1 + $0x78] sm:$0xff]  ;;  %v39_v18 = vld [vmem:[%s461_s1 + $0x70] sm:$0xff]  ;;  %v38_v19 = vld [vmem:[%s461_s1 + $0x68] sm:$0xff]  ;;  %v139_v40 = vand.u32 127, %v138_v39  ;;  %vm249_vm4 = vcmask 7168  }
  0x10   :  { %65 = vmatprep.subr.mxu0 %v48_v8  ;;  %172 = vmatpush1.msra.mxu1 %v43_v14  ;;  %v37_v20 = vld [vmem:[%s461_s1 + $0x60] sm:$0xff]  ;;  %v36_v21 = vld [vmem:[%s461_s1 + $0x58] sm:$0xff]  ;;  %v35_v22 = vld [vmem:[%s461_s1 + $0x50] sm:$0xff] }
  0x11   :  { %173 = vmatprep.subr.mxu1 %v42_v15  ;;  %v34_v23 = vld [vmem:[%s461_s1 + $0x48] sm:$0xff]  ;;  %v33_v24 = vld [vmem:[%s461_s1 + $0x40] sm:$0xff]  ;;  %v32_v25 = vld [vmem:[%s461_s1 + $0x38] sm:$0xff] }
  0x12   :  { %174 = vmatpush1.msra.mxu1 %v41_v16  ;;  %v31_v26 = vld [vmem:[%s461_s1 + $0x30] sm:$0xff]  ;;  %v30_v27 = vld [vmem:[%s461_s1 + $0x28] sm:$0xff]  ;;  %v29_v28 = vld [vmem:[%s461_s1 + $0x20] sm:$0xff] }
  0x13   :  { %66 = vmatpush1.xpose.msra.mxu0 %v47_v9  ;;  %175 = vmatprep.subr.mxu1 %v40_v17  ;;  %v28_v29 = vld [vmem:[%s461_s1 + $0x18] sm:$0xff]  ;;  %v27_v30 = vld [vmem:[%s461_s1 + $0x10] sm:$0xff]  ;;  %v26_v31 = vld [vmem:[%s461_s1 + $0x8] sm:$0xff] }
  0x14   :  { %67 = vmatprep.subr.mxu0 %v46_v11  ;;  %176 = vmatpush1.msra.mxu1 %v39_v18  ;;  %v25_v32 = vld [vmem:[%s461_s1] sm:$0xff] }
  0x15   :  { %177 = vmatprep.subr.mxu1 %v38_v19  ;;  %v23_v33 = vld [vmem:[%s460_s0] sm:$0xff] }
  0x16   :  { %178 = vmatpush1.msra.mxu1 %v37_v20  ;;  %v282_v35 = vld [vmem:[%s462_s2] ss:$0 sm:$0xff] }
  0x17   :  { %68 = vmatpush1.xpose.msra.mxu0 %v45_v12  ;;  %179 = vmatprep.subr.mxu1 %v36_v21  ;;  %v242_v8 = vld [vmem:[#allocation2] sm:$0x1] }
  0x18   :  { %69 = vmatprep.subr.mxu0 %v44_v13  ;;  %180 = vmatpush1.msra.mxu1 %v35_v22 }
  0x19   :  { %181 = vmatprep.subr.mxu1 %v34_v23 }
  0x1a   :  { %182 = vmatpush1.msra.mxu1 %v33_v24 }
  0x1b   :  { %70 = vmatpush1.xpose.msra.mxu0 %v43_v14  ;;  %183 = vmatprep.subr.mxu1 %v32_v25 }
  0x1c   :  { %71 = vmatprep.subr.mxu0 %v42_v15  ;;  %184 = vmatpush1.msra.mxu1 %v31_v26 }
  0x1d   :  { %185 = vmatprep.subr.mxu1 %v30_v27 }
  0x1e   :  { %186 = vmatpush1.msra.mxu1 %v29_v28 }
  0x1f   :  { %72 = vmatpush1.xpose.msra.mxu0 %v41_v16  ;;  %187 = vmatprep.subr.mxu1 %v28_v29 }
  0x20   :  { %73 = vmatprep.subr.mxu0 %v40_v17  ;;  %188 = vmatpush1.msra.mxu1 %v27_v30 }
  0x21   :  { %189 = vmatprep.subr.mxu1 %v26_v31 }
  0x22   :  { %190 = vmatpush1.msra.mxu1 %v25_v32 }
  0x23   :  { %74 = vmatpush1.xpose.msra.mxu0 %v39_v18 }
  0x24   :  { %75 = vmatprep.subr.mxu0 %v38_v19 }
  0x27   :  { %76 = vmatpush1.xpose.msra.mxu0 %v37_v20 }
  0x28   :  { %77 = vmatprep.subr.mxu0 %v36_v21 }
  0x2b   :  { %78 = vmatpush1.xpose.msra.mxu0 %v35_v22 }
  0x2c   :  { %79 = vmatprep.subr.mxu0 %v34_v23 }
  0x2f   :  { %80 = vmatpush1.xpose.msra.mxu0 %v33_v24 }
  0x30   :  { %81 = vmatprep.subr.mxu0 %v32_v25 }
  0x33   :  { %82 = vmatpush1.xpose.msra.mxu0 %v31_v26 }
  0x34   :  { %83 = vmatprep.subr.mxu0 %v30_v27 }
  0x37   :  { %84 = vmatpush1.xpose.msra.mxu0 %v29_v28 }
  0x38   :  { %85 = vmatprep.subr.mxu0 %v28_v29 }
  0x3b   :  { %86 = vmatpush1.xpose.msra.mxu0 %v27_v30 }
  0x3c   :  { %87 = vmatprep.subr.mxu0 %v26_v31 }
  0x3f   :  { %88 = vmatpush1.xpose.msra.mxu0 %v25_v32 }
  0x42   :  { %122 = vmatmul.mubr.f32.vlgmr.msra.gmra.mxu0 %v23_v33 }
 0x102   :  { %v123_v34 = vpop.f32.mrf.mxu0 }
 0x103   :  { %v128_v36 = vmul.f32 2.0, %v123_v34 }
 0x104   :  { %v125_v37 = vpop.f32.mrf.mxu0 }
 0x105   :  { %v135_v38 = vsub.f32 %v282_v35, %v128_v36 }
 0x107   :  { %136 = vmin.xlane.f32.xlu0 %v135_v38 }
 0x190   :  { %v137_v41 = vpop.xlane.xlu0 %136 }
 0x191   :  { %vm140_vm0 = vcmp.le.f32.partialorder %v135_v38, %v137_v41 }
 0x192   :  { %v141_v42 = vsel %vm140_vm0, %v139_v40, 128 }
 0x193   :  { %v143_v43 = vshra.s32 %v141_v42, 16  ;;  %v142_v45 = vand.u32 65535, %v141_v42 }
 0x195   :  { %v145_v44 = vcvt.s32.f32 %v143_v43  ;;  %v144_v47 = vcvt.s32.f32 %v142_v45 }
 0x197   :  { %146 = vmin.xlane.f32.xlu0 %v145_v44 }
 0x220   :  { %v147_v46 = vpop.xlane.xlu0 %146 }
 0x221   :  { %vm148_vm1 = vcmp.eq.f32.partialorder %v145_v44, %v147_v46  ;;  %v153_v50 = vcvt.f32.s32 %v147_v46 }
 0x222   :  { %v149_v48 = vsel %vm148_vm1, %v144_v47, inf }
 0x223   :  { %150 = vmin.xlane.f32.xlu1 %v149_v48  ;;  %v154_v52 = vshll.u32 %v153_v50, 16 }
 0x2ac   :  { %v151_v51 = vpop.xlane.xlu1 %150 }
 0x2ad   :  { %v152_v53 = vcvt.f32.s32 %v151_v51 }
 0x2af   :  { %v155_v54 = vadd.s32 %v154_v52, %v152_v53 }
 0x2b1   :  { %vm156_vm3 = vcmp.eq.s32.totalorder %v139_v40, %v155_v54 }
 0x2b2   :  { %284 = vmatmul.mubr.msk.f32.vlgmr.msra.gmra.mxu1 %vm156_vm3, %v313_v55 }
 0x372   :  { %v225_v56 = vpop.f32.mrf.mxu1 }
 0x373   :  { %230 = vst [vmem:[%s463_s3] sm:$0xff] %v225_v56  ;;  %v240_v57 = vsub.f32 %v23_v33, %v225_v56 }
 0x374   :  { %v227_v58 = vpop.f32.mrf.mxu1 }
 0x375   :  { %231 = vst [vmem:[%s463_s3 + $0x8] sm:$0xff] %v227_v58  ;;  %v241_v59 = vsub.f32 %v373_v10, %v227_v58  ;;  %v243_v60 = vmul.f32 %v240_v57, %v240_v57  ;;  %s314_s3 = smov [#allocation2]  }
 0x376   :  { %s272_s8 = sshll.u32 %s314_s3, 4  ;;  %s273_s8 = int_to_ptr.vmem [resolvable:$true] %s272_s8 }
 0x377   :  { %v244_v61 = vmul.f32 %v241_v59, %v241_v59  ;;  %s290_s10 = scalar_lea.vmem %s273_s8, 16  ;;  %s294_s11 = scalar_lea.vmem %s273_s8, 32 }
 0x378   :  { %p291_p0 = scmp.ne.s32.totalorder %s273_s8, %s290_s10  ;;  %p295_p1 = scmp.lt.s32.totalorder %s273_s8, %s273_s8 }
 0x379   :  { %v245_v62 = vadd.f32 %v244_v61, %v243_v60  ;;  %p296_p2 = scmp.lt.s32.totalorder %s294_s11, %s290_s10 }
 0x37b   :  { %246 = vadd.xlane.f32.xlu1 %v245_v62  ;;  %p297_p3 = por %p296_p2, %p295_p1 }
 0x37d   :  { %p298_p4 = pnand %p297_p3, %p291_p0 }
 0x404   :  { %v247_v63 = vpop.xlane.xlu1 %246 }
 0x405   :  { %v250_v0 = vsel %vm249_vm4, %v247_v63, 0.0 }
 0x406   :  { %251 = vadd.xlane.f32.xlu0 %v250_v0 }
 0x48f   :  { %v252_v1 = vpop.xlane.xlu0 %251 }
 0x490   :  { %v253_v2 = vrot.slane %v252_v1, 4 }
 0x492   :  { %v254_v3 = vadd.f32 %v253_v2, %v252_v1 }
 0x494   :  { %v255_v4 = vrot.slane %v254_v3, 2 }
 0x496   :  { %v256_v5 = vadd.f32 %v255_v4, %v254_v3 }
 0x498   :  { %v257_v6 = vrot.slane %v256_v5, 1 }
 0x49a   :  { %v258_v7 = vadd.f32 %v257_v6, %v256_v5 }
 0x49c   :  { %285 = vpush %v258_v7 }
 0x4cd   :  { %s286_s9 = spop %285 }
 0x4ce   :  { %v260_v9 = vstv %s286_s9 }
 0x4cf   :  { %v261_v10 = vadd.f32 %v260_v9, %v242_v8 }
 0x4d1   :  { %263 = vst.msk [vmem:[#allocation2] sm:$0x1] %vm21_vm2, %v261_v10 }
 0x4d2   :  { %301 = shalt.err (!%p298_p4)
}
 0x4d3   :  { %275 = dma.vmem_to_hbm [thread:$0]  %s273_s8, 16, %s464_s4, [#allocation3]  }
 0x4d4   :  { %310 = dma.done.wait [#allocation3], 16  }
 0x4d5   :  { %311 = vsyncadd [#allocation3], 4294967280 }
 0x4d6   :  { %281 = vsyncpa [#allocation3], 1 }

// kernel: vqvae_forward.15
= control target key start
LH: loop header
LB: loop body
LE: loop exit
PB: predicated region body
PF: predicated region fallthrough
CT: control target
= control target key end

     0   :  { %s1344_s12 = smov 0   ;;  %s1346_s13 = smov 0   ;;  %s1460_s0 = inlined_call_operand.vmem [shape: bf16[4,8,1024], index: 0, kind: input, shape index: {}]   ;;  %s1461_s1 = inlined_call_operand.vmem [shape: bf16[4,1024,128], index: 1, kind: input, shape index: {}]   ;;  %s1462_s2 = inlined_call_operand.vmem [shape: f32[1,128], index: 2, kind: input, shape index: {}]   ;;  %s1463_s3 = inlined_call_operand.vmem [shape: f32[4,8,128], index: 3, kind: output, shape index: {}]  }
   0x1   :  { %s1348_s14 = smov 0  }
   0x2 LB: > { %s25_s15 = sadd.s32 1, %s1318_s13  ;;  %p1033_p0 = scmp.ge.s32.totalorder %s1322_s14, 1  ;;  %s1322_s14 = sphi %s1348_s14, %s13_s14   ;;  %s1318_s13 = sphi %s1346_s13, %s1465_s13   ;;  %s1314_s12 = sphi %s1344_s12, %s1464_s12  }
   0x3   : > { %p27_p1 = scmp.ge.s32.totalorder %s25_s15, 4  ;;  %p167_p2 = scmp.lt.s32.totalorder %s1322_s14, 5 }
   0x5   : > { %s1467_s15 = smov (%p27_p1, %s25_s15), 0  ;;  %p168_p3 = pnand %p1033_p0, %p167_p2 }
   0x6   : > { %p202_p4 = scmp.lt.s32.totalorder (!%p168_p3), %s1314_s12, 3 }
   0x7   : > { %171 = sbr.rel (%p168_p3) target bundleno = 285 (0x11d), region = 32 }
   0xc   : > { %s1469_s12 = smov (!%p202_p4, %s1314_s12), 3 }
   0xd   : > { %s1115_s16 = sshll.u32 %s1469_s12, 9  ;;  %s1114_s20 = sshll.u32 %s1469_s12, 5 }
   0xe   : > { %s1368_s19 = scalar_lea.vmem %s1461_s1, %s1115_s16  ;;  %s1404_s23 = scalar_lea.vmem %s1460_s0, %s1114_s20 }
   0xf   : > { %v1228_v0 = vld [vmem:[%s1368_s19 + $0x78] sm:$0xff]   ;;  %v1232_v4 = vld [vmem:[%s1368_s19 + $0x70] sm:$0xff]   ;;  %v1236_v8 = vld [vmem:[%s1368_s19 + $0x68] sm:$0xff]   ;;  %s1038_s26 = sshll.u32 %s1469_s12, 3 }
  0x10   : > { %v1229_v1 = vld [vmem:[%s1368_s19 + $0xf8] sm:$0xff]   ;;  %1116 = vmatprep.subr.bf16.mxu0 %v1228_v0  ;;  %v1233_v5 = vld [vmem:[%s1368_s19 + $0xf0] sm:$0xff]   ;;  %v1237_v9 = vld [vmem:[%s1368_s19 + $0xe8] sm:$0xff]   ;;  %s222_s29 = scalar_lea.vmem %s1463_s3, %s1038_s26 }
  0x11   : > { %v1230_v2 = vld [vmem:[%s1368_s19 + $0x38] sm:$0xff]   ;;  %1138 = vmatprep.subr.bf16.mxu1 %v1229_v1  ;;  %v1234_v6 = vld [vmem:[%s1368_s19 + $0x30] sm:$0xff]   ;;  %v1238_v10 = vld [vmem:[%s1368_s19 + $0x28] sm:$0xff]  }
  0x12   : > { %v1231_v3 = vld [vmem:[%s1368_s19 + $0xb8] sm:$0xff]   ;;  %1117 = vmatpush3.bf16.msra.mxu0 %v1230_v2  ;;  %v1235_v7 = vld [vmem:[%s1368_s19 + $0xb0] sm:$0xff]   ;;  %v1239_v11 = vld [vmem:[%s1368_s19 + $0xa8] sm:$0xff]  }
  0x13   : > { %1139 = vmatpush3.bf16.msra.mxu1 %v1231_v3  ;;  %1118 = vmatprep.subr.bf16.mxu0 %v1232_v4  ;;  %v1240_v12 = vld [vmem:[%s1368_s19 + $0x60] sm:$0xff]   ;;  %v1244_v16 = vld [vmem:[%s1368_s19 + $0x58] sm:$0xff]   ;;  %v1248_v20 = vld [vmem:[%s1368_s19 + $0x50] sm:$0xff]  }
  0x14   : > { %1140 = vmatprep.subr.bf16.mxu1 %v1233_v5  ;;  %v1241_v13 = vld [vmem:[%s1368_s19 + $0xe0] sm:$0xff]   ;;  %v1245_v17 = vld [vmem:[%s1368_s19 + $0xd8] sm:$0xff]   ;;  %v1249_v21 = vld [vmem:[%s1368_s19 + $0xd0] sm:$0xff]  }
  0x15   : > { %v1242_v14 = vld [vmem:[%s1368_s19 + $0x20] sm:$0xff]   ;;  %v1246_v18 = vld [vmem:[%s1368_s19 + $0x18] sm:$0xff]   ;;  %v1250_v22 = vld [vmem:[%s1368_s19 + $0x10] sm:$0xff]  }
  0x16   : > { %1119 = vmatpush3.bf16.msra.mxu0 %v1234_v6  ;;  %v1243_v15 = vld [vmem:[%s1368_s19 + $0xa0] sm:$0xff]   ;;  %v1247_v19 = vld [vmem:[%s1368_s19 + $0x98] sm:$0xff]   ;;  %v1251_v23 = vld [vmem:[%s1368_s19 + $0x90] sm:$0xff]  }
  0x17   : > { %1141 = vmatpush3.bf16.msra.mxu1 %v1235_v7  ;;  %1120 = vmatprep.subr.bf16.mxu0 %v1236_v8  ;;  %v1252_v24 = vld [vmem:[%s1368_s19 + $0x48] sm:$0xff]   ;;  %v1256_v28 = vld [vmem:[%s1368_s19 + $0x40] sm:$0xff]   ;;  %v1264_v38 = vld [vmem:[%s1368_s19 + $0x178] sm:$0xff]  }
  0x18   : > { %1142 = vmatprep.subr.bf16.mxu1 %v1237_v9  ;;  %v1253_v25 = vld [vmem:[%s1368_s19 + $0xc8] sm:$0xff]   ;;  %v1257_v29 = vld [vmem:[%s1368_s19 + $0xc0] sm:$0xff]   ;;  %v1265_v39 = vld [vmem:[%s1368_s19 + $0x1f8] sm:$0xff]  }
  0x19   : > { %v1254_v26 = vld [vmem:[%s1368_s19 + $0x8] sm:$0xff]   ;;  %v1258_v30 = vld [vmem:[%s1368_s19] sm:$0xff]   ;;  %v1266_v40 = vld [vmem:[%s1368_s19 + $0x138] sm:$0xff]  }
  0x1a   : > { %1121 = vmatpush3.bf16.msra.mxu0 %v1238_v10  ;;  %v1255_v27 = vld [vmem:[%s1368_s19 + $0x88] sm:$0xff]   ;;  %v1259_v31 = vld [vmem:[%s1368_s19 + $0x80] sm:$0xff]   ;;  %v1267_v41 = vld [vmem:[%s1368_s19 + $0x1b8] sm:$0xff]  }
  0x1b   : > { %1143 = vmatpush3.bf16.msra.mxu1 %v1239_v11  ;;  %1122 = vmatprep.subr.bf16.mxu0 %v1240_v12  ;;  %v224_v32 = vld [vmem:[%s1404_s23] sm:$0xff]  ;;  %v225_v33 = vld [vmem:[%s1404_s23 + $0x8] sm:$0xff]  ;;  %v1268_v42 = vld [vmem:[%s1368_s19 + $0x170] sm:$0xff]  }
  0x1c   : > { %1144 = vmatprep.subr.bf16.mxu1 %v1241_v13  ;;  %v1040_v34 = vcombine.low %v224_v32, %v224_v32  ;;  %v1041_v35 = vcombine.high %v224_v32, %v224_v32  ;;  %v1042_v36 = vcombine.low %v225_v33, %v225_v33  ;;  %v1043_v37 = vcombine.high %v225_v33, %v225_v33  ;;  %v1269_v43 = vld [vmem:[%s1368_s19 + $0x1f0] sm:$0xff]   ;;  %v1272_v46 = vld [vmem:[%s1368_s19 + $0x168] sm:$0xff]   ;;  %v1276_v50 = vld [vmem:[%s1368_s19 + $0x160] sm:$0xff]  }
  0x1d   : > { %v1270_v44 = vld [vmem:[%s1368_s19 + $0x130] sm:$0xff]   ;;  %v1273_v47 = vld [vmem:[%s1368_s19 + $0x1e8] sm:$0xff]   ;;  %v1277_v51 = vld [vmem:[%s1368_s19 + $0x1e0] sm:$0xff]  }
  0x1e   : > { %1123 = vmatpush3.bf16.msra.mxu0 %v1242_v14  ;;  %807 = vmatprep.mubr.bf16.mxu0 %v1041_v35  ;;  %v1271_v45 = vld [vmem:[%s1368_s19 + $0x1b0] sm:$0xff]   ;;  %v1274_v48 = vld [vmem:[%s1368_s19 + $0x128] sm:$0xff]   ;;  %v1278_v52 = vld [vmem:[%s1368_s19 + $0x120] sm:$0xff]  }
  0x1f   : > { %1145 = vmatpush3.bf16.msra.mxu1 %v1243_v15  ;;  %1124 = vmatprep.subr.bf16.mxu0 %v1244_v16  ;;  %v1275_v49 = vld [vmem:[%s1368_s19 + $0x1a8] sm:$0xff]   ;;  %v1279_v53 = vld [vmem:[%s1368_s19 + $0x1a0] sm:$0xff]   ;;  %v1280_v54 = vld [vmem:[%s1368_s19 + $0x158] sm:$0xff]  }
  0x20   : > { %1146 = vmatprep.subr.bf16.mxu1 %v1245_v17  ;;  %847 = vmatprep.mubr.bf16.mxu1 %v1043_v37  ;;  %v1281_v55 = vld [vmem:[%s1368_s19 + $0x1d8] sm:$0xff]   ;;  %v1284_v58 = vld [vmem:[%s1368_s19 + $0x150] sm:$0xff]   ;;  %v1288_v62 = vld [vmem:[%s1368_s19 + $0x148] sm:$0xff]  }
  0x21   : > { %v1282_v56 = vld [vmem:[%s1368_s19 + $0x118] sm:$0xff]   ;;  %v1285_v59 = vld [vmem:[%s1368_s19 + $0x1d0] sm:$0xff]   ;;  %v1289_v63 = vld [vmem:[%s1368_s19 + $0x1c8] sm:$0xff]  }
  0x22   : > { %1125 = vmatpush3.bf16.msra.mxu0 %v1246_v18  ;;  %v1283_v57 = vld [vmem:[%s1368_s19 + $0x198] sm:$0xff]   ;;  %v1286_v60 = vld [vmem:[%s1368_s19 + $0x110] sm:$0xff]   ;;  %v1290_v0 = vld [vmem:[%s1368_s19 + $0x108] sm:$0xff]  }
  0x23   : > { %1147 = vmatpush3.bf16.msra.mxu1 %v1247_v19  ;;  %1126 = vmatprep.subr.bf16.mxu0 %v1248_v20  ;;  %v1287_v61 = vld [vmem:[%s1368_s19 + $0x190] sm:$0xff]   ;;  %v1291_v1 = vld [vmem:[%s1368_s19 + $0x188] sm:$0xff]   ;;  %v1292_v2 = vld [vmem:[%s1368_s19 + $0x140] sm:$0xff]  }
  0x24   : > { %1148 = vmatprep.subr.bf16.mxu1 %v1249_v21  ;;  %v1293_v3 = vld [vmem:[%s1368_s19 + $0x1c0] sm:$0xff]   ;;  %v226_v6 = vld [vmem:[%s1404_s23 + $0x10] sm:$0xff]  ;;  %v227_v9 = vld [vmem:[%s1404_s23 + $0x18] sm:$0xff] }
  0x25   : > { %v1294_v4 = vld [vmem:[%s1368_s19 + $0x100] sm:$0xff]   ;;  %v1044_v7 = vcombine.low %v226_v6, %v226_v6  ;;  %v1045_v8 = vcombine.high %v226_v6, %v226_v6  ;;  %v1046_v10 = vcombine.low %v227_v9, %v227_v9  ;;  %v1047_v11 = vcombine.high %v227_v9, %v227_v9 }
  0x26   : > { %1127 = vmatpush3.bf16.msra.mxu0 %v1250_v22  ;;  %v1295_v5 = vld [vmem:[%s1368_s19 + $0x180] sm:$0xff]  }
  0x27   : > { %1149 = vmatpush3.bf16.msra.mxu1 %v1251_v23  ;;  %1128 = vmatprep.subr.bf16.mxu0 %v1252_v24  ;;  %v1039_v21 = vld [vmem:[%s1462_s2] ss:$0 sm:$0xff] }
  0x28   : > { %1150 = vmatprep.subr.bf16.mxu1 %v1253_v25 }
  0x2a   : > { %1129 = vmatpush3.bf16.msra.mxu0 %v1254_v26 }
  0x2b   : > { %1151 = vmatpush3.bf16.msra.mxu1 %v1255_v27  ;;  %1130 = vmatprep.subr.bf16.mxu0 %v1256_v28 }
  0x2c   : > { %1152 = vmatprep.subr.bf16.mxu1 %v1257_v29 }
  0x2e   : > { %1131 = vmatpush3.bf16.msra.mxu0 %v1258_v30 }
  0x2f   : > { %1153 = vmatpush3.bf16.msra.mxu1 %v1259_v31  ;;  %1160 = vmatprep.subr.bf16.mxu0 %v1264_v38 }
  0x30   : > { %1182 = vmatprep.subr.bf16.mxu1 %v1265_v39 }
  0x31   : > { %808 = vmatmul.mubr.bf16.vlgmr.msra.gmra.mxu0 %v1040_v34 }
  0x32   : > { %848 = vmatmul.mubr.bf16.vlgmr.msra.gmra.mxu1 %v1042_v36  ;;  %1161 = vmatpush3.bf16.msra.mxu0 %v1266_v40 }
  0x33   : > { %1183 = vmatpush3.bf16.msra.mxu1 %v1267_v41  ;;  %1162 = vmatprep.subr.bf16.mxu0 %v1268_v42 }
  0x34   : > { %1184 = vmatprep.subr.bf16.mxu1 %v1269_v43  ;;  %887 = vmatprep.mubr.bf16.mxu0 %v1045_v8 }
  0x35   : > { %927 = vmatprep.mubr.bf16.mxu1 %v1047_v11 }
  0x36   : > { %1163 = vmatpush3.bf16.msra.mxu0 %v1270_v44 }
  0x37   : > { %1185 = vmatpush3.bf16.msra.mxu1 %v1271_v45  ;;  %1164 = vmatprep.subr.bf16.mxu0 %v1272_v46 }
  0x38   : > { %1186 = vmatprep.subr.bf16.mxu1 %v1273_v47 }
  0x3a   : > { %1165 = vmatpush3.bf16.msra.mxu0 %v1274_v48 }
  0x3b   : > { %1187 = vmatpush3.bf16.msra.mxu1 %v1275_v49  ;;  %1166 = vmatprep.subr.bf16.mxu0 %v1276_v50 }
  0x3c   : > { %1188 = vmatprep.subr.bf16.mxu1 %v1277_v51 }
  0x3e   : > { %1167 = vmatpush3.bf16.msra.mxu0 %v1278_v52 }
  0x3f   : > { %1189 = vmatpush3.bf16.msra.mxu1 %v1279_v53  ;;  %1168 = vmatprep.subr.bf16.mxu0 %v1280_v54 }
  0x40   : > { %1190 = vmatprep.subr.bf16.mxu1 %v1281_v55 }
  0x42   : > { %1169 = vmatpush3.bf16.msra.mxu0 %v1282_v56 }
  0x43   : > { %1191 = vmatpush3.bf16.msra.mxu1 %v1283_v57  ;;  %1170 = vmatprep.subr.bf16.mxu0 %v1284_v58 }
  0x44   : > { %1192 = vmatprep.subr.bf16.mxu1 %v1285_v59 }
  0x46   : > { %1171 = vmatpush3.bf16.msra.mxu0 %v1286_v60 }
  0x47   : > { %1193 = vmatpush3.bf16.msra.mxu1 %v1287_v61  ;;  %1172 = vmatprep.subr.bf16.mxu0 %v1288_v62 }
  0x48   : > { %1194 = vmatprep.subr.bf16.mxu1 %v1289_v63 }
  0x4a   : > { %1173 = vmatpush3.bf16.msra.mxu0 %v1290_v0 }
  0x4b   : > { %1195 = vmatpush3.bf16.msra.mxu1 %v1291_v1  ;;  %1174 = vmatprep.subr.bf16.mxu0 %v1292_v2 }
  0x4c   : > { %1196 = vmatprep.subr.bf16.mxu1 %v1293_v3 }
  0x4e   : > { %1175 = vmatpush3.bf16.msra.mxu0 %v1294_v4 }
  0x4f   : > { %1197 = vmatpush3.bf16.msra.mxu1 %v1295_v5 }
  0x51   : > { %888 = vmatmul.mubr.bf16.vlgmr.msra.gmra.mxu0 %v1044_v7 }
  0x52   : > { %928 = vmatmul.mubr.bf16.vlgmr.msra.gmra.mxu1 %v1046_v10 }
  0xf1   : > { %v1132_v12 = vpop.f32.mrf.mxu0 }
  0xf2   : > { %v1154_v13 = vpop.f32.mrf.mxu1 }
  0xf3   : > { %v1133_v14 = vpop.f32.mrf.mxu0 }
  0xf4   : > { %v1155_v15 = vpop.f32.mrf.mxu1  ;;  %v1134_v20 = vadd.f32 %v1133_v14, %v1132_v12 }
  0xf5   : > { %v1135_v16 = vpop.f32.mrf.mxu0  ;;  %v1156_v23 = vadd.f32 %v1155_v15, %v1154_v13 }
  0xf6   : > { %v1157_v17 = vpop.f32.mrf.mxu1  ;;  %v810_v22 = vadd.f32 %v1134_v20, %v1039_v21 }
  0xf7   : > { %v1136_v18 = vpop.f32.mrf.mxu0 }
  0xf8   : > { %v1158_v19 = vpop.f32.mrf.mxu1  ;;  %v850_v28 = vadd.f32 %v1156_v23, %v810_v22 }
 0x111   : > { %v1176_v24 = vpop.f32.mrf.mxu0 }
 0x112   : > { %v1198_v25 = vpop.f32.mrf.mxu1 }
 0x113   : > { %v1177_v26 = vpop.f32.mrf.mxu0 }
 0x114   : > { %v1199_v27 = vpop.f32.mrf.mxu1  ;;  %v1178_v29 = vadd.f32 %v1177_v26, %v1176_v24 }
 0x115   : > { %v1179_v30 = vpop.f32.mrf.mxu0  ;;  %v1200_v33 = vadd.f32 %v1199_v27, %v1198_v25 }
 0x116   : > { %v1201_v31 = vpop.f32.mrf.mxu1  ;;  %v890_v32 = vadd.f32 %v1178_v29, %v850_v28 }
 0x117   : > { %v1180_v34 = vpop.f32.mrf.mxu0 }
 0x118   : > { %v1202_v35 = vpop.f32.mrf.mxu1  ;;  %v930_v36 = vadd.f32 %v1200_v33, %v890_v32 }
 0x11a   : > { %v935_v37 = vmax.f32 %v930_v36, 0.0 }
 0x11c   : > { %936 = vst [vmem:[%s222_s29] sm:$0xff] %v935_v37 }
 0x11d PF: > { %s13_s14 = sadd.s32 1, %s1322_s14   ;;  %s1464_s12 = smov %s1318_s13 }
 0x11e   : > { %p10_p5 = scmp.ge.s32.totalorder %s13_s14, 6   ;;  %s1465_s13 = smov %s1467_s15 }
 0x120   :  { %12 = sbr.rel (!%p10_p5) target bundleno = 2 (0x2), region = 65 }

// kernel: vqvae_forward.16
= control target key start
LH: loop header
LB: loop body
LE: loop exit
PB: predicated region body
PF: predicated region fallthrough
CT: control target
= control target key end

     0   :  { %s978_s12 = smov 0   ;;  %s980_s13 = smov 0   ;;  %s1056_s0 = inlined_call_operand.vmem [shape: bf16[4,32,512], index: 0, kind: input, shape index: {}]   ;;  %s1057_s1 = inlined_call_operand.vmem [shape: bf16[4,512,128], index: 1, kind: input, shape index: {}]   ;;  %s1058_s2 = inlined_call_operand.vmem [shape: f32[1,128], index: 2, kind: input, shape index: {}]   ;;  %s1059_s3 = inlined_call_operand.vmem [shape: f32[4,32,128], index: 3, kind: output, shape index: {}]  }
   0x1   :  { %s982_s14 = smov 0  }
   0x2 LB: > { %s25_s15 = sadd.s32 1, %s952_s13  ;;  %p757_p0 = scmp.ge.s32.totalorder %s956_s14, 1  ;;  %s956_s14 = sphi %s982_s14, %s13_s14   ;;  %s952_s13 = sphi %s980_s13, %s1061_s13   ;;  %s948_s12 = sphi %s978_s12, %s1060_s12  }
   0x3   : > { %p27_p1 = scmp.ge.s32.totalorder %s25_s15, 4  ;;  %p169_p2 = scmp.lt.s32.totalorder %s956_s14, 5 }
   0x5   : > { %s1063_s15 = smov (%p27_p1, %s25_s15), 0  ;;  %p170_p3 = pnand %p757_p0, %p169_p2 }
   0x6   : > { %p208_p4 = scmp.lt.s32.totalorder (!%p170_p3), %s948_s12, 3 }
   0x7   : > { %173 = sbr.rel (%p170_p3) target bundleno = 265 (0x109), region = 32 }
   0xc   : > { %s1065_s12 = smov (!%p208_p4, %s948_s12), 3  ;;  %v764_v42 = vld [vmem:[%s1058_s2] ss:$0 sm:$0xff] }
   0xd   : > { %s808_s16 = sshll.u32 %s1065_s12, 8  ;;  %s807_s20 = sshll.u32 %s1065_s12, 6 }
   0xe   : > { %s1002_s19 = scalar_lea.vmem %s1057_s1, %s808_s16  ;;  %s216_s23 = scalar_lea.vmem %s1056_s0, %s807_s20 }
   0xf   : > { %v890_v0 = vld [vmem:[%s1002_s19 + $0x78] sm:$0xff]   ;;  %v894_v4 = vld [vmem:[%s1002_s19 + $0x70] sm:$0xff]   ;;  %v898_v8 = vld [vmem:[%s1002_s19 + $0x68] sm:$0xff]   ;;  %s809_s26 = sshll.u32 %s1065_s12, 5 }
  0x10   : > { %v891_v1 = vld [vmem:[%s1002_s19 + $0xf8] sm:$0xff]   ;;  %810 = vmatprep.subr.bf16.mxu0 %v890_v0  ;;  %v895_v5 = vld [vmem:[%s1002_s19 + $0xf0] sm:$0xff]   ;;  %v899_v9 = vld [vmem:[%s1002_s19 + $0xe8] sm:$0xff]   ;;  %s231_s29 = scalar_lea.vmem %s1059_s3, %s809_s26 }
  0x11   : > { %v892_v2 = vld [vmem:[%s1002_s19 + $0x38] sm:$0xff]   ;;  %838 = vmatprep.subr.bf16.mxu1 %v891_v1  ;;  %v896_v6 = vld [vmem:[%s1002_s19 + $0x30] sm:$0xff]   ;;  %v900_v10 = vld [vmem:[%s1002_s19 + $0x28] sm:$0xff]  }
  0x12   : > { %v893_v3 = vld [vmem:[%s1002_s19 + $0xb8] sm:$0xff]   ;;  %811 = vmatpush3.bf16.msra.mxu0 %v892_v2  ;;  %v897_v7 = vld [vmem:[%s1002_s19 + $0xb0] sm:$0xff]   ;;  %v901_v11 = vld [vmem:[%s1002_s19 + $0xa8] sm:$0xff]  }
  0x13   : > { %839 = vmatpush3.bf16.msra.mxu1 %v893_v3  ;;  %812 = vmatprep.subr.bf16.mxu0 %v894_v4  ;;  %v902_v12 = vld [vmem:[%s1002_s19 + $0x60] sm:$0xff]   ;;  %v906_v16 = vld [vmem:[%s1002_s19 + $0x58] sm:$0xff]   ;;  %v910_v20 = vld [vmem:[%s1002_s19 + $0x50] sm:$0xff]  }
  0x14   : > { %840 = vmatprep.subr.bf16.mxu1 %v895_v5  ;;  %v903_v13 = vld [vmem:[%s1002_s19 + $0xe0] sm:$0xff]   ;;  %v907_v17 = vld [vmem:[%s1002_s19 + $0xd8] sm:$0xff]   ;;  %v911_v21 = vld [vmem:[%s1002_s19 + $0xd0] sm:$0xff]  }
  0x15   : > { %v904_v14 = vld [vmem:[%s1002_s19 + $0x20] sm:$0xff]   ;;  %v908_v18 = vld [vmem:[%s1002_s19 + $0x18] sm:$0xff]   ;;  %v912_v22 = vld [vmem:[%s1002_s19 + $0x10] sm:$0xff]  }
  0x16   : > { %813 = vmatpush3.bf16.msra.mxu0 %v896_v6  ;;  %v905_v15 = vld [vmem:[%s1002_s19 + $0xa0] sm:$0xff]   ;;  %v909_v19 = vld [vmem:[%s1002_s19 + $0x98] sm:$0xff]   ;;  %v913_v23 = vld [vmem:[%s1002_s19 + $0x90] sm:$0xff]  }
  0x17   : > { %841 = vmatpush3.bf16.msra.mxu1 %v897_v7  ;;  %814 = vmatprep.subr.bf16.mxu0 %v898_v8  ;;  %v914_v24 = vld [vmem:[%s1002_s19 + $0x48] sm:$0xff]   ;;  %v918_v28 = vld [vmem:[%s1002_s19 + $0x40] sm:$0xff]  }
  0x18   : > { %842 = vmatprep.subr.bf16.mxu1 %v899_v9  ;;  %v915_v25 = vld [vmem:[%s1002_s19 + $0xc8] sm:$0xff]   ;;  %v919_v29 = vld [vmem:[%s1002_s19 + $0xc0] sm:$0xff]  }
  0x19   : > { %v916_v26 = vld [vmem:[%s1002_s19 + $0x8] sm:$0xff]   ;;  %v920_v30 = vld [vmem:[%s1002_s19] sm:$0xff]  }
  0x1a   : > { %815 = vmatpush3.bf16.msra.mxu0 %v900_v10  ;;  %v917_v27 = vld [vmem:[%s1002_s19 + $0x88] sm:$0xff]   ;;  %v921_v31 = vld [vmem:[%s1002_s19 + $0x80] sm:$0xff]  }
  0x1b   : > { %843 = vmatpush3.bf16.msra.mxu1 %v901_v11  ;;  %816 = vmatprep.subr.bf16.mxu0 %v902_v12  ;;  %v922_v32 = vld [vmem:[%s216_s23] ss:$16 sps:$4 sm:$0xff]   ;;  %v924_v33 = vld [vmem:[%s216_s23 + $0x4] ss:$16 sps:$4 sm:$0xff]   ;;  %v925_v34 = vld [vmem:[%s216_s23 + $0x8] ss:$16 sps:$4 sm:$0xff]  }
  0x1c   : > { %844 = vmatprep.subr.bf16.mxu1 %v903_v13  ;;  %v927_v35 = vld [vmem:[%s216_s23 + $0xc] ss:$16 sps:$4 sm:$0xff]   ;;  %577 = vmatprep.mubr.bf16.mxu0 %v924_v33  ;;  %v928_v36 = vld [vmem:[%s216_s23 + $0x24] ss:$16 sps:$4 sm:$0xff]   ;;  %v932_v38 = vld [vmem:[%s216_s23 + $0x20] ss:$16 sps:$4 sm:$0xff]  }
  0x1d   : > { %626 = vmatprep.mubr.bf16.mxu1 %v927_v35  ;;  %v930_v37 = vld [vmem:[%s216_s23 + $0x2c] ss:$16 sps:$4 sm:$0xff]   ;;  %v933_v39 = vld [vmem:[%s216_s23 + $0x28] ss:$16 sps:$4 sm:$0xff]  }
  0x1e   : > { %817 = vmatpush3.bf16.msra.mxu0 %v904_v14 }
  0x1f   : > { %845 = vmatpush3.bf16.msra.mxu1 %v905_v15  ;;  %818 = vmatprep.subr.bf16.mxu0 %v906_v16 }
  0x20   : > { %846 = vmatprep.subr.bf16.mxu1 %v907_v17 }
  0x22   : > { %819 = vmatpush3.bf16.msra.mxu0 %v908_v18 }
  0x23   : > { %847 = vmatpush3.bf16.msra.mxu1 %v909_v19  ;;  %820 = vmatprep.subr.bf16.mxu0 %v910_v20 }
  0x24   : > { %848 = vmatprep.subr.bf16.mxu1 %v911_v21 }
  0x26   : > { %821 = vmatpush3.bf16.msra.mxu0 %v912_v22 }
  0x27   : > { %849 = vmatpush3.bf16.msra.mxu1 %v913_v23  ;;  %822 = vmatprep.subr.bf16.mxu0 %v914_v24 }
  0x28   : > { %850 = vmatprep.subr.bf16.mxu1 %v915_v25 }
  0x2a   : > { %823 = vmatpush3.bf16.msra.mxu0 %v916_v26 }
  0x2b   : > { %851 = vmatpush3.bf16.msra.mxu1 %v917_v27  ;;  %824 = vmatprep.subr.bf16.mxu0 %v918_v28 }
  0x2c   : > { %852 = vmatprep.subr.bf16.mxu1 %v919_v29 }
  0x2e   : > { %825 = vmatpush3.bf16.msra.mxu0 %v920_v30 }
  0x2f   : > { %853 = vmatpush3.bf16.msra.mxu1 %v921_v31 }
  0x31   : > { %578 = vmatmul.mubr.bf16.vlgmr.msra.gmra.mxu0 %v922_v32 }
  0x32   : > { %627 = vmatmul.mubr.bf16.vlgmr.msra.gmra.mxu1 %v925_v34  ;;  %585 = vmatprep.mubr.bf16.mxu0 %v928_v36 }
  0x33   : > { %634 = vmatprep.mubr.bf16.mxu1 %v930_v37 }
  0x39   : > { %586 = vmatmul.mubr.bf16.gmra.mxu0 %v932_v38 }
  0x3a   : > { %635 = vmatmul.mubr.bf16.gmra.mxu1 %v933_v39 }
  0xf1   : > { %v826_v40 = vpop.f32.mrf.mxu0 }
  0xf2   : > { %v854_v41 = vpop.f32.mrf.mxu1 }
  0xf3   : > { %v827_v43 = vpop.f32.mrf.mxu0 }
  0xf4   : > { %v828_v44 = vadd.f32 %v827_v43, %v826_v40  ;;  %v855_v45 = vpop.f32.mrf.mxu1 }
  0xf5   : > { %v829_v46 = vpop.f32.mrf.mxu0  ;;  %v856_v48 = vadd.f32 %v855_v45, %v854_v41 }
  0xf6   : > { %v580_v47 = vadd.f32 %v828_v44, %v764_v42  ;;  %v857_v49 = vpop.f32.mrf.mxu1 }
  0xf7   : > { %v830_v50 = vpop.f32.mrf.mxu0 }
  0xf8   : > { %v629_v51 = vadd.f32 %v856_v48, %v580_v47  ;;  %v831_v52 = vadd.f32 %v830_v50, %v829_v46  ;;  %v858_v53 = vpop.f32.mrf.mxu1 }
  0xf9   : > { %v832_v54 = vpop.f32.mrf.mxu0  ;;  %v859_v57 = vadd.f32 %v858_v53, %v857_v49 }
  0xfa   : > { %v643_v55 = vmax.f32 %v629_v51, 0.0  ;;  %v583_v56 = vadd.f32 %v831_v52, %v764_v42  ;;  %v860_v58 = vpop.f32.mrf.mxu1 }
  0xfb   : > { %v833_v59 = vpop.f32.mrf.mxu0 }
  0xfc   : > { %647 = vst [vmem:[%s231_s29] sm:$0xff] %v643_v55  ;;  %v632_v60 = vadd.f32 %v859_v57, %v583_v56  ;;  %v834_v61 = vadd.f32 %v833_v59, %v832_v54  ;;  %v861_v62 = vpop.f32.mrf.mxu1 }
  0xfd   : > { %v835_v63 = vpop.f32.mrf.mxu0  ;;  %v862_v2 = vadd.f32 %v861_v62, %v860_v58 }
  0xfe   : > { %v644_v0 = vmax.f32 %v632_v60, 0.0  ;;  %v588_v1 = vadd.f32 %v834_v61, %v764_v42  ;;  %v863_v3 = vpop.f32.mrf.mxu1 }
  0xff   : > { %v836_v4 = vpop.f32.mrf.mxu0 }
 0x100   : > { %648 = vst [vmem:[%s231_s29 + $0x8] sm:$0xff] %v644_v0  ;;  %v637_v5 = vadd.f32 %v862_v2, %v588_v1  ;;  %v837_v6 = vadd.f32 %v836_v4, %v835_v63  ;;  %v864_v7 = vpop.f32.mrf.mxu1 }
 0x101   : > { %v865_v10 = vadd.f32 %v864_v7, %v863_v3 }
 0x102   : > { %v645_v8 = vmax.f32 %v637_v5, 0.0  ;;  %v591_v9 = vadd.f32 %v837_v6, %v764_v42 }
 0x104   : > { %649 = vst [vmem:[%s231_s29 + $0x10] sm:$0xff] %v645_v8  ;;  %v640_v11 = vadd.f32 %v865_v10, %v591_v9 }
 0x106   : > { %v646_v12 = vmax.f32 %v640_v11, 0.0 }
 0x108   : > { %650 = vst [vmem:[%s231_s29 + $0x18] sm:$0xff] %v646_v12 }
 0x109 PF: > { %s13_s14 = sadd.s32 1, %s956_s14   ;;  %s1060_s12 = smov %s952_s13 }
 0x10a   : > { %p10_p5 = scmp.ge.s32.totalorder %s13_s14, 6   ;;  %s1061_s13 = smov %s1063_s15 }
 0x10c   :  { %12 = sbr.rel (!%p10_p5) target bundleno = 2 (0x2), region = 65 }

// kernel: vqvae_forward.17
= control target key start
LH: loop header
LB: loop body
LE: loop exit
PB: predicated region body
PF: predicated region fallthrough
CT: control target
= control target key end

     0   :  { %s933_s12 = smov 0   ;;  %s935_s13 = smov 0   ;;  %s1049_s0 = inlined_call_operand.vmem [shape: bf16[4,128,256], index: 0, kind: input, shape index: {}]   ;;  %s1050_s1 = inlined_call_operand.vmem [shape: bf16[4,256,128], index: 1, kind: input, shape index: {}]   ;;  %s1051_s2 = inlined_call_operand.vmem [shape: f32[1,128], index: 2, kind: input, shape index: {}]   ;;  %s1052_s3 = inlined_call_operand.vmem [shape: f32[4,128,128], index: 3, kind: output, shape index: {}]  }
   0x1   :  { %s937_s14 = smov 0  }
   0x2 LB: > { %s25_s15 = sadd.s32 1, %s907_s13  ;;  %p700_p0 = scmp.ge.s32.totalorder %s911_s14, 1  ;;  %s911_s14 = sphi %s937_s14, %s13_s14   ;;  %s907_s13 = sphi %s935_s13, %s1054_s13   ;;  %s903_s12 = sphi %s933_s12, %s1053_s12  }
   0x3   : > { %p27_p1 = scmp.ge.s32.totalorder %s25_s15, 4  ;;  %p169_p2 = scmp.lt.s32.totalorder %s911_s14, 5 }
   0x5   : > { %s1056_s15 = smov (%p27_p1, %s25_s15), 0  ;;  %p170_p3 = pnand %p700_p0, %p169_p2 }
   0x6   : > { %p208_p4 = scmp.lt.s32.totalorder (!%p170_p3), %s903_s12, 3 }
   0x7   : > { %173 = sbr.rel (%p170_p3) target bundleno = 278 (0x116), region = 32 }
   0xc   : > { %s1058_s12 = smov (!%p208_p4, %s903_s12), 3  ;;  %v1000_v34 = vld [vmem:[%s1051_s2] ss:$0 sm:$0xff] }
   0xd   : > { %s951_s16 = sshll.u32 %s1058_s12, 7 }
   0xe   : > { %s957_s19 = scalar_lea.vmem %s1050_s1, %s951_s16  ;;  %s972_s22 = scalar_lea.vmem %s1049_s0, %s951_s16 }
   0xf   : > { %v849_v0 = vld [vmem:[%s957_s19 + $0x78] sm:$0xff]   ;;  %v851_v2 = vld [vmem:[%s957_s19 + $0x70] sm:$0xff]   ;;  %v853_v4 = vld [vmem:[%s957_s19 + $0x68] sm:$0xff]   ;;  %s1008_s27 = scalar_lea.vmem %s1052_s3, %s951_s16 }
  0x10   : > { %v850_v1 = vld [vmem:[%s957_s19 + $0x38] sm:$0xff]   ;;  %745 = vmatprep.subr.bf16.mxu0 %v849_v0  ;;  %809 = vmatprep.subr.bf16.mxu1 %v849_v0  ;;  %v852_v3 = vld [vmem:[%s957_s19 + $0x30] sm:$0xff]   ;;  %v854_v5 = vld [vmem:[%s957_s19 + $0x28] sm:$0xff]  }
  0x11   : > { %746 = vmatpush3.bf16.msra.mxu0 %v850_v1  ;;  %817 = vmatpush3.bf16.msra.mxu1 %v850_v1  ;;  %v855_v6 = vld [vmem:[%s957_s19 + $0x60] sm:$0xff]   ;;  %v857_v8 = vld [vmem:[%s957_s19 + $0x58] sm:$0xff]   ;;  %v859_v10 = vld [vmem:[%s957_s19 + $0x50] sm:$0xff]  }
  0x12   : > { %747 = vmatprep.subr.bf16.mxu0 %v851_v2  ;;  %810 = vmatprep.subr.bf16.mxu1 %v851_v2  ;;  %v856_v7 = vld [vmem:[%s957_s19 + $0x20] sm:$0xff]   ;;  %v858_v9 = vld [vmem:[%s957_s19 + $0x18] sm:$0xff]   ;;  %v860_v13 = vld [vmem:[%s957_s19 + $0x10] sm:$0xff]  }
  0x13   : > { %v867_v11 = vld [vmem:[%s972_s22 + $0x4] ss:$8 sps:$4 sm:$0xff]   ;;  %v865_v18 = vld [vmem:[%s972_s22] ss:$8 sps:$4 sm:$0xff]   ;;  %v871_v20 = vld [vmem:[%s972_s22 + $0x14] ss:$8 sps:$4 sm:$0xff]  }
  0x14   : > { %v870_v12 = vld [vmem:[%s972_s22 + $0x44] ss:$8 sps:$4 sm:$0xff]   ;;  %497 = vmatprep.mubr.bf16.mxu0 %v867_v11  ;;  %v868_v19 = vld [vmem:[%s972_s22 + $0x40] ss:$8 sps:$4 sm:$0xff]   ;;  %v873_v21 = vld [vmem:[%s972_s22 + $0x54] ss:$8 sps:$4 sm:$0xff]  }
  0x15   : > { %748 = vmatpush3.bf16.msra.mxu0 %v852_v3  ;;  %818 = vmatpush3.bf16.msra.mxu1 %v852_v3  ;;  %v861_v14 = vld [vmem:[%s957_s19 + $0x48] sm:$0xff]   ;;  %v863_v16 = vld [vmem:[%s957_s19 + $0x40] sm:$0xff]   ;;  %v875_v22 = vld [vmem:[%s972_s22 + $0x10] ss:$8 sps:$4 sm:$0xff]  }
  0x16   : > { %749 = vmatprep.subr.bf16.mxu0 %v853_v4  ;;  %811 = vmatprep.subr.bf16.mxu1 %v853_v4  ;;  %v862_v15 = vld [vmem:[%s957_s19 + $0x8] sm:$0xff]   ;;  %v864_v17 = vld [vmem:[%s957_s19] sm:$0xff]   ;;  %v876_v23 = vld [vmem:[%s972_s22 + $0x50] ss:$8 sps:$4 sm:$0xff]  }
  0x17   : > { %529 = vmatprep.mubr.bf16.mxu1 %v870_v12  ;;  %v877_v24 = vld [vmem:[%s972_s22 + $0x24] ss:$8 sps:$4 sm:$0xff]   ;;  %v881_v26 = vld [vmem:[%s972_s22 + $0x20] ss:$8 sps:$4 sm:$0xff]   ;;  %v883_v28 = vld [vmem:[%s972_s22 + $0x34] ss:$8 sps:$4 sm:$0xff]  }
  0x18   : > { %v879_v25 = vld [vmem:[%s972_s22 + $0x64] ss:$8 sps:$4 sm:$0xff]   ;;  %v882_v27 = vld [vmem:[%s972_s22 + $0x60] ss:$8 sps:$4 sm:$0xff]   ;;  %v885_v29 = vld [vmem:[%s972_s22 + $0x74] ss:$8 sps:$4 sm:$0xff]  }
  0x19   : > { %750 = vmatpush3.bf16.msra.mxu0 %v854_v5  ;;  %819 = vmatpush3.bf16.msra.mxu1 %v854_v5  ;;  %v887_v30 = vld [vmem:[%s972_s22 + $0x30] ss:$8 sps:$4 sm:$0xff]  }
  0x1a   : > { %751 = vmatprep.subr.bf16.mxu0 %v855_v6  ;;  %812 = vmatprep.subr.bf16.mxu1 %v855_v6  ;;  %v888_v31 = vld [vmem:[%s972_s22 + $0x70] ss:$8 sps:$4 sm:$0xff]  }
  0x1d   : > { %752 = vmatpush3.bf16.msra.mxu0 %v856_v7  ;;  %820 = vmatpush3.bf16.msra.mxu1 %v856_v7 }
  0x1e   : > { %753 = vmatprep.subr.bf16.mxu0 %v857_v8  ;;  %813 = vmatprep.subr.bf16.mxu1 %v857_v8 }
  0x21   : > { %754 = vmatpush3.bf16.msra.mxu0 %v858_v9  ;;  %821 = vmatpush3.bf16.msra.mxu1 %v858_v9 }
  0x22   : > { %755 = vmatprep.subr.bf16.mxu0 %v859_v10  ;;  %814 = vmatprep.subr.bf16.mxu1 %v859_v10 }
  0x25   : > { %756 = vmatpush3.bf16.msra.mxu0 %v860_v13  ;;  %822 = vmatpush3.bf16.msra.mxu1 %v860_v13 }
  0x26   : > { %757 = vmatprep.subr.bf16.mxu0 %v861_v14  ;;  %815 = vmatprep.subr.bf16.mxu1 %v861_v14 }
  0x29   : > { %758 = vmatpush3.bf16.msra.mxu0 %v862_v15  ;;  %823 = vmatpush3.bf16.msra.mxu1 %v862_v15 }
  0x2a   : > { %759 = vmatprep.subr.bf16.mxu0 %v863_v16  ;;  %816 = vmatprep.subr.bf16.mxu1 %v863_v16 }
  0x2d   : > { %760 = vmatpush3.bf16.msra.mxu0 %v864_v17  ;;  %824 = vmatpush3.bf16.msra.mxu1 %v864_v17 }
  0x30   : > { %498 = vmatmul.mubr.bf16.vlgmr.msra.gmra.mxu0 %v865_v18  ;;  %530 = vmatmul.mubr.bf16.vlgmr.msra.gmra.mxu1 %v868_v19 }
  0x31   : > { %505 = vmatprep.mubr.bf16.mxu0 %v871_v20  ;;  %537 = vmatprep.mubr.bf16.mxu1 %v873_v21 }
  0x38   : > { %506 = vmatmul.mubr.bf16.gmra.mxu0 %v875_v22  ;;  %538 = vmatmul.mubr.bf16.gmra.mxu1 %v876_v23 }
  0x39   : > { %513 = vmatprep.mubr.bf16.mxu0 %v877_v24  ;;  %545 = vmatprep.mubr.bf16.mxu1 %v879_v25 }
  0x40   : > { %514 = vmatmul.mubr.bf16.gmra.mxu0 %v881_v26  ;;  %546 = vmatmul.mubr.bf16.gmra.mxu1 %v882_v27 }
  0x41   : > { %521 = vmatprep.mubr.bf16.mxu0 %v883_v28  ;;  %553 = vmatprep.mubr.bf16.mxu1 %v885_v29 }
  0x48   : > { %522 = vmatmul.mubr.bf16.gmra.mxu0 %v887_v30  ;;  %554 = vmatmul.mubr.bf16.gmra.mxu1 %v888_v31 }
  0xf0   : > { %v761_v32 = vpop.f32.mrf.mxu0  ;;  %v785_v33 = vpop.f32.mrf.mxu1 }
  0xf2   : > { %v762_v35 = vpop.f32.mrf.mxu0  ;;  %v786_v36 = vpop.f32.mrf.mxu1 }
  0xf3   : > { %v763_v37 = vadd.f32 %v762_v35, %v761_v32  ;;  %v787_v38 = vadd.f32 %v786_v36, %v785_v33 }
  0xf4   : > { %v764_v39 = vpop.f32.mrf.mxu0  ;;  %v788_v40 = vpop.f32.mrf.mxu1 }
  0xf5   : > { %v500_v41 = vadd.f32 %v763_v37, %v1000_v34  ;;  %v532_v42 = vadd.f32 %v787_v38, %v1000_v34 }
  0xf6   : > { %v765_v43 = vpop.f32.mrf.mxu0  ;;  %v789_v44 = vpop.f32.mrf.mxu1 }
  0xf7   : > { %v562_v45 = vmax.f32 %v500_v41, 0.0  ;;  %v570_v46 = vmax.f32 %v532_v42, 0.0  ;;  %v766_v47 = vadd.f32 %v765_v43, %v764_v39  ;;  %v790_v48 = vadd.f32 %v789_v44, %v788_v40 }
  0xf8   : > { %v767_v49 = vpop.f32.mrf.mxu0  ;;  %v791_v50 = vpop.f32.mrf.mxu1 }
  0xf9   : > { %578 = vst [vmem:[%s1008_s27] sm:$0xff] %v562_v45  ;;  %586 = vst [vmem:[%s1008_s27 + $0x40] sm:$0xff] %v570_v46  ;;  %v503_v51 = vadd.f32 %v766_v47, %v1000_v34  ;;  %v535_v52 = vadd.f32 %v790_v48, %v1000_v34 }
  0xfa   : > { %v768_v53 = vpop.f32.mrf.mxu0  ;;  %v792_v54 = vpop.f32.mrf.mxu1 }
  0xfb   : > { %v563_v55 = vmax.f32 %v503_v51, 0.0  ;;  %v571_v56 = vmax.f32 %v535_v52, 0.0  ;;  %v769_v57 = vadd.f32 %v768_v53, %v767_v49  ;;  %v793_v58 = vadd.f32 %v792_v54, %v791_v50 }
  0xfc   : > { %v770_v59 = vpop.f32.mrf.mxu0  ;;  %v794_v60 = vpop.f32.mrf.mxu1 }
  0xfd   : > { %579 = vst [vmem:[%s1008_s27 + $0x8] sm:$0xff] %v563_v55  ;;  %587 = vst [vmem:[%s1008_s27 + $0x48] sm:$0xff] %v571_v56  ;;  %v508_v61 = vadd.f32 %v769_v57, %v1000_v34  ;;  %v540_v62 = vadd.f32 %v793_v58, %v1000_v34 }
  0xfe   : > { %v771_v63 = vpop.f32.mrf.mxu0  ;;  %v795_v0 = vpop.f32.mrf.mxu1 }
  0xff   : > { %v564_v1 = vmax.f32 %v508_v61, 0.0  ;;  %v572_v2 = vmax.f32 %v540_v62, 0.0  ;;  %v772_v3 = vadd.f32 %v771_v63, %v770_v59  ;;  %v796_v4 = vadd.f32 %v795_v0, %v794_v60 }
 0x100   : > { %v773_v5 = vpop.f32.mrf.mxu0  ;;  %v797_v6 = vpop.f32.mrf.mxu1 }
 0x101   : > { %580 = vst [vmem:[%s1008_s27 + $0x10] sm:$0xff] %v564_v1  ;;  %588 = vst [vmem:[%s1008_s27 + $0x50] sm:$0xff] %v572_v2  ;;  %v511_v7 = vadd.f32 %v772_v3, %v1000_v34  ;;  %v543_v8 = vadd.f32 %v796_v4, %v1000_v34 }
 0x102   : > { %v774_v9 = vpop.f32.mrf.mxu0  ;;  %v798_v10 = vpop.f32.mrf.mxu1 }
 0x103   : > { %v565_v11 = vmax.f32 %v511_v7, 0.0  ;;  %v573_v12 = vmax.f32 %v543_v8, 0.0  ;;  %v775_v13 = vadd.f32 %v774_v9, %v773_v5  ;;  %v799_v14 = vadd.f32 %v798_v10, %v797_v6 }
 0x104   : > { %v776_v15 = vpop.f32.mrf.mxu0  ;;  %v800_v16 = vpop.f32.mrf.mxu1 }
 0x105   : > { %581 = vst [vmem:[%s1008_s27 + $0x18] sm:$0xff] %v565_v11  ;;  %589 = vst [vmem:[%s1008_s27 + $0x58] sm:$0xff] %v573_v12  ;;  %v516_v17 = vadd.f32 %v775_v13, %v1000_v34  ;;  %v548_v18 = vadd.f32 %v799_v14, %v1000_v34 }
 0x106   : > { %v777_v19 = vpop.f32.mrf.mxu0  ;;  %v801_v20 = vpop.f32.mrf.mxu1 }
 0x107   : > { %v566_v21 = vmax.f32 %v516_v17, 0.0  ;;  %v574_v22 = vmax.f32 %v548_v18, 0.0  ;;  %v778_v23 = vadd.f32 %v777_v19, %v776_v15  ;;  %v802_v24 = vadd.f32 %v801_v20, %v800_v16 }
 0x108   : > { %v779_v25 = vpop.f32.mrf.mxu0  ;;  %v803_v26 = vpop.f32.mrf.mxu1 }
 0x109   : > { %582 = vst [vmem:[%s1008_s27 + $0x20] sm:$0xff] %v566_v21  ;;  %590 = vst [vmem:[%s1008_s27 + $0x60] sm:$0xff] %v574_v22  ;;  %v519_v27 = vadd.f32 %v778_v23, %v1000_v34  ;;  %v551_v28 = vadd.f32 %v802_v24, %v1000_v34 }
 0x10a   : > { %v780_v29 = vpop.f32.mrf.mxu0  ;;  %v804_v30 = vpop.f32.mrf.mxu1 }
 0x10b   : > { %v567_v31 = vmax.f32 %v519_v27, 0.0  ;;  %v575_v32 = vmax.f32 %v551_v28, 0.0  ;;  %v781_v33 = vadd.f32 %v780_v29, %v779_v25  ;;  %v805_v35 = vadd.f32 %v804_v30, %v803_v26 }
 0x10c   : > { %v782_v36 = vpop.f32.mrf.mxu0  ;;  %v806_v37 = vpop.f32.mrf.mxu1 }
 0x10d   : > { %583 = vst [vmem:[%s1008_s27 + $0x28] sm:$0xff] %v567_v31  ;;  %591 = vst [vmem:[%s1008_s27 + $0x68] sm:$0xff] %v575_v32  ;;  %v524_v38 = vadd.f32 %v781_v33, %v1000_v34  ;;  %v556_v39 = vadd.f32 %v805_v35, %v1000_v34 }
 0x10e   : > { %v783_v40 = vpop.f32.mrf.mxu0  ;;  %v807_v41 = vpop.f32.mrf.mxu1 }
 0x10f   : > { %v568_v42 = vmax.f32 %v524_v38, 0.0  ;;  %v576_v43 = vmax.f32 %v556_v39, 0.0  ;;  %v784_v44 = vadd.f32 %v783_v40, %v782_v36  ;;  %v808_v45 = vadd.f32 %v807_v41, %v806_v37 }
 0x111   : > { %584 = vst [vmem:[%s1008_s27 + $0x30] sm:$0xff] %v568_v42  ;;  %592 = vst [vmem:[%s1008_s27 + $0x70] sm:$0xff] %v576_v43  ;;  %v527_v46 = vadd.f32 %v784_v44, %v1000_v34  ;;  %v559_v47 = vadd.f32 %v808_v45, %v1000_v34 }
 0x113   : > { %v569_v48 = vmax.f32 %v527_v46, 0.0  ;;  %v577_v49 = vmax.f32 %v559_v47, 0.0 }
 0x115   : > { %585 = vst [vmem:[%s1008_s27 + $0x38] sm:$0xff] %v569_v48  ;;  %593 = vst [vmem:[%s1008_s27 + $0x78] sm:$0xff] %v577_v49 }
 0x116 PF: > { %s13_s14 = sadd.s32 1, %s911_s14   ;;  %s1053_s12 = smov %s907_s13 }
 0x117   : > { %p10_p5 = scmp.ge.s32.totalorder %s13_s14, 6   ;;  %s1054_s13 = smov %s1056_s15 }
 0x119   :  { %12 = sbr.rel (!%p10_p5) target bundleno = 2 (0x2), region = 65 }

// kernel: vqvae_forward.18
= control target key start
LH: loop header
LB: loop body
LE: loop exit
PB: predicated region body
PF: predicated region fallthrough
CT: control target
= control target key end

     0   :  { %s1330_s12 = smov 0   ;;  %s1332_s13 = smov 0   ;;  %s1487_s0 = inlined_call_operand.vmem [shape: bf16[4,512,128], index: 0, kind: input, shape index: {}]   ;;  %s1488_s1 = inlined_call_operand.vmem [shape: bf16[4,128,128], index: 1, kind: input, shape index: {}]   ;;  %s1489_s2 = inlined_call_operand.vmem [shape: f32[1,128], index: 2, kind: input, shape index: {}]   ;;  %s1490_s3 = inlined_call_operand.vmem [shape: f32[4,512,128], index: 3, kind: output, shape index: {}]  }
   0x1   :  { %s1334_s14 = smov 0   ;;  %s1336_s15 = smov 0  }
   0x2   :  { %s1338_s16 = smov 0  }
   0x3 LB: > { %s22_s17 = sadd.s32 1, %s1300_s14  ;;  %s25_s18 = sadd.s32 1, %s1304_s15  ;;  %s1308_s16 = sphi %s1338_s16, %s13_s16   ;;  %s1304_s15 = sphi %s1336_s15, %s1494_s15   ;;  %s1300_s14 = sphi %s1334_s14, %s1493_s14   ;;  %s1296_s13 = sphi %s1332_s13, %s1492_s13   ;;  %s1292_s12 = sphi %s1330_s12, %s1491_s12  }
   0x4   : > { %p23_p0 = scmp.ge.s32.totalorder %s22_s17, 2  ;;  %p921_p1 = scmp.ge.s32.totalorder %s1308_s16, 1 }
   0x5   : > { %p168_p2 = scmp.lt.s32.totalorder %s1308_s16, 9 }
   0x6   : > { %s1496_s17 = smov (%p23_p0, %s22_s17), 0  ;;  %s1498_s18 = smov (!%p23_p0, %s25_s18), %s1304_s15 }
   0x7   : > { %p169_p3 = pnand %p921_p1, %p168_p2  ;;  %p27_p4 = scmp.ge.s32.totalorder %s1498_s18, 4 }
   0x8   : > { %s922_s19 = sshll.u32 (!%p169_p3), %s1292_s12, 5  ;;  %p206_p5 = scmp.lt.s32.totalorder (!%p169_p3), %s1296_s13, 3 }
   0x9   : > { %s1500_s18 = smov (%p27_p4, %s1498_s18), 0  ;;  %172 = sbr.rel (%p169_p3) target bundleno = 325 (0x145), region = 32 }
   0xa   : > { %p208_p6 = scmp.lt.s32.totalorder (!%p169_p3), %s922_s19, 63 }
   0xe   : > { %s1502_s13 = smov (!%p206_p5, %s1296_s13), 3  ;;  %s1504_s19 = smov (!%p208_p6, %s922_s19), 63  ;;  %v1400_v24 = vld [vmem:[%s1489_s2] ss:$0 sm:$0xff] }
   0xf   : > { %s923_s20 = sshll.u32 %s1502_s13, 6 }
  0x10   : > { %s1363_s23 = scalar_lea.vmem %s1488_s1, %s923_s20  ;;  %s1365_s24 = sadd.s32 %s923_s20, %s1504_s19 }
  0x11   : > { %v1118_v0 = vld [vmem:[%s1363_s23 + $0x38] sm:$0xff]   ;;  %v1119_v1 = vld [vmem:[%s1363_s23 + $0x30] sm:$0xff]   ;;  %s924_s25 = sshll.u32 %s1365_s24, 2  ;;  %v1120_v2 = vld [vmem:[%s1363_s23 + $0x28] sm:$0xff]   ;;  %s929_s4 = sshll.u32 %s1365_s24, 3 }
  0x12   : > { %1014 = vmatprep.subr.bf16.mxu0 %v1118_v0  ;;  %1062 = vmatprep.subr.bf16.mxu1 %v1118_v0  ;;  %s1374_s28 = scalar_lea.vmem %s1487_s0, %s924_s25  ;;  %v1121_v3 = vld [vmem:[%s1363_s23 + $0x20] sm:$0xff]   ;;  %v1122_v6 = vld [vmem:[%s1363_s23 + $0x18] sm:$0xff]   ;;  %v1123_v7 = vld [vmem:[%s1363_s23 + $0x10] sm:$0xff]   ;;  %s1425_s7 = scalar_lea.vmem %s1490_s3, %s929_s4 }
  0x13   : > { %1015 = vmatpush3.bf16.msra.mxu0 %v1118_v0  ;;  %1070 = vmatpush3.bf16.msra.mxu1 %v1118_v0  ;;  %v1126_v4 = vld [vmem:[%s1374_s28] sm:$0xff]   ;;  %v1124_v8 = vld [vmem:[%s1363_s23 + $0x8] sm:$0xff]   ;;  %v1130_v12 = vld [vmem:[%s1374_s28 + $0x10] sm:$0xff]  }
  0x14   : > { %1016 = vmatprep.subr.bf16.mxu0 %v1119_v1  ;;  %1063 = vmatprep.subr.bf16.mxu1 %v1119_v1  ;;  %v1127_v5 = vld [vmem:[%s1374_s28 + $0x40] sm:$0xff]   ;;  %v1128_v10 = vld [vmem:[%s1374_s28 + $0x8] sm:$0xff]   ;;  %v1131_v13 = vld [vmem:[%s1374_s28 + $0x50] sm:$0xff]  }
  0x15   : > { %1030 = vmatprep.mubr.bf16.mxu0 %v1126_v4  ;;  %1046 = vmatprep.mubr.bf16.mxu1 %v1127_v5  ;;  %v1125_v9 = vld [vmem:[%s1363_s23] sm:$0xff]   ;;  %v1129_v11 = vld [vmem:[%s1374_s28 + $0x48] sm:$0xff]   ;;  %v1132_v14 = vld [vmem:[%s1374_s28 + $0x18] sm:$0xff]  }
  0x16   : > { %v1133_v15 = vld [vmem:[%s1374_s28 + $0x58] sm:$0xff]   ;;  %v1134_v16 = vld [vmem:[%s1374_s28 + $0x20] sm:$0xff]   ;;  %v1136_v18 = vld [vmem:[%s1374_s28 + $0x28] sm:$0xff]  }
  0x17   : > { %1017 = vmatpush3.bf16.msra.mxu0 %v1119_v1  ;;  %1071 = vmatpush3.bf16.msra.mxu1 %v1119_v1  ;;  %v1135_v17 = vld [vmem:[%s1374_s28 + $0x60] sm:$0xff]   ;;  %v1137_v19 = vld [vmem:[%s1374_s28 + $0x68] sm:$0xff]   ;;  %v1138_v20 = vld [vmem:[%s1374_s28 + $0x30] sm:$0xff]  }
  0x18   : > { %1018 = vmatprep.subr.bf16.mxu0 %v1120_v2  ;;  %1064 = vmatprep.subr.bf16.mxu1 %v1120_v2  ;;  %v1139_v21 = vld [vmem:[%s1374_s28 + $0x70] sm:$0xff]   ;;  %v1140_v22 = vld [vmem:[%s1374_s28 + $0x38] sm:$0xff]  }
  0x19   : > { %v1141_v23 = vld [vmem:[%s1374_s28 + $0x78] sm:$0xff]  }
  0x1b   : > { %1019 = vmatpush3.bf16.msra.mxu0 %v1120_v2  ;;  %1072 = vmatpush3.bf16.msra.mxu1 %v1120_v2 }
  0x1c   : > { %1020 = vmatprep.subr.bf16.mxu0 %v1121_v3  ;;  %1065 = vmatprep.subr.bf16.mxu1 %v1121_v3 }
  0x1f   : > { %1021 = vmatpush3.bf16.msra.mxu0 %v1121_v3  ;;  %1073 = vmatpush3.bf16.msra.mxu1 %v1121_v3 }
  0x20   : > { %1022 = vmatprep.subr.bf16.mxu0 %v1122_v6  ;;  %1066 = vmatprep.subr.bf16.mxu1 %v1122_v6 }
  0x23   : > { %1023 = vmatpush3.bf16.msra.mxu0 %v1122_v6  ;;  %1074 = vmatpush3.bf16.msra.mxu1 %v1122_v6 }
  0x24   : > { %1024 = vmatprep.subr.bf16.mxu0 %v1123_v7  ;;  %1067 = vmatprep.subr.bf16.mxu1 %v1123_v7 }
  0x27   : > { %1025 = vmatpush3.bf16.msra.mxu0 %v1123_v7  ;;  %1075 = vmatpush3.bf16.msra.mxu1 %v1123_v7 }
  0x28   : > { %1026 = vmatprep.subr.bf16.mxu0 %v1124_v8  ;;  %1068 = vmatprep.subr.bf16.mxu1 %v1124_v8 }
  0x2b   : > { %1027 = vmatpush3.bf16.msra.mxu0 %v1124_v8  ;;  %1076 = vmatpush3.bf16.msra.mxu1 %v1124_v8 }
  0x2c   : > { %1028 = vmatprep.subr.bf16.mxu0 %v1125_v9  ;;  %1069 = vmatprep.subr.bf16.mxu1 %v1125_v9 }
  0x2f   : > { %1029 = vmatpush3.bf16.msra.mxu0 %v1125_v9  ;;  %1077 = vmatpush3.bf16.msra.mxu1 %v1125_v9 }
  0x32   : > { %1031 = vmatmul.mubr.bf16.vlgmr.msra.gmra.mxu0 %v1128_v10  ;;  %1047 = vmatmul.mubr.bf16.vlgmr.msra.gmra.mxu1 %v1129_v11 }
  0x33   : > { %1034 = vmatprep.mubr.bf16.mxu0 %v1130_v12  ;;  %1050 = vmatprep.mubr.bf16.mxu1 %v1131_v13 }
  0x3a   : > { %1035 = vmatmul.mubr.bf16.gmra.mxu0 %v1132_v14  ;;  %1051 = vmatmul.mubr.bf16.gmra.mxu1 %v1133_v15 }
  0x3b   : > { %1038 = vmatprep.mubr.bf16.mxu0 %v1134_v16  ;;  %1054 = vmatprep.mubr.bf16.mxu1 %v1135_v17 }
  0x42   : > { %1039 = vmatmul.mubr.bf16.gmra.mxu0 %v1136_v18  ;;  %1055 = vmatmul.mubr.bf16.gmra.mxu1 %v1137_v19 }
  0x43   : > { %1042 = vmatprep.mubr.bf16.mxu0 %v1138_v20  ;;  %1058 = vmatprep.mubr.bf16.mxu1 %v1139_v21 }
  0x4a   : > { %1043 = vmatmul.mubr.bf16.gmra.mxu0 %v1140_v22  ;;  %1059 = vmatmul.mubr.bf16.gmra.mxu1 %v1141_v23 }
  0xf2   : > { %v1032_v25 = vpop.f32.mrf.mxu0  ;;  %v1048_v26 = vpop.f32.mrf.mxu1 }
  0xf3   : > { %v473_v27 = vadd.f32 %v1032_v25, %v1400_v24  ;;  %v537_v28 = vadd.f32 %v1048_v26, %v1400_v24 }
  0xf4   : > { %v464_v29 = vpop.f32.mrf.mxu0  ;;  %v528_v30 = vpop.f32.mrf.mxu1 }
  0xf5   : > { %v957_v31 = vmul.f32 -1.442695, %v473_v27  ;;  %v973_v32 = vmul.f32 -1.442695, %v537_v28  ;;  %v465_v33 = vadd.f32 %v1400_v24, %v464_v29  ;;  %v529_v34 = vadd.f32 %v1400_v24, %v528_v30 }
  0xf6   : > { %v1033_v35 = vpop.f32.mrf.mxu0  ;;  %v1049_v36 = vpop.f32.mrf.mxu1 }
  0xf7   : > { %1142 = vpow2.f32 %v957_v31  ;;  %v955_v37 = vmul.f32 -1.442695, %v465_v33  ;;  %v971_v38 = vmul.f32 -1.442695, %v529_v34  ;;  %v476_v39 = vadd.f32 %v1033_v35, %v1400_v24 }
  0xf8   : > { %1144 = vpow2.f32 %v973_v32  ;;  %v540_v40 = vadd.f32 %v1049_v36, %v1400_v24  ;;  %v467_v41 = vpop.f32.mrf.mxu0  ;;  %v531_v42 = vpop.f32.mrf.mxu1 }
  0xf9   : > { %1146 = vpow2.f32 %v955_v37  ;;  %v958_v43 = vmul.f32 -1.442695, %v476_v39  ;;  %v468_v44 = vadd.f32 %v1400_v24, %v467_v41  ;;  %v532_v45 = vadd.f32 %v1400_v24, %v531_v42 }
  0xfa   : > { %1148 = vpow2.f32 %v971_v38  ;;  %v974_v46 = vmul.f32 -1.442695, %v540_v40  ;;  %v1036_v47 = vpop.f32.mrf.mxu0  ;;  %v1052_v48 = vpop.f32.mrf.mxu1 }
  0xfb   : > { %1150 = vpow2.f32 %v958_v43  ;;  %v956_v49 = vmul.f32 -1.442695, %v468_v44  ;;  %v972_v50 = vmul.f32 -1.442695, %v532_v45  ;;  %v489_v51 = vadd.f32 %v1036_v47, %v1400_v24 }
  0xfc   : > { %1152 = vpow2.f32 %v974_v46  ;;  %v553_v52 = vadd.f32 %v1052_v48, %v1400_v24  ;;  %v480_v53 = vpop.f32.mrf.mxu0  ;;  %v544_v54 = vpop.f32.mrf.mxu1 }
  0xfd   : > { %1154 = vpow2.f32 %v956_v49  ;;  %v961_v55 = vmul.f32 -1.442695, %v489_v51  ;;  %v481_v56 = vadd.f32 %v1400_v24, %v480_v53  ;;  %v545_v57 = vadd.f32 %v1400_v24, %v544_v54 }
  0xfe   : > { %1156 = vpow2.f32 %v972_v50  ;;  %v977_v58 = vmul.f32 -1.442695, %v553_v52  ;;  %v1037_v59 = vpop.f32.mrf.mxu0  ;;  %v1053_v60 = vpop.f32.mrf.mxu1 }
  0xff   : > { %1158 = vpow2.f32 %v961_v55  ;;  %v959_v61 = vmul.f32 -1.442695, %v481_v56  ;;  %v975_v62 = vmul.f32 -1.442695, %v545_v57  ;;  %v492_v63 = vadd.f32 %v1037_v59, %v1400_v24 }
 0x100   : > { %1160 = vpow2.f32 %v977_v58  ;;  %v556_v0 = vadd.f32 %v1053_v60, %v1400_v24  ;;  %v483_v1 = vpop.f32.mrf.mxu0  ;;  %v547_v2 = vpop.f32.mrf.mxu1 }
 0x101   : > { %1162 = vpow2.f32 %v959_v61  ;;  %v962_v3 = vmul.f32 -1.442695, %v492_v63  ;;  %v484_v4 = vadd.f32 %v1400_v24, %v483_v1  ;;  %v548_v5 = vadd.f32 %v1400_v24, %v547_v2 }
 0x102   : > { %1164 = vpow2.f32 %v975_v62  ;;  %v978_v6 = vmul.f32 -1.442695, %v556_v0  ;;  %v1040_v7 = vpop.f32.mrf.mxu0  ;;  %v1056_v8 = vpop.f32.mrf.mxu1 }
 0x103   : > { %1166 = vpow2.f32 %v962_v3  ;;  %v960_v9 = vmul.f32 -1.442695, %v484_v4  ;;  %v976_v10 = vmul.f32 -1.442695, %v548_v5  ;;  %v505_v42 = vadd.f32 %v1040_v7, %v1400_v24 }
 0x104   : > { %v1143_v11 = vpop.eup %1142  ;;  %1168 = vpow2.f32 %v978_v6  ;;  %v496_v12 = vpop.f32.mrf.mxu0  ;;  %v569_v46 = vadd.f32 %v1056_v8, %v1400_v24 }
 0x105   : > { %v560_v13 = vpop.f32.mrf.mxu1  ;;  %v1145_v14 = vpop.eup %1144  ;;  %v689_v15 = vadd.f32 1.0, %v1143_v11  ;;  %1170 = vpow2.f32 %v960_v9  ;;  %v497_v49 = vadd.f32 %v1400_v24, %v496_v12  ;;  %v965_v56 = vmul.f32 -1.442695, %v505_v42 }
 0x106   : > { %v1147_v16 = vpop.eup %1146  ;;  %v705_v17 = vadd.f32 1.0, %v1145_v14  ;;  %1172 = vpow2.f32 %v976_v10  ;;  %v1041_v18 = vpop.f32.mrf.mxu0  ;;  %v561_v52 = vadd.f32 %v1400_v24, %v560_v13  ;;  %v981_v61 = vmul.f32 -1.442695, %v569_v46 }
 0x107   : > { %v1149_v19 = vpop.eup %1148  ;;  %1174 = vrcp.f32 %v689_v15  ;;  %v687_v20 = vadd.f32 1.0, %v1147_v16  ;;  %v1057_v21 = vpop.f32.mrf.mxu1  ;;  %v508_v57 = vadd.f32 %v1041_v18, %v1400_v24  ;;  %v963_v0 = vmul.f32 -1.442695, %v497_v49 }
 0x108   : > { %v1151_v22 = vpop.eup %1150  ;;  %1176 = vrcp.f32 %v705_v17  ;;  %v703_v23 = vadd.f32 1.0, %v1149_v19  ;;  %v499_v29 = vpop.f32.mrf.mxu0  ;;  %v572_v62 = vadd.f32 %v1057_v21, %v1400_v24  ;;  %v979_v3 = vmul.f32 -1.442695, %v561_v52 }
 0x109   : > { %v1153_v25 = vpop.eup %1152  ;;  %1178 = vrcp.f32 %v687_v20  ;;  %v690_v26 = vadd.f32 1.0, %v1151_v22  ;;  %v563_v32 = vpop.f32.mrf.mxu1  ;;  %v500_v1 = vadd.f32 %v1400_v24, %v499_v29  ;;  %v966_v7 = vmul.f32 -1.442695, %v508_v57 }
 0x10a   : > { %v1155_v27 = vpop.eup %1154  ;;  %1180 = vrcp.f32 %v703_v23  ;;  %v706_v28 = vadd.f32 1.0, %v1153_v25  ;;  %v1044_v39 = vpop.f32.mrf.mxu0  ;;  %v564_v4 = vadd.f32 %v1400_v24, %v563_v32  ;;  %v982_v11 = vmul.f32 -1.442695, %v572_v62 }
 0x10b   : > { %v1157_v30 = vpop.eup %1156  ;;  %1182 = vrcp.f32 %v690_v26  ;;  %v688_v31 = vadd.f32 1.0, %v1155_v27  ;;  %v1060_v43 = vpop.f32.mrf.mxu1  ;;  %v521_v8 = vadd.f32 %v1044_v39, %v1400_v24  ;;  %v964_v14 = vmul.f32 -1.442695, %v500_v1 }
 0x10c   : > { %v1159_v33 = vpop.eup %1158  ;;  %1184 = vrcp.f32 %v706_v28  ;;  %v704_v34 = vadd.f32 1.0, %v1157_v30  ;;  %v512_v53 = vpop.f32.mrf.mxu0  ;;  %v585_v12 = vadd.f32 %v1060_v43, %v1400_v24  ;;  %v980_v17 = vmul.f32 -1.442695, %v564_v4 }
 0x10d   : > { %v1161_v35 = vpop.eup %1160  ;;  %1186 = vrcp.f32 %v688_v31  ;;  %v693_v36 = vadd.f32 1.0, %v1159_v33  ;;  %v576_v58 = vpop.f32.mrf.mxu1  ;;  %v513_v15 = vadd.f32 %v1400_v24, %v512_v53  ;;  %v969_v21 = vmul.f32 -1.442695, %v521_v8 }
 0x10e   : > { %v1163_v37 = vpop.eup %1162  ;;  %1188 = vrcp.f32 %v704_v34  ;;  %v709_v38 = vadd.f32 1.0, %v1161_v35  ;;  %v1045_v5 = vpop.f32.mrf.mxu0  ;;  %v577_v18 = vadd.f32 %v1400_v24, %v576_v58  ;;  %v985_v26 = vmul.f32 -1.442695, %v585_v12 }
 0x10f   : > { %v1165_v40 = vpop.eup %1164  ;;  %1190 = vrcp.f32 %v693_v36  ;;  %v691_v41 = vadd.f32 1.0, %v1163_v37  ;;  %v1061_v9 = vpop.f32.mrf.mxu1  ;;  %v524_v22 = vadd.f32 %v1045_v5, %v1400_v24  ;;  %v967_v29 = vmul.f32 -1.442695, %v513_v15 }
 0x110   : > { %v1167_v44 = vpop.eup %1166  ;;  %1192 = vrcp.f32 %v709_v38  ;;  %v707_v45 = vadd.f32 1.0, %v1165_v40  ;;  %v515_v19 = vpop.f32.mrf.mxu0  ;;  %v588_v27 = vadd.f32 %v1061_v9, %v1400_v24  ;;  %v983_v32 = vmul.f32 -1.442695, %v577_v18 }
 0x111   : > { %v1169_v47 = vpop.eup %1168  ;;  %1194 = vrcp.f32 %v691_v41  ;;  %v694_v48 = vadd.f32 1.0, %v1167_v44  ;;  %v579_v23 = vpop.f32.mrf.mxu1  ;;  %v516_v30 = vadd.f32 %v1400_v24, %v515_v19  ;;  %v970_v35 = vmul.f32 -1.442695, %v524_v22 }
 0x112   : > { %v1171_v50 = vpop.eup %1170  ;;  %1196 = vrcp.f32 %v707_v45  ;;  %v710_v51 = vadd.f32 1.0, %v1169_v47  ;;  %v580_v33 = vadd.f32 %v1400_v24, %v579_v23  ;;  %v986_v37 = vmul.f32 -1.442695, %v588_v27 }
 0x113   : > { %v1173_v54 = vpop.eup %1172  ;;  %1198 = vrcp.f32 %v694_v48  ;;  %v692_v55 = vadd.f32 1.0, %v1171_v50  ;;  %v968_v39 = vmul.f32 -1.442695, %v516_v30 }
 0x114   : > { %v1175_v59 = vpop.eup %1174  ;;  %1200 = vrcp.f32 %v710_v51  ;;  %v708_v60 = vadd.f32 1.0, %v1173_v54  ;;  %v984_v41 = vmul.f32 -1.442695, %v580_v33 }
 0x115   : > { %v1177_v63 = vpop.eup %1176  ;;  %785 = vst [vmem:[%s1425_s7 + $0x10] sm:$0xff] %v1175_v59  ;;  %1202 = vrcp.f32 %v692_v55 }
 0x116   : > { %v1179_v2 = vpop.eup %1178  ;;  %801 = vst [vmem:[%s1425_s7 + $0x90] sm:$0xff] %v1177_v63  ;;  %1204 = vrcp.f32 %v708_v60 }
 0x117   : > { %v1181_v6 = vpop.eup %1180  ;;  %783 = vst [vmem:[%s1425_s7] sm:$0xff] %v1179_v2  ;;  %1206 = vpow2.f32 %v965_v56 }
 0x118   : > { %v1183_v10 = vpop.eup %1182  ;;  %799 = vst [vmem:[%s1425_s7 + $0x80] sm:$0xff] %v1181_v6  ;;  %1208 = vpow2.f32 %v981_v61 }
 0x119   : > { %v1185_v13 = vpop.eup %1184  ;;  %786 = vst [vmem:[%s1425_s7 + $0x18] sm:$0xff] %v1183_v10  ;;  %1210 = vpow2.f32 %v963_v0 }
 0x11a   : > { %v1187_v16 = vpop.eup %1186  ;;  %802 = vst [vmem:[%s1425_s7 + $0x98] sm:$0xff] %v1185_v13  ;;  %1212 = vpow2.f32 %v979_v3 }
 0x11b   : > { %v1189_v20 = vpop.eup %1188  ;;  %784 = vst [vmem:[%s1425_s7 + $0x8] sm:$0xff] %v1187_v16  ;;  %1214 = vpow2.f32 %v966_v7 }
 0x11c   : > { %v1191_v25 = vpop.eup %1190  ;;  %800 = vst [vmem:[%s1425_s7 + $0x88] sm:$0xff] %v1189_v20  ;;  %1216 = vpow2.f32 %v982_v11 }
 0x11d   : > { %v1193_v28 = vpop.eup %1192  ;;  %789 = vst [vmem:[%s1425_s7 + $0x30] sm:$0xff] %v1191_v25  ;;  %1218 = vpow2.f32 %v964_v14 }
 0x11e   : > { %v1195_v31 = vpop.eup %1194  ;;  %805 = vst [vmem:[%s1425_s7 + $0xb0] sm:$0xff] %v1193_v28  ;;  %1220 = vpow2.f32 %v980_v17 }
 0x11f   : > { %v1197_v34 = vpop.eup %1196  ;;  %787 = vst [vmem:[%s1425_s7 + $0x20] sm:$0xff] %v1195_v31  ;;  %1222 = vpow2.f32 %v969_v21 }
 0x120   : > { %v1199_v36 = vpop.eup %1198  ;;  %803 = vst [vmem:[%s1425_s7 + $0xa0] sm:$0xff] %v1197_v34  ;;  %1224 = vpow2.f32 %v985_v26 }
 0x121   : > { %v1201_v38 = vpop.eup %1200  ;;  %790 = vst [vmem:[%s1425_s7 + $0x38] sm:$0xff] %v1199_v36  ;;  %1226 = vpow2.f32 %v967_v29 }
 0x122   : > { %v1203_v40 = vpop.eup %1202  ;;  %806 = vst [vmem:[%s1425_s7 + $0xb8] sm:$0xff] %v1201_v38  ;;  %1228 = vpow2.f32 %v983_v32 }
 0x123   : > { %v1205_v42 = vpop.eup %1204  ;;  %788 = vst [vmem:[%s1425_s7 + $0x28] sm:$0xff] %v1203_v40  ;;  %1230 = vpow2.f32 %v970_v35 }
 0x124   : > { %v1207_v24 = vpop.eup %1206  ;;  %804 = vst [vmem:[%s1425_s7 + $0xa8] sm:$0xff] %v1205_v42  ;;  %1232 = vpow2.f32 %v986_v37 }
 0x125   : > { %v1209_v43 = vpop.eup %1208  ;;  %v697_v44 = vadd.f32 1.0, %v1207_v24  ;;  %1234 = vpow2.f32 %v968_v39 }
 0x126   : > { %v1211_v45 = vpop.eup %1210  ;;  %v713_v46 = vadd.f32 1.0, %v1209_v43  ;;  %1236 = vpow2.f32 %v984_v41 }
 0x127   : > { %v1213_v47 = vpop.eup %1212  ;;  %1238 = vrcp.f32 %v697_v44  ;;  %v695_v48 = vadd.f32 1.0, %v1211_v45 }
 0x128   : > { %v1215_v49 = vpop.eup %1214  ;;  %1240 = vrcp.f32 %v713_v46  ;;  %v711_v50 = vadd.f32 1.0, %v1213_v47 }
 0x129   : > { %v1217_v51 = vpop.eup %1216  ;;  %1242 = vrcp.f32 %v695_v48  ;;  %v698_v52 = vadd.f32 1.0, %v1215_v49 }
 0x12a   : > { %v1219_v53 = vpop.eup %1218  ;;  %1244 = vrcp.f32 %v711_v50  ;;  %v714_v54 = vadd.f32 1.0, %v1217_v51 }
 0x12b   : > { %v1221_v55 = vpop.eup %1220  ;;  %1246 = vrcp.f32 %v698_v52  ;;  %v696_v56 = vadd.f32 1.0, %v1219_v53 }
 0x12c   : > { %v1223_v57 = vpop.eup %1222  ;;  %1248 = vrcp.f32 %v714_v54  ;;  %v712_v58 = vadd.f32 1.0, %v1221_v55 }
 0x12d   : > { %v1225_v59 = vpop.eup %1224  ;;  %1250 = vrcp.f32 %v696_v56  ;;  %v701_v60 = vadd.f32 1.0, %v1223_v57 }
 0x12e   : > { %v1227_v61 = vpop.eup %1226  ;;  %1252 = vrcp.f32 %v712_v58  ;;  %v717_v62 = vadd.f32 1.0, %v1225_v59 }
 0x12f   : > { %v1229_v63 = vpop.eup %1228  ;;  %1254 = vrcp.f32 %v701_v60  ;;  %v699_v0 = vadd.f32 1.0, %v1227_v61 }
 0x130   : > { %v1231_v1 = vpop.eup %1230  ;;  %1256 = vrcp.f32 %v717_v62  ;;  %v715_v2 = vadd.f32 1.0, %v1229_v63 }
 0x131   : > { %v1233_v3 = vpop.eup %1232  ;;  %1258 = vrcp.f32 %v699_v0  ;;  %v702_v4 = vadd.f32 1.0, %v1231_v1 }
 0x132   : > { %v1235_v5 = vpop.eup %1234  ;;  %1260 = vrcp.f32 %v715_v2  ;;  %v718_v6 = vadd.f32 1.0, %v1233_v3 }
 0x133   : > { %v1237_v7 = vpop.eup %1236  ;;  %1262 = vrcp.f32 %v702_v4  ;;  %v700_v8 = vadd.f32 1.0, %v1235_v5 }
 0x134   : > { %v1239_v9 = vpop.eup %1238  ;;  %1264 = vrcp.f32 %v718_v6  ;;  %v716_v10 = vadd.f32 1.0, %v1237_v7 }
 0x135   : > { %v1241_v11 = vpop.eup %1240  ;;  %793 = vst [vmem:[%s1425_s7 + $0x50] sm:$0xff] %v1239_v9  ;;  %1266 = vrcp.f32 %v700_v8 }
 0x136   : > { %v1243_v12 = vpop.eup %1242  ;;  %809 = vst [vmem:[%s1425_s7 + $0xd0] sm:$0xff] %v1241_v11  ;;  %1268 = vrcp.f32 %v716_v10 }
 0x137   : > { %v1245_v13 = vpop.eup %1244  ;;  %791 = vst [vmem:[%s1425_s7 + $0x40] sm:$0xff] %v1243_v12 }
 0x138   : > { %v1247_v14 = vpop.eup %1246  ;;  %807 = vst [vmem:[%s1425_s7 + $0xc0] sm:$0xff] %v1245_v13 }
 0x139   : > { %v1249_v15 = vpop.eup %1248  ;;  %794 = vst [vmem:[%s1425_s7 + $0x58] sm:$0xff] %v1247_v14 }
 0x13a   : > { %v1251_v16 = vpop.eup %1250  ;;  %810 = vst [vmem:[%s1425_s7 + $0xd8] sm:$0xff] %v1249_v15 }
 0x13b   : > { %v1253_v17 = vpop.eup %1252  ;;  %792 = vst [vmem:[%s1425_s7 + $0x48] sm:$0xff] %v1251_v16 }
 0x13c   : > { %v1255_v18 = vpop.eup %1254  ;;  %808 = vst [vmem:[%s1425_s7 + $0xc8] sm:$0xff] %v1253_v17 }
 0x13d   : > { %v1257_v19 = vpop.eup %1256  ;;  %797 = vst [vmem:[%s1425_s7 + $0x70] sm:$0xff] %v1255_v18 }
 0x13e   : > { %v1259_v20 = vpop.eup %1258  ;;  %813 = vst [vmem:[%s1425_s7 + $0xf0] sm:$0xff] %v1257_v19 }
 0x13f   : > { %v1261_v21 = vpop.eup %1260  ;;  %795 = vst [vmem:[%s1425_s7 + $0x60] sm:$0xff] %v1259_v20 }
 0x140   : > { %v1263_v22 = vpop.eup %1262  ;;  %811 = vst [vmem:[%s1425_s7 + $0xe0] sm:$0xff] %v1261_v21 }
 0x141   : > { %v1265_v23 = vpop.eup %1264  ;;  %798 = vst [vmem:[%s1425_s7 + $0x78] sm:$0xff] %v1263_v22 }
 0x142   : > { %v1267_v25 = vpop.eup %1266  ;;  %814 = vst [vmem:[%s1425_s7 + $0xf8] sm:$0xff] %v1265_v23 }
 0x143   : > { %v1269_v26 = vpop.eup %1268  ;;  %796 = vst [vmem:[%s1425_s7 + $0x68] sm:$0xff] %v1267_v25 }
 0x144   : > { %812 = vst [vmem:[%s1425_s7 + $0xe8] sm:$0xff] %v1269_v26 }
 0x145 PF: > { %s13_s16 = sadd.s32 1, %s1308_s16   ;;  %s1491_s12 = smov %s1300_s14 }
 0x146   : > { %p10_p7 = scmp.ge.s32.totalorder %s13_s16, 10   ;;  %s1492_s13 = smov %s1304_s15 }
 0x147   : > { %s1493_s14 = smov %s1496_s17  ;;  %s1494_s15 = smov %s1500_s18 }
 0x148   :  { %12 = sbr.rel (!%p10_p7) target bundleno = 3 (0x3), region = 65 }

// kernel: vqvae_forward.19
= control target key start
LH: loop header
LB: loop body
LE: loop exit
PB: predicated region body
PF: predicated region fallthrough
CT: control target
= control target key end

     0   :  { %s159_s0 = inlined_call_operand.vmem [shape: f32[48,128], index: 0, kind: input, shape index: {}]   ;;  %s160_s1 = inlined_call_operand.vmem [shape: f32[48,128], index: 1, kind: input, shape index: {}]   ;;  %s161_s2 = inlined_call_operand.hbm [shape: f32[1,1], index: 2, kind: output, shape index: {}]  }
   0x1   :  { %v18_v0 = vld [vmem:[%s159_s0] sm:$0xff]  ;;  %v19_v1 = vld [vmem:[%s159_s0 + $0x8] sm:$0xff]  ;;  %v20_v2 = vld [vmem:[%s159_s0 + $0x10] sm:$0xff] }
   0x2   :  { %v21_v3 = vld [vmem:[%s159_s0 + $0x18] sm:$0xff]  ;;  %v22_v4 = vld [vmem:[%s159_s0 + $0x20] sm:$0xff]  ;;  %v25_v6 = vld [vmem:[%s160_s1 + $0x8] sm:$0xff] }
   0x3   :  { %v24_v5 = vld [vmem:[%s160_s1] sm:$0xff]  ;;  %v26_v7 = vld [vmem:[%s160_s1 + $0x10] sm:$0xff]  ;;  %v27_v8 = vld [vmem:[%s160_s1 + $0x18] sm:$0xff]  ;;  %v31_v11 = vsub.f32 %v19_v1, %v25_v6 }
   0x4   :  { %v28_v9 = vld [vmem:[%s160_s1 + $0x20] sm:$0xff]  ;;  %v30_v10 = vsub.f32 %v18_v0, %v24_v5  ;;  %v32_v12 = vsub.f32 %v20_v2, %v26_v7  ;;  %v23_v13 = vld [vmem:[%s159_s0 + $0x28] sm:$0xff]  ;;  %v33_v15 = vsub.f32 %v21_v3, %v27_v8 }
   0x5   :  { %v29_v14 = vld [vmem:[%s160_s1 + $0x28] sm:$0xff] }
   0x6   :  { %7 = vsyncpa [#allocation3], 0  ;;  %v34_v16 = vsub.f32 %v22_v4, %v28_v9  ;;  %v37_v17 = vmul.f32 %v30_v10, %v30_v10  ;;  %v38_v18 = vmul.f32 %v31_v11, %v31_v11  ;;  %v39_v19 = vmul.f32 %v32_v12, %v32_v12  ;;  %s102_s0 = smov [#allocation2]  }
   0x7   :  { %v35_v20 = vsub.f32 %v23_v13, %v29_v14  ;;  %v40_v21 = vmul.f32 %v33_v15, %v33_v15  ;;  %vm16_vm0 = vcmask 0   ;;  %v101_v29 = vmov 0.0   ;;  %s67_s1 = sshll.u32 %s102_s0, 4  ;;  %s68_s1 = int_to_ptr.vmem [resolvable:$true] %s67_s1 }
   0x8   :  { %v43_v22 = vadd.f32 %v38_v18, %v37_v17  ;;  %v41_v23 = vmul.f32 %v34_v16, %v34_v16  ;;  %17 = vst.msk [vmem:[#allocation2] sm:$0x1] %vm16_vm0, %v101_v29  ;;  %s79_s6 = scalar_lea.vmem %s68_s1, 16  ;;  %s83_s7 = scalar_lea.vmem %s68_s1, 32 }
   0x9   :  { %v42_v25 = vmul.f32 %v35_v20, %v35_v20  ;;  %p80_p0 = scmp.ne.s32.totalorder %s68_s1, %s79_s6  ;;  %p84_p1 = scmp.lt.s32.totalorder %s68_s1, %s68_s1 }
   0xa   :  { %v44_v24 = vadd.f32 %v43_v22, %v39_v19  ;;  %p85_p2 = scmp.lt.s32.totalorder %s83_s7, %s79_s6 }
   0xc   :  { %v45_v26 = vadd.f32 %v44_v24, %v40_v21  ;;  %p86_p3 = por %p85_p2, %p84_p1 }
   0xe   :  { %v46_v27 = vadd.f32 %v45_v26, %v41_v23  ;;  %p87_p4 = pnand %p86_p3, %p80_p0 }
   0xf   :  { %v36_v37 = vld [vmem:[#allocation2] sm:$0x1] }
  0x10   :  { %v47_v28 = vadd.f32 %v46_v27, %v42_v25 }
  0x12   :  { %48 = vadd.xlane.f32.xlu0 %v47_v28 }
  0x9b   :  { %v49_v30 = vpop.xlane.xlu0 %48 }
  0x9c   :  { %v50_v31 = vrot.slane %v49_v30, 4 }
  0x9e   :  { %v51_v32 = vadd.f32 %v50_v31, %v49_v30 }
  0xa0   :  { %v52_v33 = vrot.slane %v51_v32, 2 }
  0xa2   :  { %v53_v34 = vadd.f32 %v52_v33, %v51_v32 }
  0xa4   :  { %v54_v35 = vrot.slane %v53_v34, 1 }
  0xa6   :  { %v55_v36 = vadd.f32 %v54_v35, %v53_v34 }
  0xa8   :  { %75 = vpush %v55_v36 }
  0xd9   :  { %s76_s5 = spop %75 }
  0xda   :  { %v57_v38 = vstv %s76_s5 }
  0xdb   :  { %v58_v39 = vadd.f32 %v57_v38, %v36_v37 }
  0xdd   :  { %60 = vst.msk [vmem:[#allocation2] sm:$0x1] %vm16_vm0, %v58_v39 }
  0xde   :  { %90 = shalt.err (!%p87_p4)
}
  0xdf   :  { %70 = dma.vmem_to_hbm [thread:$0]  %s68_s1, 16, %s161_s2, [#allocation3]  }
  0xe0   :  { %99 = dma.done.wait [#allocation3], 16  }
  0xe1   :  { %100 = vsyncadd [#allocation3], 4294967280 }
  0xe2   :  { %74 = vsyncpa [#allocation3], 1 }

</bundles_post_ra>
